<compile_context>
chip_gen: v6e
topology: v6e:2x2x1
jax: 0.10.0
libtpu: 0.0.40
codegen_flags: <defaults>
</compile_context>

<pallas_src>
import functools

import jax
import jax.numpy as jnp
from jax.experimental import pallas as pl
from jax.experimental.pallas import tpu as pltpu

LANES = 128


def attention_kernel(x_ref, wqkv_ref, wout_ref, bout_ref, o_ref,
                     *, pp, n, heads, dim_head, scale):
    """One grid step: `pp` whole patches of `n` tokens each, features lane-padded."""
    inner = heads * dim_head
    dim_p = x_ref.shape[-1]
    cd = wqkv_ref.dtype                      # MXU operand dtype (bf16 by default)

    # (1, pp, n, dim_p) tile -> (pp*n, dim_p): leading-dims-only reshape (free).
    x = x_ref[0].reshape(pp * n, dim_p)

    # Fused QKV projection (bias-free), f32 accumulation on the MXU.
    qkv = jnp.dot(x, wqkv_ref[...], preferred_element_type=jnp.float32)  # (pp*n, 3*inner)

    # 128-lane-aligned q/k/v slices (inner == 128 here).  Softmax scale folded
    # into q once.  Reshapes below split leading dims only (no lane relayout).
    q = ((qkv[:, :inner] * scale).reshape(pp, n, inner)).astype(cd)
    k = qkv[:, inner:2 * inner].reshape(pp, n, inner)       # f32
    v = qkv[:, 2 * inner:].reshape(pp, n, inner)             # f32

    # Per-head attention via lane masking instead of 32-wide unaligned slices:
    # masking head h's lanes of k (resp. v) and contracting over all 128 lanes
    # yields exactly the per-head matmul (zeroed lanes contribute nothing),
    # and the PV result already sits in head h's lane block of the output slab
    # ('b p h n d -> b p n (h d)' needs no transpose / concatenate).
    lane = jax.lax.broadcasted_iota(jnp.int32, (1, 1, inner), 2)
    acc = jnp.zeros((pp, n, inner), jnp.float32)
    for h in range(heads):                   # small static unroll
        m_h = ((lane >= h * dim_head) & (lane < (h + 1) * dim_head)
               ).astype(jnp.float32)
        k_h = (k * m_h).astype(cd)
        v_h = (v * m_h).astype(cd)

        dots = jnp.einsum('pnc,pmc->pnm', q, k_h,
                          preferred_element_type=jnp.float32)   # (pp, n, n) f32
        dots = dots - jnp.max(dots, axis=-1, keepdims=True)     # stable softmax
        e = jnp.exp(dots)                                       # f32 (EUP)
        inv_l = pl.reciprocal(jnp.sum(e, axis=-1, keepdims=True),
                              approx=True)                      # EUP, no VALU divide
        p_h = (e * inv_l).astype(cd)
        acc = acc + jnp.einsum('pnm,pmc->pnc', p_h, v_h,
                               preferred_element_type=jnp.float32)

    out = acc.reshape(pp * n, inner)          # already head-major along lanes

    # Output projection + bias (added once; Dropout p=0.0 is identity).
    y = jnp.dot(out.astype(wout_ref.dtype), wout_ref[...],
                preferred_element_type=jnp.float32) + bout_ref[...]

    # Lane-dense (dim_p multiple of 128) unmasked store.
    o_ref[0] = y.reshape(pp, n, dim_p).astype(o_ref.dtype)


def attention(x, w_qkv, w_out, b_out, *, heads, dim_head,
              compute_dtype=jnp.bfloat16, patches_per_tile=None):
    """x: (b, p, n, dim); w_qkv: (dim, 3*inner); w_out: (inner, dim); b_out: (dim,)."""
    b, p, n, dim = x.shape
    inner = heads * dim_head
    assert w_qkv.shape == (dim, 3 * inner)
    assert w_out.shape == (inner, dim)
    assert b_out.shape == (dim,)
    scale = dim_head ** -0.5
    cd = x.dtype if compute_dtype is None else compute_dtype

    # ---- Lane-dense padding of the feature dim ------------------------------
    # Zero-pad features to a multiple of 128 so loads/stores are unmasked and
    # (.,dim) tiles don't waste 4x vreg/VMEM.  Padded W_out columns / b_out
    # entries are zero => padded output lanes are exactly zero; sliced off below.
    dim_p = max(LANES, ((dim + LANES - 1) // LANES) * LANES)
    if dim_p == dim:
        x_p = x.astype(cd)
        wqkv_p = w_qkv.astype(cd)
        wout_p = w_out.astype(cd)
        bout_p = b_out.reshape(1, dim).astype(jnp.float32)
    else:
        x_p = jnp.zeros((b, p, n, dim_p), cd).at[..., :dim].set(x.astype(cd))
        wqkv_p = jnp.zeros((dim_p, 3 * inner), cd).at[:dim, :].set(w_qkv.astype(cd))
        wout_p = jnp.zeros((inner, dim_p), cd).at[:, :dim].set(w_out.astype(cd))
        bout_p = jnp.zeros((1, dim_p), jnp.float32).at[0, :dim].set(
            b_out.astype(jnp.float32))

    # ---- Grid: batch x patch-groups (softmax is per patch, so whole patches
    # per tile).  >=4 steps here => >=2 steps per v7x TensorCore for pipelining;
    # on single-TC v5e/v6e the extra steps cost ~0.35us each (negligible).
    if patches_per_tile is None:
        patches_per_tile = 1
        while (patches_per_tile * 2 <= p
               and p % (patches_per_tile * 2) == 0
               and patches_per_tile * 2 * n <= 256
               and p // (patches_per_tile * 2) >= 2):
            patches_per_tile *= 2
    pp = patches_per_tile
    assert p % pp == 0
    grid = (b, p // pp)

    kernel = functools.partial(attention_kernel, pp=pp, n=n, heads=heads,
                               dim_head=dim_head, scale=scale)

    itemsize = jnp.dtype(cd).itemsize
    cost = pl.CostEstimate(
        flops=(2 * b * p * n * dim_p * 3 * inner            # qkv projection
               + 2 * 2 * b * p * heads * n * n * inner      # masked qk^T and pv
               + 2 * b * p * n * inner * dim_p),            # output projection
        transcendentals=b * p * heads * n * n,              # exp
        bytes_accessed=((b * p * n * dim_p + dim_p * 3 * inner + inner * dim_p)
                        * itemsize
                        + dim_p * 4
                        + b * p * n * dim_p * jnp.dtype(x.dtype).itemsize),
    )

    out_p = pl.pallas_call(
        kernel,
        out_shape=jax.ShapeDtypeStruct((b, p, n, dim_p), x.dtype),
        grid_spec=pltpu.PrefetchScalarGridSpec(
            num_scalar_prefetch=0,
            grid=grid,
            in_specs=[
                # Activations: pp whole patches per step, lane-dense feature dim.
                pl.BlockSpec((1, pp, n, dim_p), lambda i, j: (i, j, 0, 0)),
                # Grid-invariant weights/bias: single VMEM buffer (no pointless
                # double-buffering of data that never changes).
                pl.BlockSpec((dim_p, 3 * inner), lambda i, j: (0, 0),
                             pipeline_mode=pl.Buffered(1)),
                pl.BlockSpec((inner, dim_p), lambda i, j: (0, 0),
                             pipeline_mode=pl.Buffered(1)),
                pl.BlockSpec((1, dim_p), lambda i, j: (0, 0),
                             pipeline_mode=pl.Buffered(1)),
            ],
            out_specs=pl.BlockSpec((1, pp, n, dim_p), lambda i, j: (i, j, 0, 0)),
        ),
        compiler_params=pltpu.CompilerParams(
            dimension_semantics=("parallel", "parallel"),
            vmem_limit_bytes=32 * 1024 * 1024,   # explicit budget (v7x: 64 MiB phys)
        ),
        cost_estimate=cost,
    )(x_p, wqkv_p, wout_p, bout_p)

    return out_p[..., :dim]


def reference(x, w_qkv, w_out, b_out, *, heads, dim_head):
    b, p, n, dim = x.shape
    inner = heads * dim_head
    qkv = x @ w_qkv
    q, k, v = jnp.split(qkv, 3, axis=-1)

    def split_heads(t):  # 'b p n (h d) -> b p h n d'
        return t.reshape(b, p, n, heads, dim_head).transpose(0, 1, 3, 2, 4)

    q, k, v = map(split_heads, (q, k, v))
    dots = jnp.einsum('bphnd,bphmd->bphnm', q, k) * (dim_head ** -0.5)
    attn = jax.nn.softmax(dots, axis=-1)
    out = jnp.einsum('bphnm,bphmd->bphnd', attn, v)
    out = out.transpose(0, 1, 3, 2, 4).reshape(b, p, n, inner)
    return out @ w_out + b_out


if __name__ == "__main__":
    # Attention(dim=32, heads=4, dim_head=32, dropout=0.0); x: (b, p, n, dim).
    # project_out is True (heads != 1), so to_out = Linear(inner, dim) + Dropout(0).
    b, p, n, dim = 2, 4, 64, 32
    heads, dim_head = 4, 32
    inner = heads * dim_head

    key = jax.random.PRNGKey(0)
    kx, kq, ko, kb = jax.random.split(key, 4)
    x = jax.random.normal(kx, (b, p, n, dim), dtype=jnp.float32)
    # Deterministic init mimicking nn.Linear's uniform(-1/sqrt(fan_in), +1/sqrt(fan_in)).
    lim_qkv = 1.0 / (dim ** 0.5)
    lim_out = 1.0 / (inner ** 0.5)
    w_qkv = jax.random.uniform(kq, (dim, 3 * inner), jnp.float32, -lim_qkv, lim_qkv)
    w_out = jax.random.uniform(ko, (inner, dim), jnp.float32, -lim_out, lim_out)
    b_out = jax.random.uniform(kb, (dim,), jnp.float32, -lim_out, lim_out)

    out = attention(x, w_qkv, w_out, b_out, heads=heads, dim_head=dim_head)
    out = jax.block_until_ready(out)

    ref = reference(x, w_qkv, w_out, b_out, heads=heads, dim_head=dim_head)
    assert out.shape == (b, p, n, dim)
    err = float(jnp.max(jnp.abs(out - ref)))
    # bf16 MXU operands (f32 accumulation) + approx reciprocal => ~1e-2 tolerance.
    assert jnp.allclose(out, ref, atol=2e-2, rtol=2e-2), err
    print("KERNEL_OK")
</pallas_src>

<mosaic_0001>
module attributes {stable_mosaic.version = 11 : i64} {
  func.func @attention_kernel(%arg0: i32, %arg1: i32, %arg2: memref<1x2x64x128xbf16, #tpu.memory_space<vmem>>, %arg3: memref<128x384xbf16, #tpu.memory_space<vmem>>, %arg4: memref<128x128xbf16, #tpu.memory_space<vmem>>, %arg5: memref<1x128xf32, #tpu.memory_space<vmem>>, %arg6: memref<1x2x64x128xf32, #tpu.memory_space<vmem>>) attributes {dimension_semantics = [#tpu.dimension_semantics<parallel>, #tpu.dimension_semantics<parallel>], iteration_bounds = array<i64: 2, 2>, scalar_prefetch = 0 : i64, scratch_operands = 0 : i64, tpu.core_type = #tpu.core_type<tc>, window_params = [{transform_indices = @transform_0, window_bounds = array<i64: 1, 2, 64, 128>}, {pipeline_mode = #tpu.pipeline_mode<synchronous>, transform_indices = @transform_1, window_bounds = array<i64: 128, 384>}, {pipeline_mode = #tpu.pipeline_mode<synchronous>, transform_indices = @transform_2, window_bounds = array<i64: 128, 128>}, {pipeline_mode = #tpu.pipeline_mode<synchronous>, transform_indices = @transform_3, window_bounds = array<i64: 1, 128>}, {transform_indices = @transform_4, window_bounds = array<i64: 1, 2, 64, 128>}]} {
    %c0 = arith.constant 0 : index
    %c0_0 = arith.constant 0 : index
    %c0_1 = arith.constant 0 : index
    %c0_2 = arith.constant 0 : index
    %0 = vector.load %arg2[%c0, %c0_0, %c0_1, %c0_2] : memref<1x2x64x128xbf16, #tpu.memory_space<vmem>>, vector<1x2x64x128xbf16>
    %1 = vector.shape_cast %0 : vector<1x2x64x128xbf16> to vector<2x64x128xbf16>
    %2 = vector.shape_cast %1 : vector<2x64x128xbf16> to vector<128x128xbf16>
    %c0_3 = arith.constant 0 : index
    %c0_4 = arith.constant 0 : index
    %3 = vector.load %arg3[%c0_3, %c0_4] : memref<128x384xbf16, #tpu.memory_space<vmem>>, vector<128x384xbf16>
    %cst = arith.constant dense<0.000000e+00> : vector<128x384xf32>
    %4 = tpu.matmul %2, %3, %cst {dimension_numbers = #tpu.dot_dimension_numbers<[1], [0], [0], [1], [0, 0, 1, 1], [], []>} : vector<128x128xbf16>, vector<128x384xbf16>, vector<128x384xf32> -> vector<128x384xf32>
    %5 = vector.extract_strided_slice %4 {offsets = [0, 0], sizes = [128, 128], strides = [1, 1]} : vector<128x384xf32> to vector<128x128xf32>
    %cst_5 = arith.constant 0.176776692 : f32
    %6 = vector.broadcast %cst_5 : f32 to vector<128x128xf32>
    %7 = arith.mulf %5, %6 : vector<128x128xf32>
    %8 = vector.shape_cast %7 : vector<128x128xf32> to vector<2x64x128xf32>
    %9 = arith.truncf %8 : vector<2x64x128xf32> to vector<2x64x128xbf16>
    %10 = vector.extract_strided_slice %4 {offsets = [0, 128], sizes = [128, 128], strides = [1, 1]} : vector<128x384xf32> to vector<128x128xf32>
    %11 = vector.shape_cast %10 : vector<128x128xf32> to vector<2x64x128xf32>
    %12 = vector.extract_strided_slice %4 {offsets = [0, 256], sizes = [128, 128], strides = [1, 1]} : vector<128x384xf32> to vector<128x128xf32>
    %13 = vector.shape_cast %12 : vector<128x128xf32> to vector<2x64x128xf32>
    %14 = tpu.iota {dimensions = array<i32: 2>} : vector<1x1x128xi32>
    %cst_6 = arith.constant 0.000000e+00 : f32
    %15 = vector.broadcast %cst_6 : f32 to vector<2x64x128xf32>
    %c0_i32 = arith.constant 0 : i32
    %16 = vector.broadcast %c0_i32 : i32 to vector<1x1x128xi32>
    %17 = arith.cmpi sge, %14, %16 : vector<1x1x128xi32>
    %c32_i32 = arith.constant 32 : i32
    %18 = vector.broadcast %c32_i32 : i32 to vector<1x1x128xi32>
    %19 = arith.cmpi slt, %14, %18 : vector<1x1x128xi32>
    %20 = arith.andi %17, %19 : vector<1x1x128xi1>
    %21 = arith.extui %20 : vector<1x1x128xi1> to vector<1x1x128xi32>
    %22 = arith.sitofp %21 : vector<1x1x128xi32> to vector<1x1x128xf32>
    %23 = vector.broadcast %22 : vector<1x1x128xf32> to vector<2x64x128xf32>
    %24 = arith.mulf %11, %23 : vector<2x64x128xf32>
    %25 = arith.truncf %24 : vector<2x64x128xf32> to vector<2x64x128xbf16>
    %26 = vector.broadcast %22 : vector<1x1x128xf32> to vector<2x64x128xf32>
    %27 = arith.mulf %13, %26 : vector<2x64x128xf32>
    %28 = arith.truncf %27 : vector<2x64x128xf32> to vector<2x64x128xbf16>
    "tpu.trace_start"() <{level = 10 : i32, message = "pnc,pmc->pnm"}> : () -> ()
    %cst_7 = arith.constant dense<0.000000e+00> : vector<2x64x64xf32>
    %29 = tpu.matmul %9, %25, %cst_7 {dimension_numbers = #tpu.dot_dimension_numbers<[2], [2], [1], [1], [0, 0, 0, 1, 1, 1], [0], [0]>} : vector<2x64x128xbf16>, vector<2x64x128xbf16>, vector<2x64x64xf32> -> vector<2x64x64xf32>
    "tpu.trace_stop"() : () -> ()
    %cst_8 = arith.constant dense<0xFF800000> : vector<2x64xf32>
    %30 = vector.multi_reduction <maximumf>, %29, %cst_8 [2] : vector<2x64x64xf32> to vector<2x64xf32>
    %31 = vector.shape_cast %30 : vector<2x64xf32> to vector<2x64x1xf32>
    %32 = vector.broadcast %31 : vector<2x64x1xf32> to vector<2x64x64xf32>
    %33 = arith.subf %29, %32 : vector<2x64x64xf32>
    %34 = math.exp %33 : vector<2x64x64xf32>
    %cst_9 = arith.constant dense<0.000000e+00> : vector<2x64xf32>
    %35 = vector.multi_reduction <add>, %34, %cst_9 [2] : vector<2x64x64xf32> to vector<2x64xf32>
    %36 = vector.shape_cast %35 : vector<2x64xf32> to vector<2x64x1xf32>
    %37 = tpu.reciprocal %36 {approx = true} : vector<2x64x1xf32> -> vector<2x64x1xf32>
    %38 = vector.broadcast %37 : vector<2x64x1xf32> to vector<2x64x64xf32>
    %39 = arith.mulf %34, %38 : vector<2x64x64xf32>
    %40 = arith.truncf %39 : vector<2x64x64xf32> to vector<2x64x64xbf16>
    "tpu.trace_start"() <{level = 10 : i32, message = "pnm,pmc->pnc"}> : () -> ()
    %cst_10 = arith.constant dense<0.000000e+00> : vector<2x64x128xf32>
    %41 = tpu.matmul %40, %28, %cst_10 {dimension_numbers = #tpu.dot_dimension_numbers<[2], [1], [1], [2], [0, 0, 0, 1, 1, 2], [0], [0]>} : vector<2x64x64xbf16>, vector<2x64x128xbf16>, vector<2x64x128xf32> -> vector<2x64x128xf32>
    "tpu.trace_stop"() : () -> ()
    %42 = arith.addf %15, %41 : vector<2x64x128xf32>
    %c32_i32_11 = arith.constant 32 : i32
    %43 = vector.broadcast %c32_i32_11 : i32 to vector<1x1x128xi32>
    %44 = arith.cmpi sge, %14, %43 : vector<1x1x128xi32>
    %c64_i32 = arith.constant 64 : i32
    %45 = vector.broadcast %c64_i32 : i32 to vector<1x1x128xi32>
    %46 = arith.cmpi slt, %14, %45 : vector<1x1x128xi32>
    %47 = arith.andi %44, %46 : vector<1x1x128xi1>
    %48 = arith.extui %47 : vector<1x1x128xi1> to vector<1x1x128xi32>
    %49 = arith.sitofp %48 : vector<1x1x128xi32> to vector<1x1x128xf32>
    %50 = vector.broadcast %49 : vector<1x1x128xf32> to vector<2x64x128xf32>
    %51 = arith.mulf %11, %50 : vector<2x64x128xf32>
    %52 = arith.truncf %51 : vector<2x64x128xf32> to vector<2x64x128xbf16>
    %53 = vector.broadcast %49 : vector<1x1x128xf32> to vector<2x64x128xf32>
    %54 = arith.mulf %13, %53 : vector<2x64x128xf32>
    %55 = arith.truncf %54 : vector<2x64x128xf32> to vector<2x64x128xbf16>
    "tpu.trace_start"() <{level = 10 : i32, message = "pnc,pmc->pnm"}> : () -> ()
    %cst_12 = arith.constant dense<0.000000e+00> : vector<2x64x64xf32>
    %56 = tpu.matmul %9, %52, %cst_12 {dimension_numbers = #tpu.dot_dimension_numbers<[2], [2], [1], [1], [0, 0, 0, 1, 1, 1], [0], [0]>} : vector<2x64x128xbf16>, vector<2x64x128xbf16>, vector<2x64x64xf32> -> vector<2x64x64xf32>
    "tpu.trace_stop"() : () -> ()
    %cst_13 = arith.constant dense<0xFF800000> : vector<2x64xf32>
    %57 = vector.multi_reduction <maximumf>, %56, %cst_13 [2] : vector<2x64x64xf32> to vector<2x64xf32>
    %58 = vector.shape_cast %57 : vector<2x64xf32> to vector<2x64x1xf32>
    %59 = vector.broadcast %58 : vector<2x64x1xf32> to vector<2x64x64xf32>
    %60 = arith.subf %56, %59 : vector<2x64x64xf32>
    %61 = math.exp %60 : vector<2x64x64xf32>
    %cst_14 = arith.constant dense<0.000000e+00> : vector<2x64xf32>
    %62 = vector.multi_reduction <add>, %61, %cst_14 [2] : vector<2x64x64xf32> to vector<2x64xf32>
    %63 = vector.shape_cast %62 : vector<2x64xf32> to vector<2x64x1xf32>
    %64 = tpu.reciprocal %63 {approx = true} : vector<2x64x1xf32> -> vector<2x64x1xf32>
    %65 = vector.broadcast %64 : vector<2x64x1xf32> to vector<2x64x64xf32>
    %66 = arith.mulf %61, %65 : vector<2x64x64xf32>
    %67 = arith.truncf %66 : vector<2x64x64xf32> to vector<2x64x64xbf16>
    "tpu.trace_start"() <{level = 10 : i32, message = "pnm,pmc->pnc"}> : () -> ()
    %cst_15 = arith.constant dense<0.000000e+00> : vector<2x64x128xf32>
    %68 = tpu.matmul %67, %55, %cst_15 {dimension_numbers = #tpu.dot_dimension_numbers<[2], [1], [1], [2], [0, 0, 0, 1, 1, 2], [0], [0]>} : vector<2x64x64xbf16>, vector<2x64x128xbf16>, vector<2x64x128xf32> -> vector<2x64x128xf32>
    "tpu.trace_stop"() : () -> ()
    %69 = arith.addf %42, %68 : vector<2x64x128xf32>
    %c64_i32_16 = arith.constant 64 : i32
    %70 = vector.broadcast %c64_i32_16 : i32 to vector<1x1x128xi32>
    %71 = arith.cmpi sge, %14, %70 : vector<1x1x128xi32>
    %c96_i32 = arith.constant 96 : i32
    %72 = vector.broadcast %c96_i32 : i32 to vector<1x1x128xi32>
    %73 = arith.cmpi slt, %14, %72 : vector<1x1x128xi32>
    %74 = arith.andi %71, %73 : vector<1x1x128xi1>
    %75 = arith.extui %74 : vector<1x1x128xi1> to vector<1x1x128xi32>
    %76 = arith.sitofp %75 : vector<1x1x128xi32> to vector<1x1x128xf32>
    %77 = vector.broadcast %76 : vector<1x1x128xf32> to vector<2x64x128xf32>
    %78 = arith.mulf %11, %77 : vector<2x64x128xf32>
    %79 = arith.truncf %78 : vector<2x64x128xf32> to vector<2x64x128xbf16>
    %80 = vector.broadcast %76 : vector<1x1x128xf32> to vector<2x64x128xf32>
    %81 = arith.mulf %13, %80 : vector<2x64x128xf32>
    %82 = arith.truncf %81 : vector<2x64x128xf32> to vector<2x64x128xbf16>
    "tpu.trace_start"() <{level = 10 : i32, message = "pnc,pmc->pnm"}> : () -> ()
    %cst_17 = arith.constant dense<0.000000e+00> : vector<2x64x64xf32>
    %83 = tpu.matmul %9, %79, %cst_17 {dimension_numbers = #tpu.dot_dimension_numbers<[2], [2], [1], [1], [0, 0, 0, 1, 1, 1], [0], [0]>} : vector<2x64x128xbf16>, vector<2x64x128xbf16>, vector<2x64x64xf32> -> vector<2x64x64xf32>
    "tpu.trace_stop"() : () -> ()
    %cst_18 = arith.constant dense<0xFF800000> : vector<2x64xf32>
    %84 = vector.multi_reduction <maximumf>, %83, %cst_18 [2] : vector<2x64x64xf32> to vector<2x64xf32>
    %85 = vector.shape_cast %84 : vector<2x64xf32> to vector<2x64x1xf32>
    %86 = vector.broadcast %85 : vector<2x64x1xf32> to vector<2x64x64xf32>
    %87 = arith.subf %83, %86 : vector<2x64x64xf32>
    %88 = math.exp %87 : vector<2x64x64xf32>
    %cst_19 = arith.constant dense<0.000000e+00> : vector<2x64xf32>
    %89 = vector.multi_reduction <add>, %88, %cst_19 [2] : vector<2x64x64xf32> to vector<2x64xf32>
    %90 = vector.shape_cast %89 : vector<2x64xf32> to vector<2x64x1xf32>
    %91 = tpu.reciprocal %90 {approx = true} : vector<2x64x1xf32> -> vector<2x64x1xf32>
    %92 = vector.broadcast %91 : vector<2x64x1xf32> to vector<2x64x64xf32>
    %93 = arith.mulf %88, %92 : vector<2x64x64xf32>
    %94 = arith.truncf %93 : vector<2x64x64xf32> to vector<2x64x64xbf16>
    "tpu.trace_start"() <{level = 10 : i32, message = "pnm,pmc->pnc"}> : () -> ()
    %cst_20 = arith.constant dense<0.000000e+00> : vector<2x64x128xf32>
    %95 = tpu.matmul %94, %82, %cst_20 {dimension_numbers = #tpu.dot_dimension_numbers<[2], [1], [1], [2], [0, 0, 0, 1, 1, 2], [0], [0]>} : vector<2x64x64xbf16>, vector<2x64x128xbf16>, vector<2x64x128xf32> -> vector<2x64x128xf32>
    "tpu.trace_stop"() : () -> ()
    %96 = arith.addf %69, %95 : vector<2x64x128xf32>
    %c96_i32_21 = arith.constant 96 : i32
    %97 = vector.broadcast %c96_i32_21 : i32 to vector<1x1x128xi32>
    %98 = arith.cmpi sge, %14, %97 : vector<1x1x128xi32>
    %c128_i32 = arith.constant 128 : i32
    %99 = vector.broadcast %c128_i32 : i32 to vector<1x1x128xi32>
    %100 = arith.cmpi slt, %14, %99 : vector<1x1x128xi32>
    %101 = arith.andi %98, %100 : vector<1x1x128xi1>
    %102 = arith.extui %101 : vector<1x1x128xi1> to vector<1x1x128xi32>
    %103 = arith.sitofp %102 : vector<1x1x128xi32> to vector<1x1x128xf32>
    %104 = vector.broadcast %103 : vector<1x1x128xf32> to vector<2x64x128xf32>
    %105 = arith.mulf %11, %104 : vector<2x64x128xf32>
    %106 = arith.truncf %105 : vector<2x64x128xf32> to vector<2x64x128xbf16>
    %107 = vector.broadcast %103 : vector<1x1x128xf32> to vector<2x64x128xf32>
    %108 = arith.mulf %13, %107 : vector<2x64x128xf32>
    %109 = arith.truncf %108 : vector<2x64x128xf32> to vector<2x64x128xbf16>
    "tpu.trace_start"() <{level = 10 : i32, message = "pnc,pmc->pnm"}> : () -> ()
    %cst_22 = arith.constant dense<0.000000e+00> : vector<2x64x64xf32>
    %110 = tpu.matmul %9, %106, %cst_22 {dimension_numbers = #tpu.dot_dimension_numbers<[2], [2], [1], [1], [0, 0, 0, 1, 1, 1], [0], [0]>} : vector<2x64x128xbf16>, vector<2x64x128xbf16>, vector<2x64x64xf32> -> vector<2x64x64xf32>
    "tpu.trace_stop"() : () -> ()
    %cst_23 = arith.constant dense<0xFF800000> : vector<2x64xf32>
    %111 = vector.multi_reduction <maximumf>, %110, %cst_23 [2] : vector<2x64x64xf32> to vector<2x64xf32>
    %112 = vector.shape_cast %111 : vector<2x64xf32> to vector<2x64x1xf32>
    %113 = vector.broadcast %112 : vector<2x64x1xf32> to vector<2x64x64xf32>
    %114 = arith.subf %110, %113 : vector<2x64x64xf32>
    %115 = math.exp %114 : vector<2x64x64xf32>
    %cst_24 = arith.constant dense<0.000000e+00> : vector<2x64xf32>
    %116 = vector.multi_reduction <add>, %115, %cst_24 [2] : vector<2x64x64xf32> to vector<2x64xf32>
    %117 = vector.shape_cast %116 : vector<2x64xf32> to vector<2x64x1xf32>
    %118 = tpu.reciprocal %117 {approx = true} : vector<2x64x1xf32> -> vector<2x64x1xf32>
    %119 = vector.broadcast %118 : vector<2x64x1xf32> to vector<2x64x64xf32>
    %120 = arith.mulf %115, %119 : vector<2x64x64xf32>
    %121 = arith.truncf %120 : vector<2x64x64xf32> to vector<2x64x64xbf16>
    "tpu.trace_start"() <{level = 10 : i32, message = "pnm,pmc->pnc"}> : () -> ()
    %cst_25 = arith.constant dense<0.000000e+00> : vector<2x64x128xf32>
    %122 = tpu.matmul %121, %109, %cst_25 {dimension_numbers = #tpu.dot_dimension_numbers<[2], [1], [1], [2], [0, 0, 0, 1, 1, 2], [0], [0]>} : vector<2x64x64xbf16>, vector<2x64x128xbf16>, vector<2x64x128xf32> -> vector<2x64x128xf32>
    "tpu.trace_stop"() : () -> ()
    %123 = arith.addf %96, %122 : vector<2x64x128xf32>
    %124 = vector.shape_cast %123 : vector<2x64x128xf32> to vector<128x128xf32>
    %125 = arith.truncf %124 : vector<128x128xf32> to vector<128x128xbf16>
    %c0_26 = arith.constant 0 : index
    %c0_27 = arith.constant 0 : index
    %126 = vector.load %arg4[%c0_26, %c0_27] : memref<128x128xbf16, #tpu.memory_space<vmem>>, vector<128x128xbf16>
    %cst_28 = arith.constant dense<0.000000e+00> : vector<128x128xf32>
    %127 = tpu.matmul %125, %126, %cst_28 {dimension_numbers = #tpu.dot_dimension_numbers<[1], [0], [0], [1], [0, 0, 1, 1], [], []>} : vector<128x128xbf16>, vector<128x128xbf16>, vector<128x128xf32> -> vector<128x128xf32>
    %c0_29 = arith.constant 0 : index
    %c0_30 = arith.constant 0 : index
    %128 = vector.load %arg5[%c0_29, %c0_30] : memref<1x128xf32, #tpu.memory_space<vmem>>, vector<1x128xf32>
    %129 = vector.broadcast %128 : vector<1x128xf32> to vector<128x128xf32>
    %130 = arith.addf %127, %129 : vector<128x128xf32>
    %131 = vector.shape_cast %130 : vector<128x128xf32> to vector<2x64x128xf32>
    %c0_31 = arith.constant 0 : index
    %c0_32 = arith.constant 0 : index
    %c0_33 = arith.constant 0 : index
    %c0_34 = arith.constant 0 : index
    %132 = vector.load %arg6[%c0_31, %c0_32, %c0_33, %c0_34] : memref<1x2x64x128xf32, #tpu.memory_space<vmem>>, vector<1x2x64x128xf32>
    %133 = vector.shape_cast %132 : vector<1x2x64x128xf32> to vector<2x64x128xf32>
    %134 = vector.shape_cast %131 : vector<2x64x128xf32> to vector<1x2x64x128xf32>
    tpu.vector_store %arg6[%c0_31, %c0_32, %c0_33, %c0_34], %134 {strides = array<i32>} : memref<1x2x64x128xf32, #tpu.memory_space<vmem>>, vector<1x2x64x128xf32>,
    return
  }
  func.func @transform_0(%arg0: i32, %arg1: i32) -> (i32, i32, i32, i32) {
    %c0_i32 = arith.constant 0 : i32
    %c0_i32_0 = arith.constant 0 : i32
    %c0_i32_1 = arith.constant 0 : i32
    return %arg0, %arg1, %c0_i32, %c0_i32_0 : i32, i32, i32, i32
  }
  func.func @transform_1(%arg0: i32, %arg1: i32) -> (i32, i32) {
    %c0_i32 = arith.constant 0 : i32
    %c0_i32_0 = arith.constant 0 : i32
    %c0_i32_1 = arith.constant 0 : i32
    return %c0_i32, %c0_i32_0 : i32, i32
  }
  func.func @transform_2(%arg0: i32, %arg1: i32) -> (i32, i32) {
    %c0_i32 = arith.constant 0 : i32
    %c0_i32_0 = arith.constant 0 : i32
    %c0_i32_1 = arith.constant 0 : i32
    return %c0_i32, %c0_i32_0 : i32, i32
  }
  func.func @transform_3(%arg0: i32, %arg1: i32) -> (i32, i32) {
    %c0_i32 = arith.constant 0 : i32
    %c0_i32_0 = arith.constant 0 : i32
    %c0_i32_1 = arith.constant 0 : i32
    return %c0_i32, %c0_i32_0 : i32, i32
  }
  func.func @transform_4(%arg0: i32, %arg1: i32) -> (i32, i32, i32, i32) {
    %c0_i32 = arith.constant 0 : i32
    %c0_i32_0 = arith.constant 0 : i32
    %c0_i32_1 = arith.constant 0 : i32
    return %arg0, %arg1, %c0_i32, %c0_i32_0 : i32, i32, i32, i32
  }
}

</mosaic_0001>

<bundles_post_ra>
// kernel: tpu_custom_call.1
= control target key start
LH: loop header
LB: loop body
LE: loop exit
PB: predicated region body
PF: predicated region fallthrough
CT: control target
= control target key end

     0   :  { %s6047_s0 = inlined_call_operand.hbm [shape: bf16[2,4,64,128], index: 0, kind: input, shape index: {}]   ;;  %s6048_s1 = inlined_call_operand.hbm [shape: bf16[128,384], index: 1, kind: input, shape index: {}]   ;;  %s6049_s2 = inlined_call_operand.hbm [shape: bf16[128,128], index: 2, kind: input, shape index: {}]   ;;  %s6050_s3 = inlined_call_operand.vmem [shape: f32[1,128], index: 3, kind: input, shape index: {}]   ;;  %s6051_s4 = inlined_call_operand.hbm [shape: f32[2,4,64,128], index: 4, kind: output, shape index: {}]  }
   0x1   :  { %6097 = sst [smem:[#allocation64_spill]] %s6048_s1 }
   0x2   :  { %6098 = sst [smem:[#allocation65_spill]] %s6049_s2 }
   0x3   :  { %6099 = sst [smem:[#allocation66_spill]] %s6051_s4 }
   0x4   :  { %9 = vsyncpa [#allocation3], 0 }
   0x5   :  { %11 = vsyncpa [#allocation3 + $0x1], 0 }
   0x6   :  { %12 = vsyncpa [#allocation6], 0 }
   0x7   :  { %13 = vsyncpa [#allocation4], 0 }
   0x8   :  { %15 = vsyncpa [#allocation4 + $0x1], 0  ;;  %s4390_s15 = smov 0   ;;  %s4392_s16 = smov 0  }
   0x9   :  { %s4394_s17 = smov 0   ;;  %s4396_s18 = smov 0  }
   0xa   :  { %s4398_s19 = smov 0   ;;  %s4400_s20 = smov 0  }
   0xb   :  { %s4402_s21 = smov 0   ;;  %s4404_s22 = smov 0  }
   0xc LB: > { %6100 = sst [smem:[#allocation12_spill]] %s4323_s15  ;;  %s3162_s23 = sadd.s32 4294967295, %s4351_s22   ;;  %s4351_s22 = sphi %s4404_s22, %s21_s22   ;;  %s4347_s21 = sphi %s4402_s21, %s6247_s21   ;;  %s4343_s20 = sphi %s4400_s20, %s6246_s20   ;;  %s4339_s19 = sphi %s4398_s19, %s6245_s19   ;;  %s4335_s18 = sphi %s4396_s18, %s6244_s18   ;;  %s4331_s17 = sphi %s4394_s17, %s6243_s17   ;;  %s4327_s16 = sphi %s4392_s16, %s6242_s16   ;;  %s4323_s15 = sphi %s4390_s15, %s6241_s15  }
   0xd   : > { %s3163_s24 = sadd.s32 4294967294, %s4351_s22   ;;  %p55_p0 = scmp.ne.s32.totalorder %s4327_s16, %s4323_s15 }
   0xe   : > { %p4434_p1 = scmp.eq.s32.totalorder %s3162_s23, 0  ;;  %p4438_p2 = scmp.eq.s32.totalorder %s3162_s23, 3 }
   0xf   : > { %p150_p3 = scmp.eq.s32.totalorder %s3163_s24, 3  ;;  %p3164_p5 = scmp.ge.s32.totalorder %s4351_s22, 1 }
  0x10   : > { %s6101_s25 = scalar_select %p4434_p1, 1, 0 }
  0x11   : > { %p4444_p4 = por %p4434_p1, %p55_p0  ;;  %p4449_p6 = por %p150_p3, %p55_p0 }
  0x12   : > { %p157_p7 = scmp.lt.s32.totalorder %s4351_s22, 5  ;;  %s4353_s30 = smov [#allocation5]  }
  0x13   : > { %s6103_s27 = scalar_select %p4444_p4, 1, 0 }
  0x14   : > { %s6104_s28 = scalar_select %p4449_p6, 1, 0 }
  0x15   : > { %p4454_p8 = pnand %p3164_p5, %p157_p7  ;;  %s169_s5 = sshll.u32 %s4353_s30, 4  ;;  %s170_s5 = int_to_ptr.vmem [resolvable:$true] %s169_s5 }
  0x16   : > { %6105 = sst [smem:[#allocation13_spill]] %s6104_s28  ;;  %s4354_s7 = smov [#allocation7]  }
  0x17   : > { %p3772_p9 = pneg %p4454_p8  ;;  %s182_s8 = sshll.u32 %s4354_s7, 4  ;;  %s183_s8 = int_to_ptr.vmem [resolvable:$true] %s182_s8 }
  0x18   : > { %s4182_s9 = scalar_lea.vmem %s170_s5, 3072  ;;  %p4190_p3 = scmp.lt.s32.totalorder %s170_s5, %s170_s5 }
  0x19   : > { %p4462_p10 = pnand %p3772_p9, %p4434_p1  ;;  %p4183_p12 = scmp.ne.s32.totalorder %s170_s5, %s4182_s9 }
  0x1a   : > { %p4191_p5 = scmp.lt.s32.totalorder %s4182_s9, %s4182_s9 }
  0x1b   : > { %p4173_p11 = pneg %p4462_p10 }
  0x1c   : > { %p4192_p7 = por %p4191_p5, %p4190_p3 }
  0x1d   : > { %p4185_p13 = pnand %p4183_p12, %p4173_p11 }
  0x1f   : > { %p4186_p0 = pneg %p4185_p13 }
  0x21   : > { %p4193_p9 = pnand %p4192_p7, %p4186_p0 }
  0x23   : > { %4196 = shalt.err (!%p4193_p9)
}
  0x24   : > { %s4355_s10 = smov 192   ;;  %s4356_s11 = smov 12  }
  0x25   : > { %s6108_s1 = sld [smem:[#allocation64_spill]]  ;;  %s4208_s14 = scalar_lea.vmem %s183_s8, 1024 }
  0x26   : > { %p4209_p6 = scmp.ne.s32.totalorder %s183_s8, %s4208_s14  ;;  %p4216_p1 = scmp.lt.s32.totalorder %s183_s8, %s183_s8 }
  0x27   : > { %p4217_p4 = scmp.lt.s32.totalorder %s4208_s14, %s4208_s14 }
  0x28   : > { %p4211_p12 = pnand %p4209_p6, %p4173_p11 }
  0x29   : > { %p4218_p3 = por %p4217_p4, %p4216_p1 }
  0x2a   : > { %p4212_p13 = pneg %p4211_p12 }
  0x2b   : > { %3775 = dma.hbm_to_vmem [thread:$0]  (!%p4462_p10), %s6108_s1, 3072, %s170_s5, [#allocation6], %s4355_s10, %s4355_s10, %s4356_s11  }
  0x2c   : > { %p4219_p0 = pnand %p4218_p3, %p4212_p13 }
  0x2e   : > { %4222 = shalt.err (!%p4219_p0)
}
  0x2f   : > { %s6055_s23 = smov 64   ;;  %s6056_s24 = smov 4  }
  0x30   : > { %s6109_s2 = sld [smem:[#allocation65_spill]]  ;;  %s30_s7 = sadd.s32 1, %s4343_s20 }
  0x31   : > { %s33_s9 = sadd.s32 1, %s4347_s21  ;;  %p31_p1 = scmp.ge.s32.totalorder %s30_s7, 2 }
  0x32   : > { %s42_s10 = sadd.s32 1, %s4331_s17  ;;  %p49_p4 = scmp.ne.s32.totalorder %s4331_s17, %s4327_s16 }
  0x33   : > { %p50_p6 = scmp.eq.s32.totalorder %s4351_s22, 0  ;;  %s6249_s7 = smov (%p31_p1, %s30_s7), 0 }
  0x34   : > { %6110 = sst [smem:[#allocation14_spill]] %s6249_s7  ;;  %s6251_s9 = smov (!%p31_p1, %s33_s9), %s4347_s21 }
  0x35   : > { %s38_s6 = ssub.s32 %s4343_s20, %s6249_s7  ;;  %p4498_p11 = por %p50_p6, %p49_p4 }
  0x36   : > { %3778 = dma.hbm_to_vmem [thread:$0]  (!%p4462_p10), %s6109_s2, 1024, %s183_s8, [#allocation6], %s6055_s23, %s6055_s23, %s6056_s24  }
  0x37   : > { %p35_p10 = scmp.ge.s32.totalorder %s6251_s9, 2  ;;  %p4504_p5 = por %p4438_p2, %p49_p4 }
  0x38   : > { %p3789_p7 = scmp.lt.s32.totalorder %s4351_s22, 4  ;;  %s199_s12 = sand.u32 1, %s4331_s17  }
  0x39   : > { %s6112_s8 = scalar_select %p4504_p5, 1, 0 }
  0x3a   : > { %s6253_s9 = smov (%p35_p10, %s6251_s9), 0  ;;  %s3168_s13 = sshll.u32 %s199_s12, 6 }
  0x3b   : > { %6113 = sst [smem:[#allocation15_spill]] %s6112_s8  ;;  %s37_s14 = ssub.s32 %s4347_s21, %s6253_s9 }
  0x3c   : > { %s39_s30 = sor.u32 %s38_s6, %s37_s14  ;;  %s3262_s5 = sshll.u32 %s4343_s20, 4 }
  0x3d   : > { %p40_p9 = scmp.eq.s32.totalorder %s39_s30, 0  ;;  %s3171_s23 = sshll.u32 %s4347_s21, 5 }
  0x3e   : > { %s210_s24 = sadd.s32 %s3262_s5, %s3171_s23  ;;  %s203_s1 = scalar_lea.vmem [#allocation2], %s3168_s13 }
  0x3f   : > { %s213_s26 = sshll.u32 %s203_s1, 4  ;;  %s3172_s7 = sshll.u32 %s210_s24, 6  ;;  %s214_s26 = int_to_ptr.vmem [resolvable:$true] %s213_s26 }
  0x40   : > { %s4517_s2 = scalar_select %p40_p9, %s4331_s17, %s42_s10  }
  0x41   : > { %s212_s4 = scalar_lea.hbm %s6047_s0, %s3172_s7  ;;  %p4526_p2 = pnand %p3789_p7, %p4498_p11 }
  0x42   : > { %s200_s6 = scalar_lea.sflag [#allocation3], %s199_s12  ;;  %s4236_s23 = scalar_lea.vmem %s214_s26, 1024 }
  0x43   : > { %p4225_p12 = pneg %p4526_p2  ;;  %p4237_p13 = scmp.ne.s32.totalorder %s214_s26, %s4236_s23 }
  0x44   : > { %s4359_s1 = smov [#allocation2]  }
  0x45   : > { %p4239_p3 = pnand %p4237_p13, %p4225_p12  ;;  %s4241_s24 = sshll.u32 %s4359_s1, 4  ;;  %s4242_s24 = int_to_ptr.vmem [resolvable:$false] %s4241_s24 }
  0x46   : > { %s4243_s10 = scalar_lea.vmem %s4242_s24, 2048  ;;  %p4244_p1 = scmp.lt.s32.totalorder %s214_s26, %s4242_s24 }
  0x47   : > { %p4240_p0 = pneg %p4239_p3  ;;  %p4245_p4 = scmp.lt.s32.totalorder %s4243_s10, %s4236_s23 }
  0x49   : > { %p4246_p6 = por %p4245_p4, %p4244_p1 }
  0x4b   : > { %p4247_p10 = pnand %p4246_p6, %p4240_p0 }
  0x4d   : > { %4250 = shalt.err (!%p4247_p10)
}
  0x4e   : > { %s6115_s15 = smov 4   ;;  %s6116_s28 = smov 64  }
  0x4f   : > { %3782 = dma.hbm_to_vmem [thread:$0]  (!%p4526_p2), %s212_s4, 1024, %s214_s26, %s200_s6, %s6116_s28, %s6116_s28, %s6115_s15  }
  0x50   : > { %225 = sbr.rel (%p4454_p8) target bundleno = 2498 (0x9c2), region = 36 }
  0x55   : > { %s4540_s7 = sand.u32 1, %s4327_s16   ;;  %p6117_p11 = scmp.ne.s32.totalorder %s6103_s27, 0 }
  0x56   : > { %s3174_s11 = sshll.u32 %s4540_s7, 6  ;;  %s228_s12 = scalar_lea.sflag [#allocation3], %s4540_s7 }
  0x57   : > { %s4544_s13 = scalar_lea.vmem [#allocation2], %s3174_s11 }
  0x58   : > { %4310 = dma.done.wait (%p6117_p11), %s228_s12, 1024  }
  0x59   : > { %4312 = vsyncadd (%p6117_p11), %s228_s12, 4294966272  ;;  %p6118_p7 = scmp.ne.s32.totalorder %s6101_s25, 0 }
  0x5b   : > { %4314 = dma.done.wait (%p6118_p7), [#allocation6], 4096  }
  0x5c   : > { %4316 = vsyncadd (%p6118_p7), [#allocation6], 4294963200  ;;  %v4360_v0 = vmov 0   ;;  %v3867_v1 = vld [vmem:[#allocation5 + $0xac] ss:$12 sps:$4 sm:$0xff]   ;;  %v3891_v18 = vld [vmem:[%s4544_s13] sm:$0xff]   ;;  %v725_v33 = vlaneseq }
  0x5d   : > { %523 = vmatprep.mubr.bf16.mxu0 %v4360_v0  ;;  %563 = vmatprep.mubr.bf16.mxu1 %v4360_v0  ;;  %v3869_v2 = vld [vmem:[#allocation5 + $0xa8] ss:$12 sps:$4 sm:$0xff]   ;;  %v3872_v4 = vld [vmem:[#allocation5 + $0x90] ss:$12 sps:$4 sm:$0xff]   ;;  %v3875_v6 = vld [vmem:[#allocation5 + $0x78] ss:$12 sps:$4 sm:$0xff]  }
  0x5e   : > { %491 = vmatprep.subr.bf16.mxu0 %v3867_v1  ;;  %3744 = vmatprep.subr.bf16.mxu1 %v3867_v1  ;;  %v3870_v3 = vld [vmem:[#allocation5 + $0x94] ss:$12 sps:$4 sm:$0xff]   ;;  %v3873_v5 = vld [vmem:[#allocation5 + $0x7c] ss:$12 sps:$4 sm:$0xff]   ;;  %v3876_v7 = vld [vmem:[#allocation5 + $0x64] ss:$12 sps:$4 sm:$0xff]  }
  0x5f   : > { %492 = vmatpush1.bf16.msra.mxu0 %v3869_v2  ;;  %3752 = vmatpush1.bf16.msra.mxu1 %v3869_v2  ;;  %v3878_v8 = vld [vmem:[#allocation5 + $0x60] ss:$12 sps:$4 sm:$0xff]   ;;  %v3881_v10 = vld [vmem:[#allocation5 + $0x48] ss:$12 sps:$4 sm:$0xff]   ;;  %v3884_v12 = vld [vmem:[#allocation5 + $0x30] ss:$12 sps:$4 sm:$0xff]  }
  0x60   : > { %493 = vmatprep.subr.bf16.mxu0 %v3870_v3  ;;  %3745 = vmatprep.subr.bf16.mxu1 %v3870_v3  ;;  %v3879_v9 = vld [vmem:[#allocation5 + $0x4c] ss:$12 sps:$4 sm:$0xff]   ;;  %v3882_v11 = vld [vmem:[#allocation5 + $0x34] ss:$12 sps:$4 sm:$0xff]   ;;  %v3885_v13 = vld [vmem:[#allocation5 + $0x1c] ss:$12 sps:$4 sm:$0xff]  }
  0x61   : > { %v3887_v14 = vld [vmem:[#allocation5 + $0x18] ss:$12 sps:$4 sm:$0xff]   ;;  %v3890_v16 = vld [vmem:[#allocation5] ss:$12 sps:$4 sm:$0xff]   ;;  %v3899_v17 = vld [vmem:[#allocation5 + $0xb0] ss:$12 sps:$4 sm:$0xff]  }
  0x62   : > { %v3888_v15 = vld [vmem:[#allocation5 + $0x4] ss:$12 sps:$4 sm:$0xff]   ;;  %v3901_v21 = vld [vmem:[#allocation5 + $0x80] ss:$12 sps:$4 sm:$0xff]   ;;  %v3902_v24 = vld [vmem:[#allocation5 + $0x68] ss:$12 sps:$4 sm:$0xff]  }
  0x63   : > { %494 = vmatpush1.bf16.msra.mxu0 %v3872_v4  ;;  %3753 = vmatpush1.bf16.msra.mxu1 %v3872_v4  ;;  %v3892_v19 = vld [vmem:[%s4544_s13 + $0x20] sm:$0xff]   ;;  %v3893_v22 = vld [vmem:[%s4544_s13 + $0x8] sm:$0xff]   ;;  %v3903_v25 = vld [vmem:[#allocation5 + $0x50] ss:$12 sps:$4 sm:$0xff]   ;;  %v4570_v34 = vand.u32 127, %v725_v33  ;;  %v4361_v35 = vmov 0.0  }
  0x64   : > { %495 = vmatprep.subr.bf16.mxu0 %v3873_v5  ;;  %3746 = vmatprep.subr.bf16.mxu1 %v3873_v5  ;;  %v3900_v20 = vld [vmem:[#allocation5 + $0x98] ss:$12 sps:$4 sm:$0xff]   ;;  %v3894_v23 = vld [vmem:[%s4544_s13 + $0x28] sm:$0xff]   ;;  %v3895_v26 = vld [vmem:[%s4544_s13 + $0x10] sm:$0xff]   ;;  %vm910_vm8 = vcmask 523264   ;;  %s3177_s4 = sshll.u32 %s4540_s7, 7 }
  0x65   : > { %v3896_v27 = vld [vmem:[%s4544_s13 + $0x30] sm:$0xff]   ;;  %v3904_v28 = vld [vmem:[#allocation5 + $0x38] ss:$12 sps:$4 sm:$0xff]   ;;  %v3905_v29 = vld [vmem:[#allocation5 + $0x20] ss:$12 sps:$4 sm:$0xff]   ;;  %vm1770_vm0 = vcmp.ge.s32.totalorder %v4570_v34, 64 }
  0x66   : > { %v3897_v30 = vld [vmem:[%s4544_s13 + $0x18] sm:$0xff]   ;;  %v3906_v32 = vld [vmem:[#allocation5 + $0x8] ss:$12 sps:$4 sm:$0xff]   ;;  %vm1771_vm1 = vcmp.lt.s32.totalorder %v4570_v34, 96  ;;  %vm2307_vm2 = vcmp.ge.s32.totalorder %v4570_v34, 96  ;;  %vm1095_vm4 = vcmp.ge.s32.totalorder %v4570_v34, 32 }
  0x67   : > { %496 = vmatpush1.bf16.msra.mxu0 %v3875_v6  ;;  %3754 = vmatpush1.bf16.msra.mxu1 %v3875_v6  ;;  %v3898_v31 = vld [vmem:[%s4544_s13 + $0x38] sm:$0xff]   ;;  %vm1772_vm3 = vmand %vm1770_vm0, %vm1771_vm1  ;;  %v4576_v36 = vsel %vm2307_vm2, 1.0, %v4361_v35  ;;  %vm1096_vm5 = vcmp.lt.s32.totalorder %v4570_v34, 64  ;;  %vm728_vm7 = vcmp.lt.s32.totalorder %v4570_v34, 32  ;;  %s5968_s29 = scalar_lea.vmem [#allocation8], %s3177_s4  ;;  %s3263_s8 = sshll.u32 %s4335_s18, 4 }
  0x68   : > { %497 = vmatprep.subr.bf16.mxu0 %v3876_v7  ;;  %3747 = vmatprep.subr.bf16.mxu1 %v3876_v7  ;;  %v4579_v37 = vsel %vm1772_vm3, 1.0, %v4361_v35  ;;  %vm1097_vm6 = vmand %vm1095_vm4, %vm1096_vm5  ;;  %v4730_v34 = vsel %vm728_vm7, 1.0, %v4361_v35  ;;  %s3258_s14 = sshll.u32 %s4339_s19, 5  ;;  %s3053_s6 = sshll.u32 %s5968_s29, 4  ;;  %s5992_s6 = int_to_ptr.vmem [resolvable:$true] %s3053_s6 }
  0x69   : > { %v4592_v45 = vsel %vm1097_vm6, 1.0, %v4361_v35  ;;  %s3050_s30 = sadd.s32 %s3263_s8, %s3258_s14  ;;  %s6236_s23 = sld [smem:[#allocation66_spill]] }
  0x6a   : > { %s3259_s26 = sshll.u32 %s3050_s30, 7  ;;  %s3037_s24 = scalar_lea.sflag [#allocation4], %s4540_s7 }
  0x6b   : > { %498 = vmatpush1.bf16.msra.mxu0 %v3878_v8  ;;  %3755 = vmatpush1.bf16.msra.mxu1 %v3878_v8  ;;  %s4251_s10 = scalar_lea.vmem %s5992_s6, 2048  ;;  %s4362_s15 = smov [#allocation8]  }
  0x6c   : > { %499 = vmatprep.subr.bf16.mxu0 %v3879_v9  ;;  %3748 = vmatprep.subr.bf16.mxu1 %v3879_v9  ;;  %p4252_p8 = scmp.ne.s32.totalorder %s5992_s6, %s4251_s10  ;;  %s4255_s28 = sshll.u32 %s4362_s15, 4  ;;  %s4256_s28 = int_to_ptr.vmem [resolvable:$false] %s4255_s28 }
  0x6d   : > { %s4257_s11 = scalar_lea.vmem %s4256_s28, 4096  ;;  %p4258_p12 = scmp.lt.s32.totalorder %s5992_s6, %s4256_s28 }
  0x6e   : > { %p4253_p9 = pnand %p4252_p8, %p4504_p5  ;;  %p4259_p13 = scmp.lt.s32.totalorder %s4257_s11, %s4251_s10 }
  0x6f   : > { %500 = vmatpush1.bf16.msra.mxu0 %v3881_v10  ;;  %3756 = vmatpush1.bf16.msra.mxu1 %v3881_v10  ;;  %s5990_s1 = scalar_lea.hbm %s6236_s23, %s3259_s26 }
  0x70   : > { %501 = vmatprep.subr.bf16.mxu0 %v3882_v11  ;;  %3749 = vmatprep.subr.bf16.mxu1 %v3882_v11  ;;  %p4254_p2 = pneg %p4253_p9  ;;  %p4260_p3 = por %p4259_p13, %p4258_p12 }
  0x72   : > { %p4261_p0 = pnand %p4260_p3, %p4254_p2 }
  0x73   : > { %502 = vmatpush1.bf16.msra.mxu0 %v3884_v12  ;;  %3757 = vmatpush1.bf16.msra.mxu1 %v3884_v12 }
  0x74   : > { %503 = vmatprep.subr.bf16.mxu0 %v3885_v13  ;;  %3750 = vmatprep.subr.bf16.mxu1 %v3885_v13 }
  0x77   : > { %504 = vmatpush1.bf16.msra.mxu0 %v3887_v14  ;;  %3758 = vmatpush1.bf16.msra.mxu1 %v3887_v14 }
  0x78   : > { %505 = vmatprep.subr.bf16.mxu0 %v3888_v15  ;;  %3751 = vmatprep.subr.bf16.mxu1 %v3888_v15 }
  0x7b   : > { %506 = vmatpush1.bf16.msra.mxu0 %v3890_v16  ;;  %3759 = vmatpush1.bf16.msra.mxu1 %v3890_v16 }
  0x7c   : > { %3424 = vmatprep.subr.bf16.mxu1 %v3899_v17 }
  0x7e   : > { %524 = vmatmul.mubr.bf16.vlgmr.msra.gmra.mxu0 %v3891_v18  ;;  %564 = vmatmul.mubr.bf16.vlgmr.msra.gmra.mxu1 %v3892_v19 }
  0x7f   : > { %533 = vmatprep.mubr.bf16.mxu0 %v4360_v0  ;;  %573 = vmatprep.mubr.bf16.mxu1 %v4360_v0 }
  0x80   : > { %3425 = vmatpush3.bf16.msra.mxu1 %v3899_v17 }
  0x81   : > { %3426 = vmatprep.subr.bf16.mxu1 %v3900_v20 }
  0x84   : > { %3427 = vmatpush3.bf16.msra.mxu1 %v3900_v20 }
  0x85   : > { %3428 = vmatprep.subr.bf16.mxu1 %v3901_v21 }
  0x86   : > { %534 = vmatmul.mubr.bf16.gmra.mxu0 %v3893_v22  ;;  %574 = vmatmul.mubr.bf16.gmra.mxu1 %v3894_v23 }
  0x87   : > { %543 = vmatprep.mubr.bf16.mxu0 %v4360_v0  ;;  %583 = vmatprep.mubr.bf16.mxu1 %v4360_v0 }
  0x88   : > { %3429 = vmatpush3.bf16.msra.mxu1 %v3901_v21 }
  0x89   : > { %3430 = vmatprep.subr.bf16.mxu1 %v3902_v24 }
  0x8c   : > { %3431 = vmatpush3.bf16.msra.mxu1 %v3902_v24 }
  0x8d   : > { %3432 = vmatprep.subr.bf16.mxu1 %v3903_v25 }
  0x8e   : > { %544 = vmatmul.mubr.bf16.gmra.mxu0 %v3895_v26  ;;  %584 = vmatmul.mubr.bf16.gmra.mxu1 %v3896_v27 }
  0x8f   : > { %553 = vmatprep.mubr.bf16.mxu0 %v4360_v0  ;;  %593 = vmatprep.mubr.bf16.mxu1 %v4360_v0 }
  0x90   : > { %3433 = vmatpush3.bf16.msra.mxu1 %v3903_v25 }
  0x91   : > { %3434 = vmatprep.subr.bf16.mxu1 %v3904_v28 }
  0x94   : > { %3435 = vmatpush3.bf16.msra.mxu1 %v3904_v28 }
  0x95   : > { %3436 = vmatprep.subr.bf16.mxu1 %v3905_v29 }
  0x96   : > { %554 = vmatmul.mubr.bf16.gmra.mxu0 %v3897_v30  ;;  %594 = vmatmul.mubr.bf16.gmra.mxu1 %v3898_v31 }
  0x97   : > { %3440 = vmatprep.mubr.bf16.mxu1 %v3891_v18 }
  0x98   : > { %3437 = vmatpush3.bf16.msra.mxu1 %v3905_v29 }
  0x99   : > { %3438 = vmatprep.subr.bf16.mxu1 %v3906_v32 }
  0x9c   : > { %3439 = vmatpush3.bf16.msra.mxu1 %v3906_v32 }
  0x9f   : > { %3441 = vmatmul.mubr.bf16.vlgmr.msra.gmra.mxu1 %v3893_v22 }
  0xa0   : > { %3444 = vmatprep.mubr.bf16.mxu1 %v3895_v26 }
  0xa7   : > { %3445 = vmatmul.mubr.bf16.gmra.mxu1 %v3897_v30 }
  0xa8   : > { %3448 = vmatprep.mubr.bf16.mxu1 %v3892_v19 }
  0xaf   : > { %3449 = vmatmul.mubr.bf16.gmra.mxu1 %v3894_v23 }
  0xb0   : > { %3452 = vmatprep.mubr.bf16.mxu1 %v3896_v27 }
  0xb7   : > { %3453 = vmatmul.mubr.bf16.gmra.mxu1 %v3898_v31 }
 0x13e   : > { %v525_v38 = vpop.f32.mrf.mxu0  ;;  %v565_v39 = vpop.f32.mrf.mxu1 }
 0x13f   : > { %v709_v42 = vmul.f32 0.17677669, %v565_v39  ;;  %v701_v50 = vmul.f32 0.17677669, %v525_v38 }
 0x140   : > { %v4583_v40 = vpop.f32.mrf.mxu0  ;;  %v4585_v41 = vpop.f32.mrf.mxu1 }
 0x141   : > { %v1775_v43 = vmul.f32 %v4579_v37, %v4583_v40  ;;  %v2312_v44 = vmul.f32 %v4576_v36, %v4583_v40  ;;  %v1783_v46 = vmul.f32 %v4579_v37, %v4585_v41  ;;  %v2320_v47 = vmul.f32 %v4576_v36, %v4585_v41 }
 0x142   : > { %v529_v48 = vpop.f32.mrf.mxu0  ;;  %v569_v49 = vpop.f32.mrf.mxu1  ;;  %v1100_v55 = vmul.f32 %v4592_v45, %v4583_v40  ;;  %v1108_v59 = vmul.f32 %v4592_v45, %v4585_v41 }
 0x143   : > { %v702_v51 = vmul.f32 0.17677669, %v529_v48  ;;  %v710_v52 = vmul.f32 0.17677669, %v569_v49 }
 0x144   : > { %v4598_v53 = vpop.f32.mrf.mxu0  ;;  %v4600_v54 = vpop.f32.mrf.mxu1 }
 0x145   : > { %v4604_v56 = vpack.c.bf16 %v702_v51, %v701_v50  ;;  %v4606_v57 = vpack.c.bf16 %v710_v52, %v709_v42  ;;  %v1101_v58 = vmul.f32 %v4592_v45, %v4598_v53  ;;  %v1776_v60 = vmul.f32 %v4579_v37, %v4598_v53 }
 0x146   : > { %v2313_v61 = vmul.f32 %v4576_v36, %v4598_v53  ;;  %v1109_v62 = vmul.f32 %v4592_v45, %v4600_v54  ;;  %v4618_v63 = vpop.f32.mrf.mxu0  ;;  %v4620_v0 = vpop.f32.mrf.mxu1  ;;  %v1784_v1 = vmul.f32 %v4579_v37, %v4600_v54  ;;  %v2321_v2 = vmul.f32 %v4576_v36, %v4600_v54 }
 0x147   : > { %3464 = vmatprep.mubr.bf16.mxu1 %v4604_v56  ;;  %3480 = vmatprep.mubr.bf16.mxu0 %v4606_v57  ;;  %v4632_v5 = vpack.c.bf16 %v1101_v58, %v1100_v55  ;;  %v4648_v13 = vpack.c.bf16 %v1776_v60, %v1775_v43 }
 0x148   : > { %v4628_v3 = vpop.f32.mrf.mxu0  ;;  %v4630_v4 = vpop.f32.mrf.mxu1  ;;  %v4634_v6 = vpack.c.bf16 %v1109_v62, %v1108_v59  ;;  %v4650_v14 = vpack.c.bf16 %v1784_v1, %v1783_v46  ;;  %v4656_v17 = vpack.c.bf16 %v2313_v61, %v2312_v44  ;;  %v4658_v18 = vpack.c.bf16 %v2321_v2, %v2320_v47 }
 0x149   : > { %v1777_v7 = vmul.f32 %v4579_v37, %v4628_v3  ;;  %v2314_v8 = vmul.f32 %v4576_v36, %v4628_v3  ;;  %v1785_v9 = vmul.f32 %v4579_v37, %v4630_v4  ;;  %v2322_v10 = vmul.f32 %v4576_v36, %v4630_v4  ;;  %6119 = vst [vmem:[#allocation16_spill] sm:$0xff] %v4648_v13 }
 0x14a   : > { %v4644_v11 = vpop.f32.mrf.mxu0  ;;  %v4646_v12 = vpop.f32.mrf.mxu1  ;;  %6120 = vst [vmem:[#allocation17_spill] sm:$0xff] %v4650_v14  ;;  %6121 = vst [vmem:[#allocation18_spill] sm:$0xff] %v4656_v17 }
 0x14b   : > { %6122 = vst [vmem:[#allocation19_spill] sm:$0xff] %v4658_v18 }
 0x14c   : > { %v4652_v15 = vpop.f32.mrf.mxu0  ;;  %v4654_v16 = vpop.f32.mrf.mxu1 }
 0x14d   : > { %v1778_v19 = vmul.f32 %v4579_v37, %v4652_v15  ;;  %v2315_v20 = vmul.f32 %v4576_v36, %v4652_v15  ;;  %v1786_v23 = vmul.f32 %v4579_v37, %v4654_v16  ;;  %v2323_v24 = vmul.f32 %v4576_v36, %v4654_v16 }
 0x14e   : > { %v4664_v21 = vpop.f32.mrf.mxu0  ;;  %v4666_v22 = vpop.f32.mrf.mxu1 }
 0x14f   : > { %v4688_v33 = vpack.c.bf16 %v1778_v19, %v1777_v7  ;;  %v4690_v38 = vpack.c.bf16 %v1786_v23, %v1785_v9  ;;  %v4696_v43 = vpack.c.bf16 %v2315_v20, %v2314_v8  ;;  %v4698_v44 = vpack.c.bf16 %v2323_v24, %v2322_v10 }
 0x150   : > { %v4672_v25 = vpop.f32.mrf.mxu0  ;;  %v4674_v26 = vpop.f32.mrf.mxu1 }
 0x151   : > { %v1779_v27 = vmul.f32 %v4579_v37, %v4672_v25  ;;  %v2316_v28 = vmul.f32 %v4576_v36, %v4672_v25  ;;  %v1787_v29 = vmul.f32 %v4579_v37, %v4674_v26  ;;  %v2324_v30 = vmul.f32 %v4576_v36, %v4674_v26  ;;  %6123 = vst [vmem:[#allocation20_spill] sm:$0xff] %v4688_v33 }
 0x152   : > { %v4684_v31 = vpop.f32.mrf.mxu0  ;;  %v4686_v32 = vpop.f32.mrf.mxu1  ;;  %6124 = vst [vmem:[#allocation21_spill] sm:$0xff] %v4690_v38  ;;  %6125 = vst [vmem:[#allocation22_spill] sm:$0xff] %v4696_v43  ;;  %v736_v23 = vmul.f32 %v4730_v34, %v4672_v25 }
 0x153   : > { %6126 = vst [vmem:[#allocation23_spill] sm:$0xff] %v4698_v44  ;;  %v744_v44 = vmul.f32 %v4730_v34, %v4674_v26 }
 0x154   : > { %v4692_v39 = vpop.f32.mrf.mxu0  ;;  %v4694_v42 = vpop.f32.mrf.mxu1 }
 0x155   : > { %v1780_v46 = vmul.f32 %v4579_v37, %v4692_v39  ;;  %v2317_v47 = vmul.f32 %v4576_v36, %v4692_v39  ;;  %v1788_v50 = vmul.f32 %v4579_v37, %v4694_v42  ;;  %v2325_v51 = vmul.f32 %v4576_v36, %v4694_v42 }
 0x156   : > { %v4704_v48 = vpop.f32.mrf.mxu0  ;;  %v4706_v49 = vpop.f32.mrf.mxu1  ;;  %v737_v8 = vmul.f32 %v4730_v34, %v4692_v39 }
 0x157   : > { %v4732_v2 = vpack.c.bf16 %v1780_v46, %v1779_v27  ;;  %v4734_v7 = vpack.c.bf16 %v1788_v50, %v1787_v29  ;;  %v4742_v19 = vpack.c.bf16 %v2317_v47, %v2316_v28  ;;  %v4744_v20 = vpack.c.bf16 %v2325_v51, %v2324_v30 }
 0x158   : > { %v4713_v52 = vpop.f32.mrf.mxu0  ;;  %v4715_v55 = vpop.f32.mrf.mxu1  ;;  %v745_v27 = vmul.f32 %v4730_v34, %v4694_v42 }
 0x159   : > { %v1781_v58 = vmul.f32 %v4579_v37, %v4713_v52  ;;  %v2318_v59 = vmul.f32 %v4576_v36, %v4713_v52  ;;  %v1789_v60 = vmul.f32 %v4579_v37, %v4715_v55  ;;  %v2326_v61 = vmul.f32 %v4576_v36, %v4715_v55  ;;  %6127 = vst [vmem:[#allocation24_spill] sm:$0xff] %v4732_v2 }
 0x15a   : > { %v4725_v62 = vpop.f32.mrf.mxu0  ;;  %v4727_v1 = vpop.f32.mrf.mxu1  ;;  %6128 = vst [vmem:[#allocation25_spill] sm:$0xff] %v4734_v7  ;;  %6129 = vst [vmem:[#allocation26_spill] sm:$0xff] %v4742_v19  ;;  %v738_v35 = vmul.f32 %v4730_v34, %v4713_v52  ;;  %v746_v29 = vmul.f32 %v4730_v34, %v4715_v55 }
 0x15b   : > { %6130 = vst [vmem:[#allocation27_spill] sm:$0xff] %v4744_v20  ;;  %v750_v20 = vpack.c.bf16 %v737_v8, %v736_v23 }
 0x15c   : > { %v4738_v9 = vpop.f32.mrf.mxu0  ;;  %v4740_v10 = vpop.f32.mrf.mxu1 }
 0x15d   : > { %v739_v24 = vmul.f32 %v4730_v34, %v4738_v9  ;;  %v1782_v28 = vmul.f32 %v4579_v37, %v4738_v9  ;;  %v747_v30 = vmul.f32 %v4730_v34, %v4740_v10  ;;  %v2319_v46 = vmul.f32 %v4576_v36, %v4738_v9 }
 0x15e   : > { %v1790_v47 = vmul.f32 %v4579_v37, %v4740_v10  ;;  %v2327_v50 = vmul.f32 %v4576_v36, %v4740_v10 }
 0x15f   : > { %v751_v51 = vpack.c.bf16 %v739_v24, %v738_v35  ;;  %v4766_v18 = vpop.f32.mrf.mxu1  ;;  %v755_v17 = vpack.c.bf16 %v747_v30, %v746_v29  ;;  %v4780_v38 = vpack.c.bf16 %v1782_v28, %v1781_v58  ;;  %v754_v24 = vpack.c.bf16 %v745_v27, %v744_v44 }
 0x160   : > { %v4772_v43 = vmul.f32 %v4766_v18, %v4579_v37  ;;  %v4776_v19 = vmul.f32 %v4766_v18, %v4576_v36  ;;  %v4782_v35 = vpack.c.bf16 %v1790_v47, %v1789_v60  ;;  %v4794_v30 = vpack.c.bf16 %v2319_v46, %v2318_v59 }
 0x161   : > { %3456 = vmatprep.subr.bf16.mxu1 %v751_v51  ;;  %v4778_v14 = vpop.f32.mrf.mxu1  ;;  %6131 = vst [vmem:[#allocation28_spill] sm:$0xff] %v4780_v38  ;;  %3472 = vmatprep.subr.bf16.mxu0 %v755_v17  ;;  %v4796_v58 = vpack.c.bf16 %v2327_v50, %v2326_v61  ;;  %v743_v59 = vmul.f32 %v4730_v34, %v4654_v16 }
 0x162   : > { %6132 = vst [vmem:[#allocation29_spill] sm:$0xff] %v4782_v35  ;;  %3457 = vmatpush3.bf16.xpose.msra.mxu1 %v751_v51  ;;  %v4786_v8 = vmul.f32 %v4579_v37, %v4778_v14  ;;  %3473 = vmatpush3.bf16.xpose.msra.mxu0 %v755_v17  ;;  %v4790_v23 = vmul.f32 %v4576_v36, %v4778_v14  ;;  %6133 = vst [vmem:[#allocation30_spill] sm:$0xff] %v4794_v30 }
 0x163   : > { %3458 = vmatprep.subr.bf16.mxu1 %v750_v20  ;;  %v4792_v29 = vpop.f32.mrf.mxu1  ;;  %6134 = vst [vmem:[#allocation31_spill] sm:$0xff] %v4796_v58  ;;  %3474 = vmatprep.subr.bf16.mxu0 %v754_v24  ;;  %v735_v17 = vmul.f32 %v4730_v34, %v4652_v15  ;;  %v734_v46 = vmul.f32 %v4730_v34, %v4628_v3 }
 0x164   : > { %v4800_v44 = vmul.f32 %v4792_v29, %v4579_v37  ;;  %v4804_v60 = vmul.f32 %v4792_v29, %v4576_v36  ;;  %v742_v50 = vmul.f32 %v4730_v34, %v4630_v4 }
 0x165   : > { %v4808_v27 = vpop.f32.mrf.mxu1  ;;  %v749_v30 = vpack.c.bf16 %v735_v17, %v734_v46  ;;  %v741_v46 = vmul.f32 %v4730_v34, %v4600_v54 }
 0x166   : > { %v4814_v61 = vmul.f32 %v4579_v37, %v4808_v27  ;;  %v4818_v28 = vmul.f32 %v4576_v36, %v4808_v27  ;;  %v753_v35 = vpack.c.bf16 %v743_v59, %v742_v50  ;;  %v733_v59 = vmul.f32 %v4730_v34, %v4598_v53 }
 0x167   : > { %v4822_v47 = vpop.f32.mrf.mxu1 }
 0x168   : > { %v4828_v51 = vmul.f32 %v4822_v47, %v4579_v37  ;;  %v4832_v58 = vmul.f32 %v4822_v47, %v4576_v36 }
 0x169   : > { %v4834_v7 = vpop.f32.mrf.mxu1 }
 0x16a   : > { %6135 = vst [vmem:[#allocation32_spill] sm:$0xff] %v4828_v51  ;;  %6136 = vst [vmem:[#allocation33_spill] sm:$0xff] %v4832_v58  ;;  %3459 = vmatpush3.bf16.xpose.msra.mxu1 %v750_v20  ;;  %v4838_v13 = vmul.f32 %v4579_v37, %v4834_v7  ;;  %v4842_v33 = vmul.f32 %v4576_v36, %v4834_v7  ;;  %3475 = vmatpush3.bf16.xpose.msra.mxu0 %v754_v24 }
 0x16b   : > { %3460 = vmatprep.subr.bf16.mxu1 %v749_v30  ;;  %v4844_v2 = vpop.f32.mrf.mxu1  ;;  %3476 = vmatprep.subr.bf16.mxu0 %v753_v35  ;;  %v732_v58 = vmul.f32 %v4730_v34, %v4583_v40 }
 0x16c   : > { %6137 = vst [vmem:[#allocation34_spill] sm:$0xff] %v4838_v13  ;;  %6138 = vst [vmem:[#allocation35_spill] sm:$0xff] %v4842_v33  ;;  %v4848_v17 = vmul.f32 %v4844_v2, %v4579_v37  ;;  %v4852_v20 = vmul.f32 %v4844_v2, %v4576_v36 }
 0x16d   : > { %v4858_v50 = vpop.f32.mrf.mxu1 }
 0x16e   : > { %6139 = vst [vmem:[#allocation36_spill] sm:$0xff] %v4848_v17  ;;  %6140 = vst [vmem:[#allocation37_spill] sm:$0xff] %v4852_v20  ;;  %v4862_v24 = vmul.f32 %v4579_v37, %v4858_v50  ;;  %v4866_v33 = vmul.f32 %v4576_v36, %v4858_v50  ;;  %v740_v20 = vmul.f32 %v4730_v34, %v4585_v41 }
 0x16f   : > { %v3450_v53 = vpop.f32.mrf.mxu1  ;;  %v748_v17 = vpack.c.bf16 %v733_v59, %v732_v58 }
 0x170   : > { %6141 = vst [vmem:[#allocation38_spill] sm:$0xff] %v4862_v24  ;;  %6142 = vst [vmem:[#allocation39_spill] sm:$0xff] %v4866_v33  ;;  %v4873_v13 = vmul.f32 %v3450_v53, %v4730_v34  ;;  %v4876_v54 = vmul.f32 %v3450_v53, %v4592_v45  ;;  %v752_v51 = vpack.c.bf16 %v741_v46, %v740_v20 }
 0x171   : > { %v4879_v24 = vmul.f32 %v3450_v53, %v4579_v37  ;;  %v4882_v33 = vmul.f32 %v3450_v53, %v4576_v36  ;;  %v670_v38 = vpop.f32.mrf.mxu1 }
 0x172   : > { %6143 = vst [vmem:[#allocation40_spill] sm:$0xff] %v4873_v13  ;;  %3461 = vmatpush3.bf16.xpose.msra.mxu1 %v749_v30  ;;  %v4885_v40 = vmul.f32 %v4730_v34, %v670_v38  ;;  %v4888_v41 = vmul.f32 %v4592_v45, %v670_v38  ;;  %v4891_v13 = vmul.f32 %v4579_v37, %v670_v38 }
 0x173   : > { %6144 = vst [vmem:[#allocation41_spill] sm:$0xff] %v4879_v24  ;;  %6145 = vst [vmem:[#allocation42_spill] sm:$0xff] %v4882_v33  ;;  %v4894_v58 = vmul.f32 %v4576_v36, %v670_v38  ;;  %3477 = vmatpush3.bf16.xpose.msra.mxu0 %v753_v35  ;;  %3462 = vmatprep.subr.bf16.mxu1 %v748_v17  ;;  %v3451_v20 = vpop.f32.mrf.mxu1  ;;  %v1107_v38 = vmul.f32 %v4592_v45, %v4738_v9 }
 0x174   : > { %6146 = vst [vmem:[#allocation43_spill] sm:$0xff] %v4885_v40  ;;  %6147 = vst [vmem:[#allocation44_spill] sm:$0xff] %v4891_v13  ;;  %3478 = vmatprep.subr.bf16.mxu0 %v752_v51  ;;  %v4897_v59 = vmul.f32 %v3451_v20, %v4730_v34  ;;  %v4900_v30 = vmul.f32 %v3451_v20, %v4592_v45  ;;  %v4903_v46 = vmul.f32 %v3451_v20, %v4579_v37 }
 0x175   : > { %6148 = vst [vmem:[#allocation45_spill] sm:$0xff] %v4894_v58  ;;  %v4906_v53 = vmul.f32 %v3451_v20, %v4576_v36  ;;  %v1115_v35 = vmul.f32 %v4592_v45, %v4740_v10  ;;  %v673_v58 = vpop.f32.mrf.mxu1  ;;  %v1106_v20 = vmul.f32 %v4592_v45, %v4713_v52  ;;  %v1114_v9 = vmul.f32 %v4592_v45, %v4715_v55 }
 0x176   : > { %6149 = vst [vmem:[#allocation46_spill] sm:$0xff] %v4897_v59  ;;  %6150 = vst [vmem:[#allocation47_spill] sm:$0xff] %v4903_v46  ;;  %v4913_v33 = vmul.f32 %v4730_v34, %v673_v58  ;;  %v4916_v13 = vmul.f32 %v4592_v45, %v673_v58  ;;  %v4919_v24 = vmul.f32 %v4579_v37, %v673_v58 }
 0x177   : > { %6151 = vst [vmem:[#allocation48_spill] sm:$0xff] %v4906_v53  ;;  %v4922_v46 = vmul.f32 %v4576_v36, %v673_v58  ;;  %v4928_v10 = vpop.f32.mrf.mxu1 }
 0x178   : > { %6152 = vst [vmem:[#allocation49_spill] sm:$0xff] %v4913_v33  ;;  %6153 = vst [vmem:[#allocation50_spill] sm:$0xff] %v4919_v24  ;;  %v4932_v53 = vmul.f32 %v4928_v10, %v4730_v34  ;;  %v4936_v33 = vmul.f32 %v4928_v10, %v4579_v37  ;;  %v4940_v58 = vmul.f32 %v4928_v10, %v4576_v36 }
 0x179   : > { %6154 = vst [vmem:[#allocation51_spill] sm:$0xff] %v4922_v46  ;;  %v1119_v46 = vpack.c.bf16 %v1107_v38, %v1106_v20  ;;  %v1123_v24 = vpack.c.bf16 %v1115_v35, %v1114_v9  ;;  %v686_v52 = vpop.f32.mrf.mxu1  ;;  %v712_v38 = vmul.f32 0.17677669, %v4646_v12  ;;  %v706_v35 = vmul.f32 0.17677669, %v4684_v31 }
 0x17a   : > { %6155 = vst [vmem:[#allocation52_spill] sm:$0xff] %v4932_v53  ;;  %6156 = vst [vmem:[#allocation53_spill] sm:$0xff] %v4936_v33  ;;  %3463 = vmatpush3.bf16.xpose.msra.mxu1 %v748_v17  ;;  %v4943_v55 = vmul.f32 %v4730_v34, %v686_v52  ;;  %v4946_v40 = vmul.f32 %v4592_v45, %v686_v52  ;;  %v4949_v53 = vmul.f32 %v4579_v37, %v686_v52 }
 0x17b   : > { %6157 = vst [vmem:[#allocation54_spill] sm:$0xff] %v4940_v58  ;;  %v4952_v59 = vmul.f32 %v4576_v36, %v686_v52  ;;  %v711_v33 = vmul.f32 0.17677669, %v4620_v0  ;;  %v704_v58 = vmul.f32 0.17677669, %v4644_v11  ;;  %3479 = vmatpush3.bf16.xpose.msra.mxu0 %v752_v51  ;;  %3488 = vmatprep.subr.bf16.mxu1 %v1119_v46  ;;  %v4957_v17 = vpop.f32.mrf.mxu1  ;;  %v1105_v52 = vmul.f32 %v4592_v45, %v4692_v39 }
 0x17c   : > { %6158 = vst [vmem:[#allocation55_spill] sm:$0xff] %v4949_v53  ;;  %3504 = vmatprep.subr.bf16.mxu0 %v1123_v24  ;;  %v4962_v20 = vmul.f32 %v4957_v17, %v4730_v34  ;;  %v4966_v9 = vmul.f32 %v4957_v17, %v4579_v37  ;;  %v4970_v0 = vmul.f32 %v4957_v17, %v4576_v36  ;;  %v703_v11 = vmul.f32 0.17677669, %v4618_v63 }
 0x17d   : > { %6159 = vst [vmem:[#allocation56_spill] sm:$0xff] %v4952_v59  ;;  %v713_v12 = vmul.f32 0.17677669, %v4666_v22  ;;  %v714_v51 = vmul.f32 0.17677669, %v4686_v32  ;;  %v1113_v53 = vmul.f32 %v4592_v45, %v4694_v42  ;;  %v1112_v22 = vmul.f32 %v4592_v45, %v4674_v26 }
 0x17e   : > { %6160 = vst [vmem:[#allocation57_spill] sm:$0xff] %v4966_v9  ;;  %6161 = vst [vmem:[#allocation58_spill] sm:$0xff] %v4970_v0  ;;  %v705_v31 = vmul.f32 0.17677669, %v4664_v21  ;;  %v4978_v59 = vpack.c.bf16 %v704_v58, %v703_v11  ;;  %v4982_v9 = vpack.c.bf16 %v712_v38, %v711_v33  ;;  %v1104_v0 = vmul.f32 %v4592_v45, %v4672_v25 }
 0x17f   : > { %v4990_v32 = vpack.c.bf16 %v714_v51, %v713_v12  ;;  %v708_v33 = vmul.f32 0.17677669, %v4725_v62  ;;  %v1122_v25 = vpack.c.bf16 %v1113_v53, %v1112_v22  ;;  %v715_v39 = vmul.f32 0.17677669, %v4706_v49 }
 0x180   : > { %6162 = vst [vmem:[#allocation59_spill] sm:$0xff] %v4982_v9  ;;  %v4986_v63 = vpack.c.bf16 %v706_v35, %v705_v31  ;;  %v1118_v21 = vpack.c.bf16 %v1105_v52, %v1104_v0  ;;  %v716_v42 = vmul.f32 0.17677669, %v4727_v1  ;;  %v707_v26 = vmul.f32 0.17677669, %v4704_v48 }
 0x181   : > { %6163 = vst [vmem:[#allocation60_spill] sm:$0xff] %v4990_v32  ;;  %3465 = vmatmul.mubr.bf16.vlgmr.msra.gmra.mxu1 %v4978_v59  ;;  %v1103_v58 = vmul.f32 %v4592_v45, %v4652_v15  ;;  %v1111_v38 = vmul.f32 %v4592_v45, %v4654_v16  ;;  %v1110_v49 = vmul.f32 %v4592_v45, %v4630_v4 }
 0x182   : > { %3481 = vmatmul.mubr.bf16.vlgmr.msra.gmra.mxu0 %v4982_v9  ;;  %3468 = vmatprep.mubr.bf16.mxu1 %v4986_v63  ;;  %v5004_v62 = vpack.c.bf16 %v708_v33, %v707_v26  ;;  %v5008_v53 = vpack.c.bf16 %v716_v42, %v715_v39  ;;  %v1131_v4 = vmul.f32 %v4844_v2, %v4592_v45 }
 0x183   : > { %3484 = vmatprep.mubr.bf16.mxu0 %v4990_v32  ;;  %3489 = vmatpush3.bf16.xpose.msra.mxu1 %v1119_v46  ;;  %v1102_v46 = vmul.f32 %v4592_v45, %v4628_v3  ;;  %v1121_v16 = vpack.c.bf16 %v1111_v38, %v1110_v49  ;;  %v1130_v3 = vmul.f32 %v4822_v47, %v4592_v45  ;;  %v6176_v49 = vld [vmem:[#allocation39_spill] sm:$0xff] }
 0x184   : > { %3505 = vmatpush3.bf16.xpose.msra.mxu0 %v1123_v24  ;;  %3490 = vmatprep.subr.bf16.mxu1 %v1118_v21  ;;  %6164 = vst [vmem:[#allocation61_spill] sm:$0xff] %v5008_v53  ;;  %v762_v48 = vmul.f32 %v4822_v47, %v4730_v34  ;;  %v763_v1 = vmul.f32 %v4844_v2, %v4730_v34 }
 0x185   : > { %3506 = vmatprep.subr.bf16.mxu0 %v1122_v25  ;;  %v1117_v15 = vpack.c.bf16 %v1103_v58, %v1102_v46  ;;  %v1143_v24 = vpack.c.bf16 %v1131_v4, %v1130_v3  ;;  %v760_v0 = vmul.f32 %v4730_v34, %v4834_v7  ;;  %v761_v11 = vmul.f32 %v4730_v34, %v4858_v50  ;;  %v6173_v58 = vld [vmem:[#allocation37_spill] sm:$0xff]  ;;  %v6175_v46 = vld [vmem:[#allocation35_spill] sm:$0xff]  ;;  %v689_v4 = vpop.f32.mrf.mxu1 }
 0x186   : > { %v775_v35 = vpack.c.bf16 %v763_v1, %v762_v48  ;;  %v1128_v47 = vmul.f32 %v4592_v45, %v4834_v7  ;;  %v1129_v2 = vmul.f32 %v4592_v45, %v4858_v50  ;;  %v758_v12 = vmul.f32 %v4766_v18, %v4730_v34  ;;  %v6178_v48 = vld [vmem:[#allocation40_spill] sm:$0xff]  ;;  %v6179_v1 = vld [vmem:[#allocation46_spill] sm:$0xff] }
 0x187   : > { %v1126_v51 = vmul.f32 %v4766_v18, %v4592_v45  ;;  %v1127_v31 = vmul.f32 %v4792_v29, %v4592_v45  ;;  %v756_v7 = vmul.f32 %v4730_v34, %v4778_v14  ;;  %v1124_v50 = vmul.f32 %v4592_v45, %v4778_v14 }
 0x188   : > { %v1142_v52 = vpack.c.bf16 %v1129_v2, %v1128_v47  ;;  %v757_v22 = vmul.f32 %v4730_v34, %v4808_v27  ;;  %v1125_v18 = vmul.f32 %v4592_v45, %v4808_v27  ;;  %v1138_v14 = vmul.f32 %v4928_v10, %v4592_v45  ;;  %v6182_v47 = vld [vmem:[#allocation41_spill] sm:$0xff]  ;;  %v6183_v2 = vld [vmem:[#allocation47_spill] sm:$0xff] }
 0x189   : > { %3469 = vmatmul.mubr.bf16.gmra.mxu1 %v5004_v62  ;;  %v5060_v39 = vpack.c.bf16 %v4800_v44, %v4772_v43  ;;  %v5064_v27 = vpack.c.bf16 %v4814_v61, %v4786_v8  ;;  %v1139_v42 = vmul.f32 %v4957_v17, %v4592_v45  ;;  %v5071_v26 = vpack.c.bf16 %v4804_v60, %v4776_v19  ;;  %v6167_v8 = vld [vmem:[#allocation28_spill] sm:$0xff]  ;;  %v6170_v60 = vld [vmem:[#allocation34_spill] sm:$0xff] }
 0x18a   : > { %3485 = vmatmul.mubr.bf16.gmra.mxu0 %v5008_v53  ;;  %3496 = vmatprep.mubr.bf16.mxu1 %v4604_v56  ;;  %v772_v33 = vpack.c.bf16 %v757_v22, %v756_v7  ;;  %v5075_v10 = vpack.c.bf16 %v4818_v28, %v4790_v23  ;;  %v6168_v44 = vld [vmem:[#allocation32_spill] sm:$0xff]  ;;  %v6171_v17 = vld [vmem:[#allocation38_spill] sm:$0xff]  ;;  %v6172_v28 = vld [vmem:[#allocation33_spill] sm:$0xff]  ;;  %v5104_v3 = vpack.c.bf16 %v4916_v13, %v4888_v41 }
 0x18b   : > { %3491 = vmatpush3.bf16.xpose.msra.mxu1 %v1118_v21  ;;  %3512 = vmatprep.mubr.bf16.mxu0 %v4606_v57  ;;  %v1141_v21 = vpack.c.bf16 %v1127_v31, %v1126_v51  ;;  %6165 = vst [vmem:[#allocation62_spill] sm:$0xff] %v5071_v26  ;;  %v5078_v43 = vpack.c.bf16 %v1139_v42, %v1138_v14  ;;  %v6169_v61 = vld [vmem:[#allocation36_spill] sm:$0xff]  ;;  %v6191_v51 = vld [vmem:[#allocation45_spill] sm:$0xff]  ;;  %v6192_v31 = vld [vmem:[#allocation51_spill] sm:$0xff] }
 0x18c   : > { %3507 = vmatpush3.bf16.xpose.msra.mxu0 %v1122_v25  ;;  %3492 = vmatprep.subr.bf16.mxu1 %v1117_v15  ;;  %v1140_v25 = vpack.c.bf16 %v1125_v18, %v1124_v50  ;;  %6166 = vst [vmem:[#allocation63_spill] sm:$0xff] %v5075_v10  ;;  %v5083_v19 = vpack.c.bf16 %v6169_v61, %v6168_v44  ;;  %v6189_v13 = vld [vmem:[#allocation48_spill] sm:$0xff]  ;;  %v6195_v14 = vld [vmem:[#allocation53_spill] sm:$0xff]  ;;  %v6201_v61 = vld [vmem:[#allocation58_spill] sm:$0xff] }
 0x18d   : > { %3508 = vmatprep.subr.bf16.mxu0 %v1121_v16  ;;  %v5087_v23 = vpack.c.bf16 %v6171_v17, %v6170_v60  ;;  %v5092_v38 = vpack.c.bf16 %v6173_v58, %v6172_v28  ;;  %v1137_v7 = vmul.f32 %v4592_v45, %v689_v4  ;;  %v769_v50 = vmul.f32 %v4730_v34, %v689_v4  ;;  %v6196_v42 = vld [vmem:[#allocation57_spill] sm:$0xff]  ;;  %v6198_v45 = vld [vmem:[#allocation55_spill] sm:$0xff] }
 0x18e   : > { %v1812_v22 = vmul.f32 %v4579_v37, %v689_v4  ;;  %v2349_v18 = vmul.f32 %v4576_v36, %v689_v4  ;;  %v5146_v44 = vpack.c.bf16 %v6196_v42, %v6195_v14  ;;  %v6200_v37 = vld [vmem:[#allocation54_spill] sm:$0xff] }
 0x18f   : > { %6174 = vst [vmem:[#allocation28_spill] sm:$0xff] %v5092_v38  ;;  %v5153_v36 = vpack.c.bf16 %v6201_v61, %v6200_v37 }
 0x190   : > { %6197 = vst [vmem:[#allocation37_spill] sm:$0xff] %v5146_v44 }
 0x191   : > { %6202 = vst [vmem:[#allocation39_spill] sm:$0xff] %v5153_v36 }
 0x193   : > { %3493 = vmatpush3.bf16.xpose.msra.mxu1 %v1117_v15  ;;  %v5096_v15 = vpack.c.bf16 %v6176_v49, %v6175_v46 }
 0x194   : > { %3509 = vmatpush3.bf16.xpose.msra.mxu0 %v1121_v16  ;;  %3494 = vmatprep.subr.bf16.mxu1 %v4632_v5  ;;  %v5100_v16 = vpack.c.bf16 %v4900_v30, %v4876_v54  ;;  %v6186_v54 = vld [vmem:[#allocation50_spill] sm:$0xff] }
 0x195   : > { %3510 = vmatprep.subr.bf16.mxu0 %v4634_v6  ;;  %6177 = vst [vmem:[#allocation32_spill] sm:$0xff] %v5096_v15 }
 0x19b   : > { %3495 = vmatpush3.bf16.xpose.msra.mxu1 %v4632_v5  ;;  %v759_v5 = vmul.f32 %v4792_v29, %v4730_v34  ;;  %v5149_v34 = vpack.c.bf16 %v1812_v22, %v6198_v45 }
 0x19c   : > { %3511 = vmatpush3.bf16.xpose.msra.mxu0 %v4634_v6  ;;  %3520 = vmatprep.subr.bf16.mxu1 %v1143_v24  ;;  %v774_v6 = vpack.c.bf16 %v761_v11, %v760_v0  ;;  %v6181_v0 = vld [vmem:[#allocation49_spill] sm:$0xff] }
 0x19d   : > { %3552 = vmatprep.subr.bf16.mxu0 %v775_v35  ;;  %v773_v29 = vpack.c.bf16 %v759_v5, %v758_v12  ;;  %v5116_v12 = vpack.c.bf16 %v6183_v2, %v6182_v47  ;;  %v6185_v5 = vld [vmem:[#allocation44_spill] sm:$0xff]  ;;  %6199 = vst [vmem:[#allocation35_spill] sm:$0xff] %v5149_v34 }
 0x19e   : > { %v5120_v30 = vpack.c.bf16 %v6186_v54, %v6185_v5 }
 0x19f   : > { %6184 = vst [vmem:[#allocation36_spill] sm:$0xff] %v5116_v12 }
 0x1a0   : > { %6187 = vst [vmem:[#allocation34_spill] sm:$0xff] %v5120_v30 }
 0x1a2   : > { %3497 = vmatmul.mubr.bf16.vlgmr.msra.gmra.mxu1 %v4978_v59 }
 0x1a3   : > { %3513 = vmatmul.mubr.bf16.vlgmr.msra.gmra.mxu0 %v4982_v9  ;;  %3500 = vmatprep.mubr.bf16.mxu1 %v4986_v63 }
 0x1a4   : > { %3516 = vmatprep.mubr.bf16.mxu0 %v4990_v32  ;;  %3553 = vmatpush3.bf16.msra.mxu0 %v775_v35  ;;  %v6180_v35 = vld [vmem:[#allocation43_spill] sm:$0xff] }
 0x1a5   : > { %3554 = vmatprep.subr.bf16.mxu0 %v774_v6  ;;  %3521 = vmatpush3.bf16.msra.mxu1 %v1143_v24  ;;  %v5108_v24 = vpack.c.bf16 %v6179_v1, %v6178_v48  ;;  %v5112_v11 = vpack.c.bf16 %v6181_v0, %v6180_v35 }
 0x1a6   : > { %3522 = vmatprep.subr.bf16.mxu1 %v1142_v52 }
 0x1a8   : > { %3555 = vmatpush3.bf16.msra.mxu0 %v774_v6  ;;  %v6188_v6 = vld [vmem:[#allocation42_spill] sm:$0xff] }
 0x1a9   : > { %3556 = vmatprep.subr.bf16.mxu0 %v773_v29  ;;  %3523 = vmatpush3.bf16.msra.mxu1 %v1142_v52  ;;  %v5124_v41 = vpack.c.bf16 %v6189_v13, %v6188_v6  ;;  %v5128_v52 = vpack.c.bf16 %v6192_v31, %v6191_v51 }
 0x1aa   : > { %3501 = vmatmul.mubr.bf16.gmra.mxu1 %v5004_v62  ;;  %3524 = vmatprep.subr.bf16.mxu1 %v1141_v21 }
 0x1ab   : > { %3517 = vmatmul.mubr.bf16.gmra.mxu0 %v5008_v53  ;;  %6190 = vst [vmem:[#allocation38_spill] sm:$0xff] %v5124_v41  ;;  %6193 = vst [vmem:[#allocation33_spill] sm:$0xff] %v5128_v52 }
 0x1ac   : > { %3557 = vmatpush3.bf16.msra.mxu0 %v773_v29  ;;  %v5135_v29 = vpack.c.bf16 %v1137_v7, %v4946_v40  ;;  %v6203_v40 = vld [vmem:[#allocation56_spill] sm:$0xff] }
 0x1ad   : > { %3558 = vmatprep.subr.bf16.mxu0 %v772_v33  ;;  %3525 = vmatpush3.bf16.msra.mxu1 %v1141_v21  ;;  %v6194_v21 = vld [vmem:[#allocation52_spill] sm:$0xff]  ;;  %v5156_v60 = vpack.c.bf16 %v2349_v18, %v6203_v40 }
 0x1ae   : > { %3526 = vmatprep.subr.bf16.mxu1 %v1140_v25 }
 0x1af   : > { %6204 = vst [vmem:[#allocation40_spill] sm:$0xff] %v5156_v60 }
 0x1b0   : > { %3559 = vmatpush3.bf16.msra.mxu0 %v772_v33  ;;  %v5139_v33 = vpack.c.bf16 %v4962_v20, %v6194_v21 }
 0x1b1   : > { %3584 = vmatprep.subr.bf16.mxu0 %v6167_v8  ;;  %3527 = vmatpush3.bf16.msra.mxu1 %v1140_v25  ;;  %v5142_v25 = vpack.c.bf16 %v769_v50, %v4943_v55 }
 0x1b2   : > { %3536 = vmatprep.subr.bf16.mxu1 %v5078_v43 }
 0x241   : > { %v5158_v17 = vpop.f32.mrf.mxu1 }
 0x242   : > { %v5164_v28 = vpop.f32.mrf.mxu0  ;;  %v917_v10 = vsel %vm910_vm8, %v5158_v17, -inf }
 0x243   : > { %v5160_v20 = vpop.f32.mrf.mxu1 }
 0x244   : > { %v911_v55 = vsel %vm910_vm8, %v5160_v20, -inf  ;;  %v5172_v4 = vpop.f32.mrf.mxu0 }
 0x245   : > { %912 = vmax.xlane.f32.xlu0 %v911_v55  ;;  %v5166_v58 = vpop.f32.mrf.mxu1  ;;  %v935_v15 = vsel %vm910_vm8, %v5172_v4, -inf }
 0x246   : > { %v5174_v48 = vpop.f32.mrf.mxu0  ;;  %v920_v60 = vsel %vm910_vm8, %v5166_v58, -inf }
 0x247   : > { %v5168_v46 = vpop.f32.mrf.mxu1 }
 0x248   : > { %v914_v49 = vsel %vm910_vm8, %v5168_v46, -inf  ;;  %v5176_v1 = vpop.f32.mrf.mxu0 }
 0x249   : > { %915 = vmax.xlane.f32.xlu1 %v914_v49  ;;  %v5178_v35 = vpop.f32.mrf.mxu1 }
 0x24a   : > { %v5180_v0 = vpop.f32.mrf.mxu0 }
 0x24b   : > { %v5182_v47 = vpop.f32.mrf.mxu1 }
 0x24c   : > { %v5184_v2 = vpop.f32.mrf.mxu0 }
 0x24d   : > { %v5186_v5 = vpop.f32.mrf.mxu1 }
 0x24e   : > { %v5188_v54 = vpop.f32.mrf.mxu0 }
 0x24f   : > { %v5190_v6 = vpop.f32.mrf.mxu1 }
 0x250   : > { %v5192_v13 = vpop.f32.mrf.mxu0 }
 0x262   : > { %v5194_v51 = vpop.f32.mrf.mxu1 }
 0x263   : > { %v5196_v31 = vpop.f32.mrf.mxu0  ;;  %v1284_v7 = vsel %vm910_vm8, %v5194_v51, -inf }
 0x264   : > { %1285 = vmax.xlane.f32.xlu1 %v1284_v7  ;;  %v5200_v50 = vpop.f32.mrf.mxu1 }
 0x265   : > { %v5202_v22 = vpop.f32.mrf.mxu0  ;;  %v1278_v18 = vsel %vm910_vm8, %v5200_v50, -inf }
 0x266   : > { %1279 = vmax.xlane.f32.xlu0 %v1278_v18  ;;  %v5206_v21 = vpop.f32.mrf.mxu1  ;;  %v1302_v61 = vsel %vm910_vm8, %v5202_v22, -inf }
 0x267   : > { %v5208_v14 = vpop.f32.mrf.mxu0  ;;  %v1287_v42 = vsel %vm910_vm8, %v5206_v21, -inf }
 0x268   : > { %1288 = vmax.xlane.f32.xlu1 %v1287_v42  ;;  %v5212_v45 = vpop.f32.mrf.mxu1 }
 0x269   : > { %v5214_v37 = vpop.f32.mrf.mxu0  ;;  %v1281_v7 = vsel %vm910_vm8, %v5212_v45, -inf }
 0x26a   : > { %1303 = vmax.xlane.f32.xlu0 %v1302_v61  ;;  %v5218_v40 = vpop.f32.mrf.mxu1  ;;  %v1305_v55 = vsel %vm910_vm8, %v5214_v37, -inf }
 0x26b   : > { %v1296_v61 = vsel %vm910_vm8, %v5218_v40, -inf  ;;  %v5236_v41 = vpop.f32.mrf.mxu0 }
 0x26c   : > { %1306 = vmax.xlane.f32.xlu1 %v1305_v55  ;;  %v5222_v49 = vpop.f32.mrf.mxu1 }
 0x26e   : > { %1282 = vmax.xlane.f32.xlu0 %v1281_v7  ;;  %v5226_v18 = vpop.f32.mrf.mxu1  ;;  %v1290_v7 = vsel %vm910_vm8, %v5222_v49, -inf }
 0x26f   : > { %v1299_v42 = vsel %vm910_vm8, %v5226_v18, -inf }
 0x270   : > { %1300 = vmax.xlane.f32.xlu1 %v1299_v42  ;;  %v5230_v52 = vpop.f32.mrf.mxu1  ;;  %v5242_v42 = vpop.f32.mrf.mxu0 }
 0x271   : > { %v1293_v55 = vsel %vm910_vm8, %v5230_v52, -inf }
 0x272   : > { %1297 = vmax.xlane.f32.xlu0 %v1296_v61  ;;  %v1311_v61 = vsel %vm910_vm8, %v5208_v14, -inf  ;;  %v5248_v36 = vpop.f32.mrf.mxu0 }
 0x274   : > { %1294 = vmax.xlane.f32.xlu1 %v1293_v55  ;;  %v1308_v55 = vsel %vm910_vm8, %v5196_v31, -inf  ;;  %v5254_v26 = vpop.f32.mrf.mxu0 }
 0x276   : > { %1291 = vmax.xlane.f32.xlu0 %v1290_v7  ;;  %v1323_v7 = vsel %vm910_vm8, %v5248_v36, -inf }
 0x278   : > { %921 = vmax.xlane.f32.xlu1 %v920_v60  ;;  %v1314_v60 = vsel %vm910_vm8, %v5242_v42, -inf }
 0x27a   : > { %918 = vmax.xlane.f32.xlu0 %v917_v10  ;;  %v1317_v10 = vsel %vm910_vm8, %v5254_v26, -inf }
 0x27c   : > { %1312 = vmax.xlane.f32.xlu1 %v1311_v61  ;;  %v1320_v61 = vsel %vm910_vm8, %v5236_v41, -inf }
 0x27e   : > { %1309 = vmax.xlane.f32.xlu0 %v1308_v55  ;;  %v938_v55 = vsel %vm910_vm8, %v5176_v1, -inf }
 0x280   : > { %1324 = vmax.xlane.f32.xlu1 %v1323_v7  ;;  %v944_v7 = vsel %vm910_vm8, %v5174_v48, -inf }
 0x282   : > { %1315 = vmax.xlane.f32.xlu0 %v1314_v60  ;;  %v941_v60 = vsel %vm910_vm8, %v5164_v28, -inf }
 0x284   : > { %1318 = vmax.xlane.f32.xlu1 %v1317_v10  ;;  %v926_v10 = vsel %vm910_vm8, %v5190_v6, -inf }
 0x286   : > { %1321 = vmax.xlane.f32.xlu0 %v1320_v61  ;;  %v923_v61 = vsel %vm910_vm8, %v5182_v47, -inf }
 0x288   : > { %939 = vmax.xlane.f32.xlu1 %v938_v55  ;;  %v932_v55 = vsel %vm910_vm8, %v5186_v5, -inf }
 0x28a   : > { %936 = vmax.xlane.f32.xlu0 %v935_v15  ;;  %v929_v15 = vsel %vm910_vm8, %v5178_v35, -inf }
 0x28c   : > { %945 = vmax.xlane.f32.xlu1 %v944_v7  ;;  %v950_v7 = vsel %vm910_vm8, %v5192_v13, -inf }
 0x28e   : > { %942 = vmax.xlane.f32.xlu0 %v941_v60  ;;  %v947_v60 = vsel %vm910_vm8, %v5184_v2, -inf }
 0x290   : > { %927 = vmax.xlane.f32.xlu1 %v926_v10  ;;  %v956_v10 = vsel %vm910_vm8, %v5188_v54, -inf }
 0x292   : > { %924 = vmax.xlane.f32.xlu0 %v923_v61  ;;  %v953_v61 = vsel %vm910_vm8, %v5180_v0, -inf }
 0x294   : > { %933 = vmax.xlane.f32.xlu1 %v932_v55 }
 0x296   : > { %930 = vmax.xlane.f32.xlu0 %v929_v15 }
 0x298   : > { %951 = vmax.xlane.f32.xlu1 %v950_v7 }
 0x29a   : > { %948 = vmax.xlane.f32.xlu0 %v947_v60 }
 0x29c   : > { %957 = vmax.xlane.f32.xlu1 %v956_v10 }
 0x29e   : > { %954 = vmax.xlane.f32.xlu0 %v953_v61 }
 0x2ce   : > { %v913_v55 = vpop.xlane.xlu0 %912 }
 0x2cf   : > { %v959_v38 = vsub.f32 %v5160_v20, %v913_v55 }
 0x2d1   : > { %v975_v15 = vmul.f32 1.442695, %v959_v38 }
 0x2d2   : > { %v916_v30 = vpop.xlane.xlu1 %915 }
 0x2d3   : > { %3915 = vpow2.f32 %v975_v15  ;;  %v960_v7 = vsub.f32 %v5168_v46, %v916_v30 }
 0x2d5   : > { %v977_v53 = vmul.f32 1.442695, %v960_v7 }
 0x2d7   : > { %3917 = vpow2.f32 %v977_v53 }
 0x2e0   : > { %v5288_v12 = vpop.eup %3915 }
 0x2e1   : > { %v1007_v60 = vsel %vm910_vm8, %v5288_v12, 0.0 }
 0x2e2   : > { %1008 = vadd.xlane.f32.xlu0 %v1007_v60 }
 0x2e4   : > { %v5292_v10 = vpop.eup %3917 }
 0x2e5   : > { %v1010_v61 = vsel %vm910_vm8, %v5292_v10, 0.0 }
 0x2e6   : > { %1011 = vadd.xlane.f32.xlu1 %v1010_v61 }
 0x2ed   : > { %v1286_v20 = vpop.xlane.xlu1 %1285 }
 0x2ee   : > { %v1328_v38 = vsub.f32 %v5194_v51, %v1286_v20 }
 0x2ef   : > { %v1280_v55 = vpop.xlane.xlu0 %1279 }
 0x2f0   : > { %v1346_v15 = vmul.f32 1.442695, %v1328_v38  ;;  %v1326_v30 = vsub.f32 %v5200_v50, %v1280_v55 }
 0x2f1   : > { %v1289_v53 = vpop.xlane.xlu1 %1288 }
 0x2f2   : > { %3919 = vpow2.f32 %v1346_v15  ;;  %v1342_v46 = vmul.f32 1.442695, %v1326_v30  ;;  %v1329_v7 = vsub.f32 %v5206_v21, %v1289_v53 }
 0x2f3   : > { %v1304_v34 = vpop.xlane.xlu0 %1303 }
 0x2f4   : > { %3921 = vpow2.f32 %v1342_v46  ;;  %v1348_v60 = vmul.f32 1.442695, %v1329_v7  ;;  %v1334_v32 = vsub.f32 %v5202_v22, %v1304_v34 }
 0x2f5   : > { %v1307_v9 = vpop.xlane.xlu1 %1306 }
 0x2f6   : > { %3923 = vpow2.f32 %v1348_v60  ;;  %v1358_v61 = vmul.f32 1.442695, %v1334_v32  ;;  %v1335_v44 = vsub.f32 %v5214_v37, %v1307_v9 }
 0x2f7   : > { %v1283_v51 = vpop.xlane.xlu0 %1282 }
 0x2f8   : > { %3925 = vpow2.f32 %v1358_v61  ;;  %v1327_v20 = vsub.f32 %v5212_v45, %v1283_v51  ;;  %v1360_v38 = vmul.f32 1.442695, %v1335_v44 }
 0x2f9   : > { %v1301_v50 = vpop.xlane.xlu1 %1300 }
 0x2fa   : > { %v1344_v55 = vmul.f32 1.442695, %v1327_v20  ;;  %v1333_v15 = vsub.f32 %v5226_v18, %v1301_v50 }
 0x2fb   : > { %v1298_v21 = vpop.xlane.xlu0 %1297 }
 0x2fc   : > { %3927 = vpow2.f32 %v1344_v55  ;;  %v1332_v30 = vsub.f32 %v5218_v40, %v1298_v21  ;;  %v1356_v34 = vmul.f32 1.442695, %v1333_v15 }
 0x2fd   : > { %v1295_v53 = vpop.xlane.xlu1 %1294  ;;  %3929 = vpow2.f32 %v1360_v38 }
 0x2fe   : > { %v1354_v22 = vmul.f32 1.442695, %v1332_v30  ;;  %v1331_v32 = vsub.f32 %v5230_v52, %v1295_v53 }
 0x2ff   : > { %v5305_v9 = vpop.eup %3919  ;;  %v1292_v37 = vpop.xlane.xlu0 %1291 }
 0x300   : > { %3931 = vpow2.f32 %v1354_v22  ;;  %v1330_v45 = vsub.f32 %v5222_v49, %v1292_v37  ;;  %v1380_v44 = vsel %vm910_vm8, %v5305_v9, 0.0  ;;  %v1352_v40 = vmul.f32 1.442695, %v1331_v32 }
 0x301   : > { %v5310_v18 = vpop.eup %3921  ;;  %1381 = vadd.xlane.f32.xlu0 %v1380_v44  ;;  %v922_v46 = vpop.xlane.xlu1 %921  ;;  %3933 = vpow2.f32 %v1356_v34 }
 0x302   : > { %v1350_v7 = vmul.f32 1.442695, %v1330_v45  ;;  %v962_v60 = vsub.f32 %v5166_v58, %v922_v46  ;;  %v1374_v49 = vsel %vm910_vm8, %v5310_v18, 0.0 }
 0x303   : > { %v5313_v61 = vpop.eup %3923  ;;  %v919_v52 = vpop.xlane.xlu0 %918 }
 0x304   : > { %3935 = vpow2.f32 %v1350_v7  ;;  %v961_v51 = vsub.f32 %v5158_v17, %v919_v52  ;;  %v1383_v20 = vsel %vm910_vm8, %v5313_v61, 0.0  ;;  %v981_v55 = vmul.f32 1.442695, %v962_v60 }
 0x305   : > { %v5320_v50 = vpop.eup %3925  ;;  %1375 = vadd.xlane.f32.xlu0 %v1374_v49  ;;  %v1313_v38 = vpop.xlane.xlu1 %1312  ;;  %1384 = vadd.xlane.f32.xlu1 %v1383_v20  ;;  %3937 = vpow2.f32 %v1352_v40 }
 0x306   : > { %v979_v58 = vmul.f32 1.442695, %v961_v51  ;;  %v1337_v15 = vsub.f32 %v5208_v14, %v1313_v38  ;;  %v1398_v30 = vsel %vm910_vm8, %v5320_v50, 0.0 }
 0x307   : > { %v1310_v21 = vpop.xlane.xlu0 %1309 }
 0x308   : > { %3939 = vpow2.f32 %v979_v58  ;;  %v1336_v17 = vsub.f32 %v5196_v31, %v1310_v21  ;;  %v1364_v34 = vmul.f32 1.442695, %v1337_v15 }
 0x309   : > { %v5326_v53 = vpop.eup %3927  ;;  %1399 = vadd.xlane.f32.xlu0 %v1398_v30  ;;  %v1325_v22 = vpop.xlane.xlu1 %1324  ;;  %3941 = vpow2.f32 %v981_v55 }
 0x30a   : > { %v1362_v32 = vmul.f32 1.442695, %v1336_v17  ;;  %v1341_v37 = vsub.f32 %v5248_v36, %v1325_v22  ;;  %v1377_v45 = vsel %vm910_vm8, %v5326_v53, 0.0  ;;  %v5331_v14 = vpop.eup %3929 }
 0x30b   : > { %v1316_v44 = vpop.xlane.xlu0 %1315  ;;  %1378 = vadd.xlane.f32.xlu1 %v1377_v45  ;;  %v1401_v51 = vsel %vm910_vm8, %v5331_v14, 0.0 }
 0x30c   : > { %3943 = vpow2.f32 %v1362_v32  ;;  %v1338_v31 = vsub.f32 %v5242_v42, %v1316_v44  ;;  %v1372_v40 = vmul.f32 1.442695, %v1341_v37 }
 0x30d   : > { %v5334_v46 = vpop.eup %3931  ;;  %3945 = vpow2.f32 %v1364_v34  ;;  %v1319_v7 = vpop.xlane.xlu1 %1318 }
 0x30e   : > { %v1366_v60 = vmul.f32 1.442695, %v1338_v31  ;;  %v1339_v52 = vsub.f32 %v5254_v26, %v1319_v7  ;;  %v1392_v36 = vsel %vm910_vm8, %v5334_v46, 0.0  ;;  %v5341_v49 = vpop.eup %3933 }
 0x30f   : > { %1393 = vadd.xlane.f32.xlu0 %v1392_v36  ;;  %v1322_v20 = vpop.xlane.xlu0 %1321  ;;  %1402 = vadd.xlane.f32.xlu1 %v1401_v51  ;;  %v1395_v17 = vsel %vm910_vm8, %v5341_v49, 0.0 }
 0x310   : > { %3947 = vpow2.f32 %v1366_v60  ;;  %v1340_v42 = vsub.f32 %v5236_v41, %v1322_v20  ;;  %v1368_v55 = vmul.f32 1.442695, %v1339_v52 }
 0x311   : > { %v5344_v38 = vpop.eup %3935  ;;  %3949 = vpow2.f32 %v1372_v40  ;;  %v940_v58 = vpop.xlane.xlu1 %939 }
 0x312   : > { %v1370_v26 = vmul.f32 1.442695, %v1340_v42  ;;  %v968_v15 = vsub.f32 %v5176_v1, %v940_v58  ;;  %v1386_v21 = vsel %vm910_vm8, %v5344_v38, 0.0  ;;  %v5351_v30 = vpop.eup %3937 }
 0x313   : > { %1387 = vadd.xlane.f32.xlu0 %v1386_v21  ;;  %v937_v34 = vpop.xlane.xlu0 %936  ;;  %1396 = vadd.xlane.f32.xlu1 %v1395_v17  ;;  %v1389_v31 = vsel %vm910_vm8, %v5351_v30, 0.0 }
 0x314   : > { %3951 = vpow2.f32 %v1370_v26  ;;  %v967_v41 = vsub.f32 %v5172_v4, %v937_v34  ;;  %v993_v32 = vmul.f32 1.442695, %v968_v15 }
 0x315   : > { %v5354_v22 = vpop.eup %3939  ;;  %3953 = vpow2.f32 %v1368_v55  ;;  %v946_v37 = vpop.xlane.xlu1 %945 }
 0x316   : > { %v991_v1 = vmul.f32 1.442695, %v967_v41  ;;  %v970_v45 = vsub.f32 %v5174_v48, %v946_v37  ;;  %v1013_v44 = vsel %vm910_vm8, %v5354_v22, 0.0  ;;  %v5361_v40 = vpop.eup %3941 }
 0x317   : > { %1014 = vadd.xlane.f32.xlu0 %v1013_v44  ;;  %v943_v7 = vpop.xlane.xlu0 %942  ;;  %1390 = vadd.xlane.f32.xlu1 %v1389_v31  ;;  %v1016_v55 = vsel %vm910_vm8, %v5361_v40, 0.0 }
 0x318   : > { %3955 = vpow2.f32 %v991_v1  ;;  %v969_v4 = vsub.f32 %v5164_v28, %v943_v7  ;;  %v997_v52 = vmul.f32 1.442695, %v970_v45 }
 0x319   : > { %v5364_v60 = vpop.eup %3943  ;;  %3957 = vpow2.f32 %v993_v32  ;;  %v928_v36 = vpop.xlane.xlu1 %927 }
 0x31a   : > { %v5366_v48 = vpop.eup %3945  ;;  %v995_v51 = vmul.f32 1.442695, %v969_v4  ;;  %v964_v20 = vsub.f32 %v5190_v6, %v928_v36  ;;  %v1404_v42 = vsel %vm910_vm8, %v5364_v60, 0.0 }
 0x31b   : > { %1405 = vadd.xlane.f32.xlu0 %v1404_v42  ;;  %v925_v58 = vpop.xlane.xlu0 %924  ;;  %1017 = vadd.xlane.f32.xlu1 %v1016_v55  ;;  %v1407_v21 = vsel %vm910_vm8, %v5366_v48, 0.0 }
 0x31c   : > { %3959 = vpow2.f32 %v995_v51  ;;  %v963_v28 = vsub.f32 %v5182_v47, %v925_v58  ;;  %v985_v17 = vmul.f32 1.442695, %v964_v20 }
 0x31d   : > { %v5374_v26 = vpop.eup %3947  ;;  %3961 = vpow2.f32 %v997_v52  ;;  %v934_v15 = vpop.xlane.xlu1 %933 }
 0x31e   : > { %v5378_v6 = vpop.eup %3949  ;;  %v983_v34 = vmul.f32 1.442695, %v963_v28  ;;  %v966_v41 = vsub.f32 %v5186_v5, %v934_v15  ;;  %v1410_v32 = vsel %vm910_vm8, %v5374_v26, 0.0 }
 0x31f   : > { %1411 = vadd.xlane.f32.xlu0 %v1410_v32  ;;  %v931_v37 = vpop.xlane.xlu0 %930  ;;  %1408 = vadd.xlane.f32.xlu1 %v1407_v21  ;;  %v1419_v31 = vsel %vm910_vm8, %v5378_v6, 0.0 }
 0x320   : > { %3963 = vpow2.f32 %v983_v34  ;;  %v965_v47 = vsub.f32 %v5178_v35, %v931_v37  ;;  %v989_v45 = vmul.f32 1.442695, %v966_v41 }
 0x321   : > { %v5384_v1 = vpop.eup %3951  ;;  %v952_v44 = vpop.xlane.xlu1 %951  ;;  %3965 = vpow2.f32 %v985_v17 }
 0x322   : > { %v5388_v7 = vpop.eup %3953  ;;  %v987_v5 = vmul.f32 1.442695, %v965_v47  ;;  %v972_v4 = vsub.f32 %v5192_v13, %v952_v44  ;;  %v1416_v52 = vsel %vm910_vm8, %v5384_v1, 0.0 }
 0x323   : > { %1417 = vadd.xlane.f32.xlu0 %v1416_v52  ;;  %v949_v36 = vpop.xlane.xlu0 %948  ;;  %1420 = vadd.xlane.f32.xlu1 %v1419_v31  ;;  %v1413_v42 = vsel %vm910_vm8, %v5388_v7, 0.0 }
 0x324   : > { %3967 = vpow2.f32 %v987_v5  ;;  %v971_v35 = vsub.f32 %v5184_v2, %v949_v36  ;;  %v1001_v58 = vmul.f32 1.442695, %v972_v4 }
 0x325   : > { %v5394_v51 = vpop.eup %3955  ;;  %3969 = vpow2.f32 %v989_v45  ;;  %v958_v20 = vpop.xlane.xlu1 %957 }
 0x326   : > { %v5398_v55 = vpop.eup %3957  ;;  %v999_v13 = vmul.f32 1.442695, %v971_v35  ;;  %v974_v28 = vsub.f32 %v5188_v54, %v958_v20  ;;  %v1031_v15 = vsel %vm910_vm8, %v5394_v51, 0.0 }
 0x327   : > { %1032 = vadd.xlane.f32.xlu0 %v1031_v15  ;;  %v955_v21 = vpop.xlane.xlu0 %954  ;;  %1414 = vadd.xlane.f32.xlu1 %v1413_v42  ;;  %v1034_v34 = vsel %vm910_vm8, %v5398_v55, 0.0 }
 0x328   : > { %3971 = vpow2.f32 %v999_v13  ;;  %v973_v2 = vsub.f32 %v5180_v0, %v955_v21  ;;  %v1005_v32 = vmul.f32 1.442695, %v974_v28 }
 0x329   : > { %v5404_v17 = vpop.eup %3959  ;;  %3973 = vpow2.f32 %v1001_v58 }
 0x32a   : > { %v5408_v41 = vpop.eup %3961  ;;  %v1003_v37 = vmul.f32 1.442695, %v973_v2  ;;  %v1037_v54 = vsel %vm910_vm8, %v5404_v17, 0.0 }
 0x32b   : > { %1038 = vadd.xlane.f32.xlu0 %v1037_v54  ;;  %1035 = vadd.xlane.f32.xlu1 %v1034_v34  ;;  %v1040_v45 = vsel %vm910_vm8, %v5408_v41, 0.0 }
 0x32c   : > { %3975 = vpow2.f32 %v1003_v37 }
 0x32d   : > { %v5412_v47 = vpop.eup %3963  ;;  %3977 = vpow2.f32 %v1005_v32 }
 0x32e   : > { %v1019_v0 = vsel %vm910_vm8, %v5412_v47, 0.0  ;;  %v5418_v44 = vpop.eup %3965 }
 0x32f   : > { %1020 = vadd.xlane.f32.xlu0 %v1019_v0  ;;  %1041 = vadd.xlane.f32.xlu1 %v1040_v45  ;;  %v1022_v52 = vsel %vm910_vm8, %v5418_v44, 0.0 }
 0x331   : > { %v5420_v31 = vpop.eup %3967 }
 0x332   : > { %v5422_v5 = vpop.eup %3969  ;;  %v1025_v4 = vsel %vm910_vm8, %v5420_v31, 0.0 }
 0x333   : > { %1026 = vadd.xlane.f32.xlu0 %v1025_v4  ;;  %1023 = vadd.xlane.f32.xlu1 %v1022_v52  ;;  %v1028_v20 = vsel %vm910_vm8, %v5422_v5, 0.0 }
 0x335   : > { %v5428_v36 = vpop.eup %3971 }
 0x336   : > { %v1043_v35 = vsel %vm910_vm8, %v5428_v36, 0.0  ;;  %v5434_v42 = vpop.eup %3973 }
 0x337   : > { %1044 = vadd.xlane.f32.xlu0 %v1043_v35  ;;  %1029 = vadd.xlane.f32.xlu1 %v1028_v20  ;;  %v1046_v28 = vsel %vm910_vm8, %v5434_v42, 0.0 }
 0x339   : > { %v5436_v58 = vpop.eup %3975 }
 0x33a   : > { %v1049_v13 = vsel %vm910_vm8, %v5436_v58, 0.0  ;;  %v5442_v15 = vpop.eup %3977 }
 0x33b   : > { %1050 = vadd.xlane.f32.xlu0 %v1049_v13  ;;  %1047 = vadd.xlane.f32.xlu1 %v1046_v28  ;;  %v1052_v21 = vsel %vm910_vm8, %v5442_v15, 0.0 }
 0x33f   : > { %1053 = vadd.xlane.f32.xlu1 %v1052_v21 }
 0x36b   : > { %v1009_v2 = vpop.xlane.xlu0 %1008 }
 0x36c   : > { %3979 = vrcp.f32 %v1009_v2 }
 0x36f   : > { %v1012_v34 = vpop.xlane.xlu1 %1011 }
 0x370   : > { %3981 = vrcp.f32 %v1012_v34 }
 0x379   : > { %v3980_v32 = vpop.eup %3979 }
 0x37a   : > { %v1071_v54 = vmul.f32 %v3980_v32, %v5288_v12 }
 0x37d   : > { %v3982_v37 = vpop.eup %3981 }
 0x37e   : > { %v1072_v0 = vmul.f32 %v3982_v37, %v5292_v10 }
 0x380   : > { %v1087_v45 = vpack.c.bf16 %v1072_v0, %v1071_v54 }
 0x382   : > { %3560 = vmatprep.mubr.msk.bf16.mxu0 %vm910_vm8, %v1087_v45 }
 0x38a   : > { %v1382_v4 = vpop.xlane.xlu0 %1381 }
 0x38e   : > { %v1376_v52 = vpop.xlane.xlu0 %1375  ;;  %v1385_v35 = vpop.xlane.xlu1 %1384 }
 0x38f   : > { %3983 = vrcp.f32 %v1385_v35 }
 0x390   : > { %3985 = vrcp.f32 %v1376_v52 }
 0x391   : > { %3987 = vrcp.f32 %v1382_v4 }
 0x392   : > { %v1400_v20 = vpop.xlane.xlu0 %1399 }
 0x394   : > { %v1379_v13 = vpop.xlane.xlu1 %1378 }
 0x395   : > { %3989 = vrcp.f32 %v1379_v13 }
 0x396   : > { %3991 = vrcp.f32 %v1400_v20 }
 0x398   : > { %v1394_v28 = vpop.xlane.xlu0 %1393  ;;  %v1403_v21 = vpop.xlane.xlu1 %1402 }
 0x399   : > { %3993 = vrcp.f32 %v1403_v21 }
 0x39c   : > { %v1388_v2 = vpop.xlane.xlu0 %1387  ;;  %v1397_v34 = vpop.xlane.xlu1 %1396 }
 0x39d   : > { %v3984_v12 = vpop.eup %3983  ;;  %3995 = vrcp.f32 %v1397_v34 }
 0x39e   : > { %v3986_v10 = vpop.eup %3985  ;;  %3997 = vrcp.f32 %v1388_v2  ;;  %v1441_v45 = vmul.f32 %v3984_v12, %v5313_v61 }
 0x39f   : > { %v3988_v54 = vpop.eup %3987  ;;  %3999 = vrcp.f32 %v1394_v28  ;;  %v1438_v4 = vmul.f32 %v3986_v10, %v5310_v18 }
 0x3a0   : > { %v1015_v32 = vpop.xlane.xlu0 %1014  ;;  %v1391_v37 = vpop.xlane.xlu1 %1390  ;;  %v1440_v35 = vmul.f32 %v3988_v54, %v5305_v9 }
 0x3a1   : > { %4001 = vrcp.f32 %v1391_v37 }
 0x3a2   : > { %v3990_v0 = vpop.eup %3989  ;;  %4003 = vrcp.f32 %v1015_v32  ;;  %v1455_v34 = vpack.c.bf16 %v1441_v45, %v1440_v35 }
 0x3a3   : > { %v1439_v52 = vmul.f32 %v3990_v0, %v5326_v53  ;;  %v3992_v18 = vpop.eup %3991 }
 0x3a4   : > { %v1406_v20 = vpop.xlane.xlu0 %1405  ;;  %v1018_v13 = vpop.xlane.xlu1 %1017 }
 0x3a5   : > { %v1454_v21 = vpack.c.bf16 %v1439_v52, %v1438_v4  ;;  %4005 = vrcp.f32 %v1018_v13 }
 0x3a6   : > { %4007 = vrcp.f32 %v1406_v20  ;;  %v3994_v9 = vpop.eup %3993 }
 0x3a7   : > { %3528 = vmatprep.mubr.msk.bf16.mxu1 %vm910_vm8, %v1454_v21  ;;  %v1447_v52 = vmul.f32 %v3994_v9, %v5331_v14 }
 0x3a8   : > { %v1412_v28 = vpop.xlane.xlu0 %1411  ;;  %3529 = vmatmul.mubr.msk.bf16.vlgmr.msra.gmra.mxu1 %vm910_vm8, %v1455_v34  ;;  %v1409_v61 = vpop.xlane.xlu1 %1408 }
 0x3a9   : > { %3537 = vmatpush3.bf16.msra.mxu1 %v5078_v43  ;;  %4009 = vrcp.f32 %v1409_v61 }
 0x3aa   : > { %3538 = vmatprep.subr.bf16.mxu1 %v5135_v29  ;;  %v3996_v53 = vpop.eup %3995 }
 0x3ab   : > { %v3998_v10 = vpop.eup %3997  ;;  %v1445_v54 = vmul.f32 %v3996_v53, %v5341_v49  ;;  %v1446_v49 = vmul.f32 %v3992_v18, %v5320_v50  ;;  %v6205_v53 = vld [vmem:[#allocation24_spill] sm:$0xff] }
 0x3ac   : > { %v1418_v2 = vpop.xlane.xlu0 %1417  ;;  %v1421_v12 = vpop.xlane.xlu1 %1420  ;;  %v1442_v45 = vmul.f32 %v3998_v10, %v5344_v38 }
 0x3ad   : > { %3539 = vmatpush3.bf16.msra.mxu1 %v5135_v29  ;;  %v4000_v32 = vpop.eup %3999  ;;  %4011 = vrcp.f32 %v1418_v2 }
 0x3ae   : > { %3540 = vmatprep.subr.bf16.mxu1 %v5100_v16  ;;  %v4002_v37 = vpop.eup %4001  ;;  %4013 = vrcp.f32 %v1421_v12  ;;  %v1444_v29 = vmul.f32 %v4000_v32, %v5334_v46 }
 0x3af   : > { %4015 = vrcp.f32 %v1412_v28  ;;  %v1443_v4 = vmul.f32 %v4002_v37, %v5351_v30  ;;  %v4004_v35 = vpop.eup %4003 }
 0x3b0   : > { %v1033_v43 = vpop.xlane.xlu0 %1032  ;;  %v1415_v0 = vpop.xlane.xlu1 %1414  ;;  %v1457_v21 = vpack.c.bf16 %v1445_v54, %v1444_v29  ;;  %v1073_v34 = vmul.f32 %v4004_v35, %v5354_v22 }
 0x3b1   : > { %3541 = vmatpush3.bf16.msra.mxu1 %v5100_v16  ;;  %4017 = vrcp.f32 %v1415_v0  ;;  %v1456_v20 = vpack.c.bf16 %v1443_v4, %v1442_v45  ;;  %v1458_v16 = vpack.c.bf16 %v1447_v52, %v1446_v49 }
 0x3b2   : > { %3542 = vmatprep.subr.bf16.mxu1 %v5104_v3  ;;  %v4006_v13 = vpop.eup %4005  ;;  %4019 = vrcp.f32 %v1033_v43 }
 0x3b3   : > { %v1074_v38 = vmul.f32 %v4006_v13, %v5361_v40  ;;  %3532 = vmatprep.mubr.msk.bf16.mxu1 %vm910_vm8, %v1456_v20  ;;  %v4008_v28 = vpop.eup %4007 }
 0x3b4   : > { %v1039_v14 = vpop.xlane.xlu0 %1038  ;;  %v1036_v30 = vpop.xlane.xlu1 %1035  ;;  %3533 = vmatmul.mubr.msk.bf16.gmra.mxu1 %vm910_vm8, %v1457_v21  ;;  %v1448_v22 = vmul.f32 %v4008_v28, %v5364_v60  ;;  %v6209_v28 = vld [vmem:[#allocation25_spill] sm:$0xff] }
 0x3b5   : > { %v1088_v46 = vpack.c.bf16 %v1074_v38, %v1073_v34  ;;  %3543 = vmatpush3.bf16.msra.mxu1 %v5104_v3  ;;  %4021 = vrcp.f32 %v1036_v30  ;;  %3544 = vmatprep.mubr.msk.bf16.mxu1 %vm910_vm8, %v1458_v16  ;;  %v6208_v38 = vld [vmem:[#allocation29_spill] sm:$0xff] }
 0x3b6   : > { %v4010_v50 = vpop.eup %4009  ;;  %3568 = vmatprep.subr.bf16.mxu1 %v5139_v33  ;;  %4023 = vrcp.f32 %v1039_v14 }
 0x3b7   : > { %v1449_v40 = vmul.f32 %v4010_v50, %v5366_v48  ;;  %3561 = vmatmul.mubr.msk.bf16.vlgmr.msra.gmra.mxu0 %vm910_vm8, %v1088_v46 }
 0x3b8   : > { %v1021_v61 = vpop.xlane.xlu0 %1020  ;;  %v1042_v18 = vpop.xlane.xlu1 %1041  ;;  %3585 = vmatpush3.bf16.xpose.msra.mxu0 %v6167_v8 }
 0x3b9   : > { %v1459_v9 = vpack.c.bf16 %v1449_v40, %v1448_v22  ;;  %3586 = vmatprep.subr.bf16.mxu0 %v6205_v53  ;;  %4025 = vrcp.f32 %v1042_v18 }
 0x3ba   : > { %v4012_v3 = vpop.eup %4011  ;;  %4027 = vrcp.f32 %v1021_v61 }
 0x3bb   : > { %v4014_v2 = vpop.eup %4013  ;;  %v1452_v8 = vmul.f32 %v4012_v3, %v5384_v1 }
 0x3bc   : > { %v1027_v12 = vpop.xlane.xlu0 %1026  ;;  %v1024_v10 = vpop.xlane.xlu1 %1023  ;;  %3545 = vmatmul.mubr.msk.bf16.vlgmr.msra.gmra.mxu1 %vm910_vm8, %v1459_v9  ;;  %v1453_v48 = vmul.f32 %v4014_v2, %v5378_v6  ;;  %v6218_v2 = vld [vmem:[#allocation61_spill] sm:$0xff] }
 0x3bd   : > { %v4016_v32 = vpop.eup %4015  ;;  %3569 = vmatpush3.bf16.msra.mxu1 %v5139_v33  ;;  %4029 = vrcp.f32 %v1024_v10  ;;  %v6206_v33 = vld [vmem:[#allocation20_spill] sm:$0xff] }
 0x3be   : > { %v4018_v60 = vpop.eup %4017  ;;  %3570 = vmatprep.subr.bf16.mxu1 %v5142_v25  ;;  %4031 = vrcp.f32 %v1027_v12  ;;  %v1450_v43 = vmul.f32 %v4016_v32, %v5374_v26  ;;  %v1461_v6 = vpack.c.bf16 %v1453_v48, %v1452_v8  ;;  %v6219_v12 = vld [vmem:[#allocation34_spill] sm:$0xff] }
 0x3bf   : > { %v1451_v0 = vmul.f32 %v4018_v60, %v5388_v7  ;;  %v4020_v45 = vpop.eup %4019 }
 0x3c0   : > { %v1045_v37 = vpop.xlane.xlu0 %1044  ;;  %v1030_v54 = vpop.xlane.xlu1 %1029  ;;  %3587 = vmatpush3.bf16.xpose.msra.mxu0 %v6205_v53  ;;  %v1079_v7 = vmul.f32 %v4020_v45, %v5394_v51 }
 0x3c1   : > { %3571 = vmatpush3.bf16.msra.mxu1 %v5142_v25  ;;  %3588 = vmatprep.subr.bf16.mxu0 %v6206_v33  ;;  %4033 = vrcp.f32 %v1030_v54  ;;  %v1460_v4 = vpack.c.bf16 %v1451_v0, %v1450_v43 }
 0x3c2   : > { %v4022_v52 = vpop.eup %4021  ;;  %3572 = vmatprep.subr.bf16.mxu1 %v5108_v24  ;;  %4035 = vrcp.f32 %v1045_v37 }
 0x3c3   : > { %3548 = vmatprep.mubr.msk.bf16.mxu1 %vm910_vm8, %v1460_v4  ;;  %v1080_v35 = vmul.f32 %v4022_v52, %v5398_v55  ;;  %v4024_v29 = vpop.eup %4023 }
 0x3c4   : > { %v1051_v1 = vpop.xlane.xlu0 %1050  ;;  %v1048_v26 = vpop.xlane.xlu1 %1047  ;;  %3549 = vmatmul.mubr.msk.bf16.gmra.mxu1 %vm910_vm8, %v1461_v6  ;;  %v1081_v49 = vmul.f32 %v4024_v29, %v5404_v17 }
 0x3c5   : > { %3573 = vmatpush3.bf16.msra.mxu1 %v5108_v24  ;;  %4037 = vrcp.f32 %v1048_v26  ;;  %v1091_v25 = vpack.c.bf16 %v1080_v35, %v1079_v7  ;;  %v6207_v24 = vld [vmem:[#allocation16_spill] sm:$0xff] }
 0x3c6   : > { %v4026_v20 = vpop.eup %4025  ;;  %4039 = vrcp.f32 %v1051_v1  ;;  %3574 = vmatprep.subr.bf16.mxu1 %v5112_v11 }
 0x3c7   : > { %v1082_v13 = vmul.f32 %v4026_v20, %v5408_v41  ;;  %3576 = vmatprep.mubr.msk.bf16.mxu1 %vm910_vm8, %v1091_v25  ;;  %v4028_v21 = vpop.eup %4027 }
 0x3c8   : > { %v1054_v51 = vpop.xlane.xlu1 %1053  ;;  %3589 = vmatpush3.bf16.xpose.msra.mxu0 %v6206_v33  ;;  %v1075_v14 = vmul.f32 %v4028_v21, %v5412_v47 }
 0x3c9   : > { %4041 = vrcp.f32 %v1054_v51  ;;  %v1092_v55 = vpack.c.bf16 %v1082_v13, %v1081_v49  ;;  %3575 = vmatpush3.bf16.msra.mxu1 %v5112_v11  ;;  %3590 = vmatprep.subr.bf16.mxu0 %v6207_v24 }
 0x3ca   : > { %v4030_v34 = vpop.eup %4029  ;;  %3600 = vmatprep.subr.bf16.mxu1 %v6208_v38 }
 0x3cb   : > { %v1076_v17 = vmul.f32 %v4030_v34, %v5418_v44  ;;  %v4032_v41 = vpop.eup %4031 }
 0x3cc   : > { %3577 = vmatmul.mubr.msk.bf16.vlgmr.msra.gmra.mxu1 %vm910_vm8, %v1092_v55  ;;  %v1077_v11 = vmul.f32 %v4032_v41, %v5420_v31 }
 0x3cd   : > { %3601 = vmatpush3.bf16.xpose.msra.mxu1 %v6208_v38  ;;  %v1089_v30 = vpack.c.bf16 %v1076_v17, %v1075_v14 }
 0x3ce   : > { %v4034_v16 = vpop.eup %4033  ;;  %3602 = vmatprep.subr.bf16.mxu1 %v6209_v28 }
 0x3cf   : > { %3564 = vmatprep.mubr.msk.bf16.mxu0 %vm910_vm8, %v1089_v30  ;;  %v1078_v46 = vmul.f32 %v4034_v16, %v5422_v5  ;;  %v4036_v50 = vpop.eup %4035  ;;  %v6210_v5 = vld [vmem:[#allocation21_spill] sm:$0xff] }
 0x3d0   : > { %3591 = vmatpush3.bf16.xpose.msra.mxu0 %v6207_v24  ;;  %v1083_v40 = vmul.f32 %v4036_v50, %v5428_v36  ;;  %v6211_v36 = vld [vmem:[#allocation17_spill] sm:$0xff] }
 0x3d1   : > { %3616 = vmatprep.subr.bf16.mxu0 %v5083_v19  ;;  %v1090_v47 = vpack.c.bf16 %v1078_v46, %v1077_v11 }
 0x3d2   : > { %v4038_v44 = vpop.eup %4037 }
 0x3d3   : > { %v4040_v22 = vpop.eup %4039  ;;  %3565 = vmatmul.mubr.msk.bf16.gmra.mxu0 %vm910_vm8, %v1090_v47  ;;  %v1084_v61 = vmul.f32 %v4038_v44, %v5434_v42  ;;  %v6213_v42 = vld [vmem:[#allocation30_spill] sm:$0xff] }
 0x3d4   : > { %3592 = vmatprep.mubr.bf16.mxu0 %v4604_v56  ;;  %v1085_v9 = vmul.f32 %v4040_v22, %v5436_v58  ;;  %v6214_v58 = vld [vmem:[#allocation59_spill] sm:$0xff] }
 0x3d5   : > { %3603 = vmatpush3.bf16.xpose.msra.mxu1 %v6209_v28  ;;  %v1093_v31 = vpack.c.bf16 %v1084_v61, %v1083_v40 }
 0x3d6   : > { %v4042_v18 = vpop.eup %4041  ;;  %3604 = vmatprep.subr.bf16.mxu1 %v6210_v5 }
 0x3d7   : > { %v1086_v53 = vmul.f32 %v4042_v18, %v5442_v15  ;;  %3580 = vmatprep.mubr.msk.bf16.mxu1 %vm910_vm8, %v1093_v31  ;;  %v6215_v15 = vld [vmem:[#allocation60_spill] sm:$0xff] }
 0x3d9   : > { %v1094_v3 = vpack.c.bf16 %v1086_v53, %v1085_v9 }
 0x3db   : > { %3581 = vmatmul.mubr.msk.bf16.gmra.mxu1 %vm910_vm8, %v1094_v3  ;;  %3593 = vmatmul.mubr.bf16.vlgmr.msra.gmra.mxu0 %v4978_v59 }
 0x3dc   : > { %3608 = vmatprep.mubr.bf16.mxu1 %v4606_v57  ;;  %3617 = vmatpush3.bf16.msra.mxu0 %v5083_v19  ;;  %v6212_v19 = vld [vmem:[#allocation37_spill] sm:$0xff] }
 0x3dd   : > { %3596 = vmatprep.mubr.bf16.mxu0 %v4986_v63  ;;  %3605 = vmatpush3.bf16.xpose.msra.mxu1 %v6210_v5 }
 0x3de   : > { %3618 = vmatprep.subr.bf16.mxu0 %v5087_v23  ;;  %3606 = vmatprep.subr.bf16.mxu1 %v6211_v36 }
 0x3e0   : > { %3619 = vmatpush3.bf16.msra.mxu0 %v5087_v23  ;;  %v6216_v23 = vld [vmem:[#allocation35_spill] sm:$0xff] }
 0x3e1   : > { %3620 = vmatprep.subr.bf16.mxu0 %v5060_v39 }
 0x3e3   : > { %3597 = vmatmul.mubr.bf16.gmra.mxu0 %v5004_v62 }
 0x3e4   : > { %3621 = vmatpush3.bf16.msra.mxu0 %v5060_v39  ;;  %v6217_v39 = vld [vmem:[#allocation36_spill] sm:$0xff] }
 0x3e5   : > { %3607 = vmatpush3.bf16.xpose.msra.mxu1 %v6211_v36  ;;  %3622 = vmatprep.subr.bf16.mxu0 %v5064_v27 }
 0x3e6   : > { %3632 = vmatprep.subr.bf16.mxu1 %v6212_v19 }
 0x3e8   : > { %3623 = vmatpush3.bf16.msra.mxu0 %v5064_v27  ;;  %v6220_v27 = vld [vmem:[#allocation31_spill] sm:$0xff] }
 0x3e9   : > { %3648 = vmatprep.subr.bf16.mxu0 %v6213_v42 }
 0x3ec   : > { %3609 = vmatmul.mubr.bf16.vlgmr.msra.gmra.mxu1 %v6214_v58 }
 0x3ed   : > { %3612 = vmatprep.mubr.bf16.mxu1 %v6215_v15  ;;  %3633 = vmatpush3.bf16.msra.mxu1 %v6212_v19 }
 0x3ee   : > { %3634 = vmatprep.subr.bf16.mxu1 %v6216_v23 }
 0x3f1   : > { %3635 = vmatpush3.bf16.msra.mxu1 %v6216_v23 }
 0x3f2   : > { %3636 = vmatprep.subr.bf16.mxu1 %v6217_v39 }
 0x3f4   : > { %3613 = vmatmul.mubr.bf16.gmra.mxu1 %v6218_v2 }
 0x3f5   : > { %3637 = vmatpush3.bf16.msra.mxu1 %v6217_v39 }
 0x3f6   : > { %3638 = vmatprep.subr.bf16.mxu1 %v6219_v12 }
 0x3f9   : > { %3639 = vmatpush3.bf16.msra.mxu1 %v6219_v12 }
 0x3fa   : > { %3664 = vmatprep.subr.bf16.mxu1 %v6220_v27 }
 0x468   : > { %v3530_v10 = vpop.f32.mrf.mxu1 }
 0x46a   : > { %v1508_v32 = vpop.f32.mrf.mxu1 }
 0x46c   : > { %v3531_v60 = vpop.f32.mrf.mxu1 }
 0x46e   : > { %v1511_v8 = vpop.f32.mrf.mxu1 }
 0x474   : > { %v3534_v48 = vpop.f32.mrf.mxu1 }
 0x476   : > { %v1524_v37 = vpop.f32.mrf.mxu1 }
 0x477   : > { %v3562_v54 = vpop.f32.mrf.mxu0 }
 0x478   : > { %v5550_v43 = vadd.f32 %v3562_v54, %v3530_v10  ;;  %v3535_v0 = vpop.f32.mrf.mxu1 }
 0x479   : > { %v1662_v45 = vpop.f32.mrf.mxu0 }
 0x47a   : > { %v5552_v33 = vadd.f32 %v1662_v45, %v1508_v32  ;;  %v1527_v4 = vpop.f32.mrf.mxu1 }
 0x47b   : > { %v3563_v52 = vpop.f32.mrf.mxu0 }
 0x47c   : > { %v5554_v6 = vadd.f32 %v3563_v52, %v3531_v60  ;;  %v3546_v1 = vpop.f32.mrf.mxu1 }
 0x47d   : > { %v1665_v26 = vpop.f32.mrf.mxu0 }
 0x47e   : > { %v5556_v7 = vadd.f32 %v1665_v26, %v1511_v8  ;;  %v1585_v35 = vpop.f32.mrf.mxu1 }
 0x480   : > { %v3547_v29 = vpop.f32.mrf.mxu1 }
 0x482   : > { %v1588_v25 = vpop.f32.mrf.mxu1 }
 0x484   : > { %v3550_v20 = vpop.f32.mrf.mxu1 }
 0x486   : > { %v1601_v49 = vpop.f32.mrf.mxu1 }
 0x488   : > { %v3551_v13 = vpop.f32.mrf.mxu1 }
 0x48a   : > { %v1604_v51 = vpop.f32.mrf.mxu1 }
 0x48c   : > { %v3578_v21 = vpop.f32.mrf.mxu1 }
 0x48d   : > { %v5558_v55 = vadd.f32 %v3578_v21, %v3546_v1 }
 0x48e   : > { %v1739_v24 = vpop.f32.mrf.mxu1 }
 0x48f   : > { %v5560_v34 = vadd.f32 %v1739_v24, %v1585_v35 }
 0x490   : > { %v3579_v38 = vpop.f32.mrf.mxu1 }
 0x491   : > { %v5562_v14 = vadd.f32 %v3579_v38, %v3547_v29 }
 0x492   : > { %v1742_v17 = vpop.f32.mrf.mxu1 }
 0x493   : > { %v5564_v41 = vadd.f32 %v1742_v17, %v1588_v25  ;;  %v3566_v30 = vpop.f32.mrf.mxu0 }
 0x494   : > { %v5566_v16 = vadd.f32 %v3566_v30, %v3534_v48 }
 0x495   : > { %v1678_v28 = vpop.f32.mrf.mxu0 }
 0x496   : > { %v5568_v11 = vadd.f32 %v1678_v28, %v1524_v37 }
 0x497   : > { %v3567_v46 = vpop.f32.mrf.mxu0 }
 0x498   : > { %v5570_v50 = vadd.f32 %v3567_v46, %v3535_v0 }
 0x499   : > { %v1681_v47 = vpop.f32.mrf.mxu0 }
 0x49a   : > { %v5572_v44 = vadd.f32 %v1681_v47, %v1527_v4 }
 0x49b   : > { %v3582_v22 = vpop.f32.mrf.mxu1  ;;  %v3594_v61 = vpop.f32.mrf.mxu0 }
 0x49c   : > { %v5574_v40 = vadd.f32 %v3582_v22, %v3550_v20  ;;  %v1959_v12 = vsel %vm910_vm8, %v3594_v61, -inf }
 0x49d   : > { %v1755_v18 = vpop.f32.mrf.mxu1  ;;  %v1857_v5 = vpop.f32.mrf.mxu0 }
 0x49e   : > { %v5576_v31 = vadd.f32 %v1755_v18, %v1601_v49  ;;  %v1953_v9 = vsel %vm910_vm8, %v1857_v5, -inf }
 0x49f   : > { %v3583_v53 = vpop.f32.mrf.mxu1  ;;  %1954 = vmax.xlane.f32.xlu0 %v1953_v9  ;;  %v3595_v36 = vpop.f32.mrf.mxu0 }
 0x4a0   : > { %v5579_v3 = vadd.f32 %v3583_v53, %v3551_v13  ;;  %v1962_v32 = vsel %vm910_vm8, %v3595_v36, -inf }
 0x4a1   : > { %v1758_v19 = vpop.f32.mrf.mxu1  ;;  %v1860_v39 = vpop.f32.mrf.mxu0 }
 0x4a2   : > { %v5581_v23 = vadd.f32 %v1758_v19, %v1604_v51  ;;  %v1956_v10 = vsel %vm910_vm8, %v1860_v39, -inf }
 0x4a3   : > { %1960 = vmax.xlane.f32.xlu0 %v1959_v12  ;;  %1957 = vmax.xlane.f32.xlu1 %v1956_v10  ;;  %v5586_v60 = vpop.f32.mrf.mxu0 }
 0x4a4   : > { %v1971_v49 = vsel %vm910_vm8, %v5586_v60, -inf }
 0x4a5   : > { %v5589_v37 = vpop.f32.mrf.mxu0 }
 0x4a6   : > { %v1965_v35 = vsel %vm910_vm8, %v5589_v37, -inf }
 0x4a7   : > { %1963 = vmax.xlane.f32.xlu1 %v1962_v32  ;;  %v5593_v52 = vpop.f32.mrf.mxu0 }
 0x4a8   : > { %v1974_v21 = vsel %vm910_vm8, %v5593_v52, -inf }
 0x4a9   : > { %v5603_v25 = vpop.f32.mrf.mxu0 }
 0x4aa   : > { %v1968_v13 = vsel %vm910_vm8, %v5603_v25, -inf }
 0x4ac   : > { %v3610_v8 = vpop.f32.mrf.mxu1 }
 0x4ad   : > { %v1983_v48 = vsel %vm910_vm8, %v3610_v8, -inf }
 0x4ae   : > { %1984 = vmax.xlane.f32.xlu0 %v1983_v48  ;;  %v1922_v54 = vpop.f32.mrf.mxu1 }
 0x4af   : > { %v1977_v45 = vsel %vm910_vm8, %v1922_v54, -inf }
 0x4b0   : > { %v3611_v0 = vpop.f32.mrf.mxu1 }
 0x4b1   : > { %v1986_v4 = vsel %vm910_vm8, %v3611_v0, -inf }
 0x4b2   : > { %1978 = vmax.xlane.f32.xlu0 %v1977_v45  ;;  %1987 = vmax.xlane.f32.xlu1 %v1986_v4  ;;  %v5595_v1 = vpop.f32.mrf.mxu1 }
 0x4b3   : > { %v1980_v29 = vsel %vm910_vm8, %v5595_v1, -inf }
 0x4b4   : > { %v5597_v26 = vpop.f32.mrf.mxu1 }
 0x4b5   : > { %v1995_v17 = vsel %vm910_vm8, %v5597_v26, -inf }
 0x4b6   : > { %1966 = vmax.xlane.f32.xlu0 %v1965_v35  ;;  %1981 = vmax.xlane.f32.xlu1 %v1980_v29  ;;  %v5605_v20 = vpop.f32.mrf.mxu1 }
 0x4b7   : > { %v1989_v24 = vsel %vm910_vm8, %v5605_v20, -inf }
 0x4b8   : > { %v5611_v51 = vpop.f32.mrf.mxu1 }
 0x4b9   : > { %v1998_v28 = vsel %vm910_vm8, %v5611_v51, -inf }
 0x4ba   : > { %1972 = vmax.xlane.f32.xlu0 %v1971_v49  ;;  %1969 = vmax.xlane.f32.xlu1 %v1968_v13  ;;  %v5617_v38 = vpop.f32.mrf.mxu1 }
 0x4bb   : > { %v1992_v30 = vsel %vm910_vm8, %v5617_v38, -inf }
 0x4be   : > { %1975 = vmax.xlane.f32.xlu1 %v1974_v21  ;;  %1990 = vmax.xlane.f32.xlu0 %v1989_v24 }
 0x4c2   : > { %1996 = vmax.xlane.f32.xlu0 %v1995_v17  ;;  %1993 = vmax.xlane.f32.xlu1 %v1992_v30 }
 0x4c6   : > { %1999 = vmax.xlane.f32.xlu1 %v1998_v28 }
 0x528   : > { %v1955_v46 = vpop.xlane.xlu0 %1954 }
 0x529   : > { %v2001_v47 = vsub.f32 %v1857_v5, %v1955_v46 }
 0x52b   : > { %v2017_v22 = vmul.f32 1.442695, %v2001_v47 }
 0x52c   : > { %v1961_v18 = vpop.xlane.xlu0 %1960  ;;  %v1958_v9 = vpop.xlane.xlu1 %1957 }
 0x52d   : > { %4043 = vpow2.f32 %v2017_v22  ;;  %v2003_v53 = vsub.f32 %v3594_v61, %v1961_v18  ;;  %v2002_v19 = vsub.f32 %v1860_v39, %v1958_v9 }
 0x52f   : > { %v2021_v12 = vmul.f32 1.442695, %v2003_v53  ;;  %v2019_v10 = vmul.f32 1.442695, %v2002_v19 }
 0x530   : > { %v1964_v32 = vpop.xlane.xlu1 %1963 }
 0x531   : > { %4045 = vpow2.f32 %v2021_v12  ;;  %v2004_v48 = vsub.f32 %v3595_v36, %v1964_v32 }
 0x532   : > { %4047 = vpow2.f32 %v2019_v10 }
 0x533   : > { %v2023_v45 = vmul.f32 1.442695, %v2004_v48 }
 0x535   : > { %4049 = vpow2.f32 %v2023_v45 }
 0x537   : > { %v1985_v4 = vpop.xlane.xlu0 %1984 }
 0x538   : > { %v2011_v35 = vsub.f32 %v3610_v8, %v1985_v4 }
 0x53a   : > { %v5625_v29 = vpop.eup %4043  ;;  %v2037_v49 = vmul.f32 1.442695, %v2011_v35 }
 0x53b   : > { %v1979_v5 = vpop.xlane.xlu0 %1978  ;;  %v1988_v13 = vpop.xlane.xlu1 %1987  ;;  %v2049_v21 = vsel %vm910_vm8, %v5625_v29, 0.0 }
 0x53c   : > { %4051 = vpow2.f32 %v2037_v49  ;;  %v2009_v61 = vsub.f32 %v1922_v54, %v1979_v5  ;;  %v2012_v39 = vsub.f32 %v3611_v0, %v1988_v13  ;;  %2050 = vadd.xlane.f32.xlu0 %v2049_v21 }
 0x53e   : > { %v5629_v24 = vpop.eup %4045  ;;  %v2033_v36 = vmul.f32 1.442695, %v2009_v61  ;;  %v2039_v17 = vmul.f32 1.442695, %v2012_v39 }
 0x53f   : > { %v5631_v30 = vpop.eup %4047  ;;  %v1967_v28 = vpop.xlane.xlu0 %1966  ;;  %v2055_v46 = vsel %vm910_vm8, %v5629_v24, 0.0 }
 0x540   : > { %v1982_v8 = vpop.xlane.xlu1 %1981  ;;  %4053 = vpow2.f32 %v2033_v36  ;;  %v2005_v47 = vsub.f32 %v5589_v37, %v1967_v28  ;;  %2056 = vadd.xlane.f32.xlu0 %v2055_v46  ;;  %v2052_v54 = vsel %vm910_vm8, %v5631_v30, 0.0 }
 0x541   : > { %v2010_v22 = vsub.f32 %v5595_v1, %v1982_v8  ;;  %4055 = vpow2.f32 %v2039_v17  ;;  %2053 = vadd.xlane.f32.xlu1 %v2052_v54 }
 0x542   : > { %v5639_v0 = vpop.eup %4049  ;;  %v2025_v18 = vmul.f32 1.442695, %v2005_v47 }
 0x543   : > { %v2035_v9 = vmul.f32 1.442695, %v2010_v22  ;;  %v1973_v53 = vpop.xlane.xlu0 %1972  ;;  %v2058_v12 = vsel %vm910_vm8, %v5639_v0, 0.0 }
 0x544   : > { %v1970_v19 = vpop.xlane.xlu1 %1969  ;;  %4057 = vpow2.f32 %v2025_v18  ;;  %v2007_v37 = vsub.f32 %v5586_v60, %v1973_v53 }
 0x545   : > { %v2006_v1 = vsub.f32 %v5603_v25, %v1970_v19  ;;  %4059 = vpow2.f32 %v2035_v9  ;;  %2059 = vadd.xlane.f32.xlu1 %v2058_v12 }
 0x546   : > { %v2029_v10 = vmul.f32 1.442695, %v2007_v37 }
 0x547   : > { %v2027_v32 = vmul.f32 1.442695, %v2006_v1  ;;  %v1991_v48 = vpop.xlane.xlu0 %1990 }
 0x548   : > { %v1976_v45 = vpop.xlane.xlu1 %1975  ;;  %4061 = vpow2.f32 %v2029_v10  ;;  %v2013_v4 = vsub.f32 %v5605_v20, %v1991_v48 }
 0x549   : > { %v2008_v35 = vsub.f32 %v5593_v52, %v1976_v45  ;;  %v5647_v49 = vpop.eup %4051  ;;  %4063 = vpow2.f32 %v2027_v32 }
 0x54a   : > { %v2041_v5 = vmul.f32 1.442695, %v2013_v4  ;;  %v2079_v60 = vsel %vm910_vm8, %v5647_v49, 0.0 }
 0x54b   : > { %v2031_v13 = vmul.f32 1.442695, %v2008_v35  ;;  %2080 = vadd.xlane.f32.xlu0 %v2079_v60  ;;  %v1997_v25 = vpop.xlane.xlu0 %1996 }
 0x54c   : > { %v1994_v21 = vpop.xlane.xlu1 %1993  ;;  %4065 = vpow2.f32 %v2041_v5  ;;  %v2015_v61 = vsub.f32 %v5597_v26, %v1997_v25 }
 0x54d   : > { %v2014_v39 = vsub.f32 %v5617_v38, %v1994_v21  ;;  %v5653_v36 = vpop.eup %4053  ;;  %4067 = vpow2.f32 %v2031_v13 }
 0x54e   : > { %v5655_v52 = vpop.eup %4055  ;;  %v2045_v20 = vmul.f32 1.442695, %v2015_v61  ;;  %v2073_v28 = vsel %vm910_vm8, %v5653_v36, 0.0 }
 0x54f   : > { %v2043_v17 = vmul.f32 1.442695, %v2014_v39  ;;  %2074 = vadd.xlane.f32.xlu0 %v2073_v28  ;;  %v2082_v8 = vsel %vm910_vm8, %v5655_v52, 0.0 }
 0x550   : > { %v2000_v46 = vpop.xlane.xlu1 %1999  ;;  %4069 = vpow2.f32 %v2045_v20  ;;  %2083 = vadd.xlane.f32.xlu1 %v2082_v8 }
 0x551   : > { %v2016_v26 = vsub.f32 %v5611_v51, %v2000_v46  ;;  %v5662_v38 = vpop.eup %4057  ;;  %4071 = vpow2.f32 %v2043_v17 }
 0x552   : > { %v5664_v47 = vpop.eup %4059  ;;  %v2061_v54 = vsel %vm910_vm8, %v5662_v38, 0.0 }
 0x553   : > { %v2047_v22 = vmul.f32 1.442695, %v2016_v26  ;;  %2062 = vadd.xlane.f32.xlu0 %v2061_v54  ;;  %v2076_v18 = vsel %vm910_vm8, %v5664_v47, 0.0 }
 0x554   : > { %2077 = vadd.xlane.f32.xlu1 %v2076_v18 }
 0x555   : > { %4073 = vpow2.f32 %v2047_v22  ;;  %v5670_v9 = vpop.eup %4061 }
 0x556   : > { %v5672_v53 = vpop.eup %4063  ;;  %v2067_v51 = vsel %vm910_vm8, %v5670_v9, 0.0 }
 0x557   : > { %2068 = vadd.xlane.f32.xlu0 %v2067_v51  ;;  %v2064_v19 = vsel %vm910_vm8, %v5672_v53, 0.0 }
 0x558   : > { %2065 = vadd.xlane.f32.xlu1 %v2064_v19 }
 0x559   : > { %v5678_v12 = vpop.eup %4065 }
 0x55a   : > { %v5680_v37 = vpop.eup %4067  ;;  %v2085_v1 = vsel %vm910_vm8, %v5678_v12, 0.0 }
 0x55b   : > { %2086 = vadd.xlane.f32.xlu0 %v2085_v1  ;;  %v2070_v10 = vsel %vm910_vm8, %v5680_v37, 0.0 }
 0x55c   : > { %2071 = vadd.xlane.f32.xlu1 %v2070_v10 }
 0x55d   : > { %v5686_v32 = vpop.eup %4069 }
 0x55e   : > { %v5688_v48 = vpop.eup %4071  ;;  %v2091_v45 = vsel %vm910_vm8, %v5686_v32, 0.0 }
 0x55f   : > { %2092 = vadd.xlane.f32.xlu0 %v2091_v45  ;;  %v2088_v4 = vsel %vm910_vm8, %v5688_v48, 0.0 }
 0x560   : > { %2089 = vadd.xlane.f32.xlu1 %v2088_v4 }
 0x562   : > { %v5694_v35 = vpop.eup %4073 }
 0x563   : > { %v2094_v5 = vsel %vm910_vm8, %v5694_v35, 0.0 }
 0x564   : > { %2095 = vadd.xlane.f32.xlu1 %v2094_v5 }
 0x5c5   : > { %v2051_v13 = vpop.xlane.xlu0 %2050 }
 0x5c6   : > { %4075 = vrcp.f32 %v2051_v13 }
 0x5c9   : > { %v2057_v60 = vpop.xlane.xlu0 %2056 }
 0x5ca   : > { %v2054_v25 = vpop.xlane.xlu1 %2053 }
 0x5cb   : > { %4077 = vrcp.f32 %v2054_v25 }
 0x5cc   : > { %4079 = vrcp.f32 %v2057_v60 }
 0x5ce   : > { %v2060_v21 = vpop.xlane.xlu1 %2059 }
 0x5cf   : > { %4081 = vrcp.f32 %v2060_v21 }
 0x5d3   : > { %v4076_v39 = vpop.eup %4075 }
 0x5d4   : > { %v2081_v61 = vpop.xlane.xlu0 %2080  ;;  %v2113_v8 = vmul.f32 %v4076_v39, %v5625_v29  ;;  %v6222_v39 = vld [vmem:[#allocation22_spill] sm:$0xff] }
 0x5d8   : > { %v4078_v20 = vpop.eup %4077  ;;  %v2075_v17 = vpop.xlane.xlu0 %2074 }
 0x5d9   : > { %v2084_v28 = vpop.xlane.xlu1 %2083  ;;  %v2114_v46 = vmul.f32 %v4078_v20, %v5631_v30  ;;  %v4080_v26 = vpop.eup %4079  ;;  %v6221_v30 = vld [vmem:[#allocation26_spill] sm:$0xff] }
 0x5da   : > { %4083 = vrcp.f32 %v2084_v28  ;;  %v2115_v51 = vmul.f32 %v4080_v26, %v5629_v24 }
 0x5db   : > { %v2129_v22 = vpack.c.bf16 %v2114_v46, %v2113_v8  ;;  %4085 = vrcp.f32 %v2075_v17 }
 0x5dc   : > { %v4082_v54 = vpop.eup %4081  ;;  %v2063_v18 = vpop.xlane.xlu0 %2062  ;;  %4087 = vrcp.f32 %v2081_v61 }
 0x5dd   : > { %v2116_v19 = vmul.f32 %v4082_v54, %v5639_v0  ;;  %v2078_v1 = vpop.xlane.xlu1 %2077  ;;  %3624 = vmatprep.mubr.msk.bf16.mxu0 %vm910_vm8, %v2129_v22 }
 0x5de   : > { %4089 = vrcp.f32 %v2078_v1 }
 0x5df   : > { %v2130_v10 = vpack.c.bf16 %v2116_v19, %v2115_v51  ;;  %4091 = vrcp.f32 %v2063_v18  ;;  %v6224_v51 = vld [vmem:[#allocation18_spill] sm:$0xff] }
 0x5e0   : > { %v2069_v29 = vpop.xlane.xlu0 %2068 }
 0x5e1   : > { %v2066_v45 = vpop.xlane.xlu1 %2065  ;;  %3625 = vmatmul.mubr.msk.bf16.vlgmr.msra.gmra.mxu0 %vm910_vm8, %v2130_v10 }
 0x5e2   : > { %4093 = vrcp.f32 %v2066_v45  ;;  %3649 = vmatpush3.bf16.xpose.msra.mxu0 %v6213_v42 }
 0x5e3   : > { %3650 = vmatprep.subr.bf16.mxu0 %v6221_v30  ;;  %4095 = vrcp.f32 %v2069_v29 }
 0x5e4   : > { %v2087_v24 = vpop.xlane.xlu0 %2086 }
 0x5e5   : > { %v2072_v4 = vpop.xlane.xlu1 %2071 }
 0x5e6   : > { %4097 = vrcp.f32 %v2072_v4 }
 0x5e7   : > { %v4084_v0 = vpop.eup %4083  ;;  %4099 = vrcp.f32 %v2087_v24  ;;  %v6225_v24 = vld [vmem:[#allocation23_spill] sm:$0xff] }
 0x5e8   : > { %v4086_v5 = vpop.eup %4085  ;;  %v2093_v13 = vpop.xlane.xlu0 %2092  ;;  %v2124_v61 = vmul.f32 %v4084_v0, %v5655_v52  ;;  %v6228_v0 = vld [vmem:[#allocation32_spill] sm:$0xff] }
 0x5e9   : > { %v2090_v60 = vpop.xlane.xlu1 %2089  ;;  %v4088_v25 = vpop.eup %4087  ;;  %v2121_v42 = vmul.f32 %v4086_v5, %v5653_v36 }
 0x5ea   : > { %4101 = vrcp.f32 %v2090_v60  ;;  %3651 = vmatpush3.bf16.xpose.msra.mxu0 %v6221_v30  ;;  %v2123_v28 = vmul.f32 %v4088_v25, %v5647_v49 }
 0x5eb   : > { %v4090_v21 = vpop.eup %4089  ;;  %3652 = vmatprep.subr.bf16.mxu0 %v6222_v39  ;;  %4103 = vrcp.f32 %v2093_v13 }
 0x5ec   : > { %v2122_v20 = vmul.f32 %v4090_v21, %v5664_v47  ;;  %v4092_v17 = vpop.eup %4091  ;;  %v2134_v22 = vpack.c.bf16 %v2124_v61, %v2123_v28  ;;  %v6223_v47 = vld [vmem:[#allocation27_spill] sm:$0xff] }
 0x5ed   : > { %v2096_v8 = vpop.xlane.xlu1 %2095  ;;  %v2117_v54 = vmul.f32 %v4092_v17, %v5662_v38 }
 0x5ee   : > { %4105 = vrcp.f32 %v2096_v8  ;;  %v2133_v46 = vpack.c.bf16 %v2122_v20, %v2121_v42 }
 0x5ef   : > { %v4094_v26 = vpop.eup %4093 }
 0x5f0   : > { %3640 = vmatprep.mubr.msk.bf16.mxu1 %vm910_vm8, %v2133_v46  ;;  %v2118_v52 = vmul.f32 %v4094_v26, %v5672_v53  ;;  %v4096_v18 = vpop.eup %4095 }
 0x5f1   : > { %3641 = vmatmul.mubr.msk.bf16.vlgmr.msra.gmra.mxu1 %vm910_vm8, %v2134_v22  ;;  %v2119_v19 = vmul.f32 %v4096_v18, %v5670_v9 }
 0x5f2   : > { %3665 = vmatpush3.bf16.xpose.msra.mxu1 %v6220_v27  ;;  %3653 = vmatpush3.bf16.xpose.msra.mxu0 %v6222_v39  ;;  %v2131_v36 = vpack.c.bf16 %v2118_v52, %v2117_v54 }
 0x5f3   : > { %v4098_v49 = vpop.eup %4097  ;;  %3666 = vmatprep.subr.bf16.mxu1 %v6223_v47  ;;  %3654 = vmatprep.subr.bf16.mxu0 %v6224_v51 }
 0x5f4   : > { %3628 = vmatprep.mubr.msk.bf16.mxu0 %vm910_vm8, %v2131_v36  ;;  %v2120_v38 = vmul.f32 %v4098_v49, %v5680_v37  ;;  %v4100_v53 = vpop.eup %4099  ;;  %v6226_v37 = vld [vmem:[#allocation28_spill] sm:$0xff] }
 0x5f5   : > { %v2125_v27 = vmul.f32 %v4100_v53, %v5678_v12 }
 0x5f6   : > { %v2132_v1 = vpack.c.bf16 %v2120_v38, %v2119_v19 }
 0x5f7   : > { %v4102_v10 = vpop.eup %4101 }
 0x5f8   : > { %3629 = vmatmul.mubr.msk.bf16.gmra.mxu0 %vm910_vm8, %v2132_v1  ;;  %v2126_v29 = vmul.f32 %v4102_v10, %v5688_v48  ;;  %v4104_v45 = vpop.eup %4103 }
 0x5f9   : > { %3656 = vmatprep.mubr.bf16.mxu0 %v4604_v56  ;;  %v2127_v4 = vmul.f32 %v4104_v45, %v5686_v32  ;;  %v6227_v56 = vld [vmem:[#allocation19_spill] sm:$0xff]  ;;  %v6229_v32 = vld [vmem:[#allocation62_spill] sm:$0xff] }
 0x5fa   : > { %3667 = vmatpush3.bf16.xpose.msra.mxu1 %v6223_v47  ;;  %3655 = vmatpush3.bf16.xpose.msra.mxu0 %v6224_v51  ;;  %v2135_v30 = vpack.c.bf16 %v2126_v29, %v2125_v27 }
 0x5fb   : > { %v4106_v9 = vpop.eup %4105  ;;  %3668 = vmatprep.subr.bf16.mxu1 %v6225_v24  ;;  %3680 = vmatprep.subr.bf16.mxu0 %v6226_v37 }
 0x5fc   : > { %3644 = vmatprep.mubr.msk.bf16.mxu1 %vm910_vm8, %v2135_v30  ;;  %v2128_v12 = vmul.f32 %v4106_v9, %v5694_v35  ;;  %v6234_v35 = vld [vmem:[#allocation33_spill] sm:$0xff] }
 0x5fe   : > { %v2136_v48 = vpack.c.bf16 %v2128_v12, %v2127_v4 }
 0x600   : > { %3645 = vmatmul.mubr.msk.bf16.gmra.mxu1 %vm910_vm8, %v2136_v48 }
 0x601   : > { %3657 = vmatmul.mubr.bf16.vlgmr.msra.gmra.mxu0 %v4978_v59  ;;  %3672 = vmatprep.mubr.bf16.mxu1 %v4606_v57  ;;  %v6230_v57 = vld [vmem:[#allocation39_spill] sm:$0xff] }
 0x602   : > { %3669 = vmatpush3.bf16.xpose.msra.mxu1 %v6225_v24  ;;  %3660 = vmatprep.mubr.bf16.mxu0 %v4986_v63  ;;  %v6231_v59 = vld [vmem:[#allocation63_spill] sm:$0xff]  ;;  %v6232_v63 = vld [vmem:[#allocation40_spill] sm:$0xff] }
 0x603   : > { %3670 = vmatprep.subr.bf16.mxu1 %v6227_v56  ;;  %3681 = vmatpush3.bf16.msra.mxu0 %v6226_v37 }
 0x604   : > { %3682 = vmatprep.subr.bf16.mxu0 %v6228_v0 }
 0x607   : > { %3683 = vmatpush3.bf16.msra.mxu0 %v6228_v0 }
 0x608   : > { %3684 = vmatprep.subr.bf16.mxu0 %v6229_v32 }
 0x609   : > { %3661 = vmatmul.mubr.bf16.gmra.mxu0 %v5004_v62  ;;  %v6233_v62 = vld [vmem:[#allocation38_spill] sm:$0xff] }
 0x60a   : > { %3671 = vmatpush3.bf16.xpose.msra.mxu1 %v6227_v56 }
 0x60b   : > { %3685 = vmatpush3.bf16.msra.mxu0 %v6229_v32  ;;  %3696 = vmatprep.subr.bf16.mxu1 %v6230_v57 }
 0x60c   : > { %3686 = vmatprep.subr.bf16.mxu0 %v6231_v59 }
 0x60f   : > { %3687 = vmatpush3.bf16.msra.mxu0 %v6231_v59 }
 0x611   : > { %3673 = vmatmul.mubr.bf16.vlgmr.msra.gmra.mxu1 %v6214_v58 }
 0x612   : > { %3676 = vmatprep.mubr.bf16.mxu1 %v6215_v15  ;;  %3697 = vmatpush3.bf16.msra.mxu1 %v6230_v57 }
 0x613   : > { %3698 = vmatprep.subr.bf16.mxu1 %v6232_v63 }
 0x616   : > { %3699 = vmatpush3.bf16.msra.mxu1 %v6232_v63 }
 0x617   : > { %3700 = vmatprep.subr.bf16.mxu1 %v6233_v62 }
 0x619   : > { %3677 = vmatmul.mubr.bf16.gmra.mxu1 %v6218_v2 }
 0x61a   : > { %3701 = vmatpush3.bf16.msra.mxu1 %v6233_v62 }
 0x61b   : > { %3702 = vmatprep.subr.bf16.mxu1 %v6234_v35 }
 0x61e   : > { %3703 = vmatpush3.bf16.msra.mxu1 %v6234_v35 }
 0x6a1   : > { %v3626_v5 = vpop.f32.mrf.mxu0 }
 0x6a2   : > { %v5761_v58 = vadd.f32 %v3626_v5, %v5550_v43 }
 0x6a3   : > { %v2183_v15 = vpop.f32.mrf.mxu0 }
 0x6a4   : > { %v5764_v13 = vadd.f32 %v2183_v15, %v5552_v33 }
 0x6a5   : > { %v3627_v60 = vpop.f32.mrf.mxu0 }
 0x6a6   : > { %v5767_v25 = vadd.f32 %v3627_v60, %v5554_v6 }
 0x6a7   : > { %v2186_v21 = vpop.f32.mrf.mxu0 }
 0x6a8   : > { %v5770_v2 = vadd.f32 %v2186_v21, %v5556_v7 }
 0x6b1   : > { %v3642_v61 = vpop.f32.mrf.mxu1 }
 0x6b2   : > { %v5773_v39 = vadd.f32 %v3642_v61, %v5558_v55 }
 0x6b3   : > { %v2260_v42 = vpop.f32.mrf.mxu1 }
 0x6b4   : > { %v5776_v43 = vadd.f32 %v2260_v42, %v5560_v34 }
 0x6b5   : > { %v3643_v20 = vpop.f32.mrf.mxu1 }
 0x6b6   : > { %v5779_v33 = vadd.f32 %v3643_v20, %v5562_v14 }
 0x6b7   : > { %v2263_v17 = vpop.f32.mrf.mxu1 }
 0x6b8   : > { %v5782_v6 = vadd.f32 %v2263_v17, %v5564_v41  ;;  %v3630_v28 = vpop.f32.mrf.mxu0 }
 0x6b9   : > { %v5785_v7 = vadd.f32 %v3630_v28, %v5566_v16 }
 0x6ba   : > { %v2199_v8 = vpop.f32.mrf.mxu0 }
 0x6bb   : > { %v5788_v55 = vadd.f32 %v2199_v8, %v5568_v11 }
 0x6bc   : > { %v3631_v46 = vpop.f32.mrf.mxu0 }
 0x6bd   : > { %v5791_v34 = vadd.f32 %v3631_v46, %v5570_v50 }
 0x6be   : > { %v2202_v26 = vpop.f32.mrf.mxu0 }
 0x6bf   : > { %v5794_v14 = vadd.f32 %v2202_v26, %v5572_v44 }
 0x6c0   : > { %v3646_v22 = vpop.f32.mrf.mxu1 }
 0x6c1   : > { %v5797_v41 = vadd.f32 %v3646_v22, %v5574_v40  ;;  %v3658_v54 = vpop.f32.mrf.mxu0 }
 0x6c2   : > { %v2276_v52 = vpop.f32.mrf.mxu1  ;;  %v2496_v51 = vsel %vm910_vm8, %v3658_v54, -inf }
 0x6c3   : > { %v5800_v16 = vadd.f32 %v2276_v52, %v5576_v31  ;;  %v2394_v18 = vpop.f32.mrf.mxu0 }
 0x6c4   : > { %v3647_v11 = vpop.f32.mrf.mxu1  ;;  %v2490_v36 = vsel %vm910_vm8, %v2394_v18, -inf }
 0x6c5   : > { %v5804_v50 = vadd.f32 %v3647_v11, %v5579_v3  ;;  %2491 = vmax.xlane.f32.xlu0 %v2490_v36  ;;  %v5806_v49 = vpop.f32.mrf.mxu0 }
 0x6c6   : > { %v2279_v44 = vpop.f32.mrf.mxu1  ;;  %v2499_v3 = vsel %vm910_vm8, %v5806_v49, -inf }
 0x6c7   : > { %v5809_v47 = vadd.f32 %v2279_v44, %v5581_v23  ;;  %v2397_v40 = vpop.f32.mrf.mxu0 }
 0x6c8   : > { %v2493_v31 = vsel %vm910_vm8, %v2397_v40, -inf }
 0x6c9   : > { %2497 = vmax.xlane.f32.xlu0 %v2496_v51  ;;  %2494 = vmax.xlane.f32.xlu1 %v2493_v31  ;;  %v3662_v19 = vpop.f32.mrf.mxu0 }
 0x6ca   : > { %v2508_v10 = vsel %vm910_vm8, %v3662_v19, -inf }
 0x6cb   : > { %v2410_v38 = vpop.f32.mrf.mxu0 }
 0x6cc   : > { %v2502_v53 = vsel %vm910_vm8, %v2410_v38, -inf }
 0x6cd   : > { %2500 = vmax.xlane.f32.xlu1 %v2499_v3  ;;  %2503 = vmax.xlane.f32.xlu0 %v2502_v53  ;;  %v5816_v1 = vpop.f32.mrf.mxu0 }
 0x6ce   : > { %v2511_v30 = vsel %vm910_vm8, %v5816_v1, -inf }
 0x6cf   : > { %v2413_v23 = vpop.f32.mrf.mxu0 }
 0x6d0   : > { %v2505_v27 = vsel %vm910_vm8, %v2413_v23, -inf }
 0x6d1   : > { %v5820_v29 = vpop.f32.mrf.mxu1  ;;  %2509 = vmax.xlane.f32.xlu0 %v2508_v10  ;;  %2506 = vmax.xlane.f32.xlu1 %v2505_v27 }
 0x6d2   : > { %v2520_v4 = vsel %vm910_vm8, %v5820_v29, -inf }
 0x6d3   : > { %v2459_v45 = vpop.f32.mrf.mxu1 }
 0x6d4   : > { %v2514_v9 = vsel %vm910_vm8, %v2459_v45, -inf }
 0x6d5   : > { %v5825_v24 = vpop.f32.mrf.mxu1  ;;  %2512 = vmax.xlane.f32.xlu1 %v2511_v30  ;;  %2515 = vmax.xlane.f32.xlu0 %v2514_v9 }
 0x6d6   : > { %v2523_v0 = vsel %vm910_vm8, %v5825_v24, -inf }
 0x6d7   : > { %v5827_v37 = vpop.f32.mrf.mxu1 }
 0x6d8   : > { %v2517_v12 = vsel %vm910_vm8, %v5827_v37, -inf }
 0x6d9   : > { %v5833_v48 = vpop.f32.mrf.mxu1  ;;  %2521 = vmax.xlane.f32.xlu0 %v2520_v4  ;;  %2518 = vmax.xlane.f32.xlu1 %v2517_v12 }
 0x6da   : > { %v2532_v63 = vsel %vm910_vm8, %v5833_v48, -inf }
 0x6db   : > { %v5835_v56 = vpop.f32.mrf.mxu1 }
 0x6dc   : > { %v2526_v32 = vsel %vm910_vm8, %v5835_v56, -inf }
 0x6dd   : > { %v5841_v57 = vpop.f32.mrf.mxu1  ;;  %2524 = vmax.xlane.f32.xlu1 %v2523_v0  ;;  %2527 = vmax.xlane.f32.xlu0 %v2526_v32 }
 0x6de   : > { %v2535_v35 = vsel %vm910_vm8, %v5841_v57, -inf }
 0x6df   : > { %v5843_v59 = vpop.f32.mrf.mxu1 }
 0x6e0   : > { %v2529_v62 = vsel %vm910_vm8, %v5843_v59, -inf }
 0x6e1   : > { %2533 = vmax.xlane.f32.xlu0 %v2532_v63  ;;  %2530 = vmax.xlane.f32.xlu1 %v2529_v62 }
 0x6e5   : > { %2536 = vmax.xlane.f32.xlu1 %v2535_v35 }
 0x74e   : > { %v2492_v5 = vpop.xlane.xlu0 %2491 }
 0x74f   : > { %v2538_v15 = vsub.f32 %v2394_v18, %v2492_v5 }
 0x751   : > { %v2554_v60 = vmul.f32 1.442695, %v2538_v15 }
 0x752   : > { %v2498_v21 = vpop.xlane.xlu0 %2497  ;;  %v2495_v61 = vpop.xlane.xlu1 %2494 }
 0x753   : > { %4107 = vpow2.f32 %v2554_v60  ;;  %v2540_v42 = vsub.f32 %v3658_v54, %v2498_v21  ;;  %v2539_v20 = vsub.f32 %v2397_v40, %v2495_v61 }
 0x755   : > { %v2558_v17 = vmul.f32 1.442695, %v2540_v42  ;;  %v2556_v28 = vmul.f32 1.442695, %v2539_v20 }
 0x756   : > { %v2504_v8 = vpop.xlane.xlu0 %2503  ;;  %v2501_v46 = vpop.xlane.xlu1 %2500 }
 0x757   : > { %4109 = vpow2.f32 %v2558_v17  ;;  %v2542_v26 = vsub.f32 %v2410_v38, %v2504_v8  ;;  %v2541_v22 = vsub.f32 %v5806_v49, %v2501_v46 }
 0x758   : > { %4111 = vpow2.f32 %v2556_v28 }
 0x759   : > { %v2562_v52 = vmul.f32 1.442695, %v2542_v26  ;;  %v2560_v11 = vmul.f32 1.442695, %v2541_v22 }
 0x75a   : > { %v2510_v36 = vpop.xlane.xlu0 %2509  ;;  %v2507_v44 = vpop.xlane.xlu1 %2506 }
 0x75b   : > { %4113 = vpow2.f32 %v2562_v52  ;;  %v2544_v18 = vsub.f32 %v3662_v19, %v2510_v36  ;;  %v2543_v51 = vsub.f32 %v2413_v23, %v2507_v44 }
 0x75c   : > { %4115 = vpow2.f32 %v2560_v11 }
 0x75d   : > { %v2566_v31 = vmul.f32 1.442695, %v2544_v18  ;;  %v2564_v54 = vmul.f32 1.442695, %v2543_v51 }
 0x75e   : > { %v2516_v40 = vpop.xlane.xlu0 %2515  ;;  %v2513_v3 = vpop.xlane.xlu1 %2512 }
 0x75f   : > { %4117 = vpow2.f32 %v2566_v31  ;;  %v2546_v53 = vsub.f32 %v2459_v45, %v2516_v40  ;;  %v2545_v10 = vsub.f32 %v5816_v1, %v2513_v3 }
 0x760   : > { %v5853_v38 = vpop.eup %4107  ;;  %4119 = vpow2.f32 %v2564_v54 }
 0x761   : > { %v2570_v49 = vmul.f32 1.442695, %v2546_v53  ;;  %v2568_v27 = vmul.f32 1.442695, %v2545_v10  ;;  %v2586_v30 = vsel %vm910_vm8, %v5853_v38, 0.0 }
 0x762   : > { %v2522_v9 = vpop.xlane.xlu0 %2521  ;;  %2587 = vadd.xlane.f32.xlu0 %v2586_v30  ;;  %v2519_v19 = vpop.xlane.xlu1 %2518 }
 0x763   : > { %4121 = vpow2.f32 %v2570_v49  ;;  %v2548_v23 = vsub.f32 %v5820_v29, %v2522_v9  ;;  %v2547_v4 = vsub.f32 %v5827_v37, %v2519_v19 }
 0x764   : > { %v5859_v12 = vpop.eup %4109  ;;  %4123 = vpow2.f32 %v2568_v27 }
 0x765   : > { %v5861_v1 = vpop.eup %4111  ;;  %v2574_v45 = vmul.f32 1.442695, %v2548_v23  ;;  %v2572_v0 = vmul.f32 1.442695, %v2547_v4  ;;  %v2592_v32 = vsel %vm910_vm8, %v5859_v12, 0.0 }
 0x766   : > { %2593 = vadd.xlane.f32.xlu0 %v2592_v32  ;;  %v2528_v63 = vpop.xlane.xlu0 %2527  ;;  %v2589_v62 = vsel %vm910_vm8, %v5861_v1, 0.0  ;;  %v2525_v35 = vpop.xlane.xlu1 %2524 }
 0x767   : > { %4125 = vpow2.f32 %v2574_v45  ;;  %v2550_v29 = vsub.f32 %v5835_v56, %v2528_v63  ;;  %2590 = vadd.xlane.f32.xlu1 %v2589_v62  ;;  %v2549_v37 = vsub.f32 %v5825_v24, %v2525_v35  ;;  %v3907_v45 = vld [vmem:[#allocation7 + $0x38] sm:$0xff]  }
 0x768   : > { %v5869_v5 = vpop.eup %4113  ;;  %4127 = vpow2.f32 %v2572_v0  ;;  %3712 = vmatprep.subr.bf16.mxu0 %v3907_v45 }
 0x769   : > { %v5871_v15 = vpop.eup %4115  ;;  %v2578_v60 = vmul.f32 1.442695, %v2550_v29  ;;  %v2576_v21 = vmul.f32 1.442695, %v2549_v37  ;;  %v2598_v61 = vsel %vm910_vm8, %v5869_v5, 0.0 }
 0x76a   : > { %2599 = vadd.xlane.f32.xlu0 %v2598_v61  ;;  %v2534_v42 = vpop.xlane.xlu0 %2533  ;;  %v2595_v20 = vsel %vm910_vm8, %v5871_v15, 0.0  ;;  %v2531_v17 = vpop.xlane.xlu1 %2530 }
 0x76b   : > { %4129 = vpow2.f32 %v2578_v60  ;;  %v2552_v56 = vsub.f32 %v5833_v48, %v2534_v42  ;;  %2596 = vadd.xlane.f32.xlu1 %v2595_v20  ;;  %v2551_v24 = vsub.f32 %v5843_v59, %v2531_v17 }
 0x76c   : > { %v5879_v28 = vpop.eup %4117  ;;  %4131 = vpow2.f32 %v2576_v21 }
 0x76d   : > { %v5881_v8 = vpop.eup %4119  ;;  %v2582_v46 = vmul.f32 1.442695, %v2552_v56  ;;  %v2580_v26 = vmul.f32 1.442695, %v2551_v24  ;;  %v2604_v22 = vsel %vm910_vm8, %v5879_v28, 0.0 }
 0x76e   : > { %2605 = vadd.xlane.f32.xlu0 %v2604_v22  ;;  %v2601_v52 = vsel %vm910_vm8, %v5881_v8, 0.0  ;;  %v2537_v11 = vpop.xlane.xlu1 %2536 }
 0x76f   : > { %4133 = vpow2.f32 %v2582_v46  ;;  %2602 = vadd.xlane.f32.xlu1 %v2601_v52  ;;  %v2553_v48 = vsub.f32 %v5841_v57, %v2537_v11 }
 0x770   : > { %v5888_v59 = vpop.eup %4121  ;;  %4135 = vpow2.f32 %v2580_v26 }
 0x771   : > { %v5890_v36 = vpop.eup %4123  ;;  %v2584_v44 = vmul.f32 1.442695, %v2553_v48  ;;  %v2610_v18 = vsel %vm910_vm8, %v5888_v59, 0.0 }
 0x772   : > { %2611 = vadd.xlane.f32.xlu0 %v2610_v18  ;;  %v2607_v51 = vsel %vm910_vm8, %v5890_v36, 0.0 }
 0x773   : > { %4137 = vpow2.f32 %v2584_v44  ;;  %2608 = vadd.xlane.f32.xlu1 %v2607_v51 }
 0x774   : > { %v5896_v31 = vpop.eup %4125 }
 0x775   : > { %v5898_v54 = vpop.eup %4127  ;;  %v2616_v57 = vsel %vm910_vm8, %v5896_v31, 0.0 }
 0x776   : > { %2617 = vadd.xlane.f32.xlu0 %v2616_v57  ;;  %v2613_v40 = vsel %vm910_vm8, %v5898_v54, 0.0 }
 0x777   : > { %2614 = vadd.xlane.f32.xlu1 %v2613_v40 }
 0x778   : > { %v5904_v3 = vpop.eup %4129 }
 0x779   : > { %v5906_v53 = vpop.eup %4131  ;;  %v2622_v10 = vsel %vm910_vm8, %v5904_v3, 0.0 }
 0x77a   : > { %2623 = vadd.xlane.f32.xlu0 %v2622_v10  ;;  %v2619_v49 = vsel %vm910_vm8, %v5906_v53, 0.0 }
 0x77b   : > { %2620 = vadd.xlane.f32.xlu1 %v2619_v49 }
 0x77c   : > { %v5912_v27 = vpop.eup %4133 }
 0x77d   : > { %v5914_v30 = vpop.eup %4135  ;;  %v2628_v9 = vsel %vm910_vm8, %v5912_v27, 0.0 }
 0x77e   : > { %2629 = vadd.xlane.f32.xlu0 %v2628_v9  ;;  %v2625_v19 = vsel %vm910_vm8, %v5914_v30, 0.0  ;;  %v3909_v9 = vld [vmem:[#allocation7 + $0x28] sm:$0xff]  }
 0x77f   : > { %2626 = vadd.xlane.f32.xlu1 %v2625_v19 }
 0x780   : > { %v5920_v23 = vpop.eup %4137 }
 0x781   : > { %v2631_v4 = vsel %vm910_vm8, %v5920_v23, 0.0 }
 0x783   : > { %2632 = vadd.xlane.f32.xlu1 %v2631_v4 }
 0x7eb   : > { %v2588_v0 = vpop.xlane.xlu0 %2587 }
 0x7ec   : > { %4139 = vrcp.f32 %v2588_v0 }
 0x7ef   : > { %v2594_v32 = vpop.xlane.xlu0 %2593 }
 0x7f0   : > { %v2591_v63 = vpop.xlane.xlu1 %2590 }
 0x7f1   : > { %4141 = vrcp.f32 %v2591_v63  ;;  %v3910_v63 = vld [vmem:[#allocation7 + $0x20] sm:$0xff]  }
 0x7f2   : > { %4143 = vrcp.f32 %v2594_v32 }
 0x7f3   : > { %v2600_v62 = vpop.xlane.xlu0 %2599 }
 0x7f4   : > { %v2597_v35 = vpop.xlane.xlu1 %2596 }
 0x7f5   : > { %4145 = vrcp.f32 %v2597_v35 }
 0x7f6   : > { %4147 = vrcp.f32 %v2600_v62 }
 0x7f7   : > { %v2606_v29 = vpop.xlane.xlu0 %2605 }
 0x7f8   : > { %v2603_v37 = vpop.xlane.xlu1 %2602 }
 0x7f9   : > { %4149 = vrcp.f32 %v2603_v37  ;;  %v4140_v21 = vpop.eup %4139 }
 0x7fa   : > { %4151 = vrcp.f32 %v2606_v29  ;;  %v2650_v17 = vmul.f32 %v4140_v21, %v5853_v38  ;;  %v3908_v38 = vld [vmem:[#allocation7 + $0x30] sm:$0xff]  }
 0x7fb   : > { %v2612_v60 = vpop.xlane.xlu0 %2611 }
 0x7fc   : > { %v2609_v61 = vpop.xlane.xlu1 %2608 }
 0x7fd   : > { %4153 = vrcp.f32 %v2609_v61 }
 0x7fe   : > { %v4142_v42 = vpop.eup %4141  ;;  %4155 = vrcp.f32 %v2612_v60 }
 0x7ff   : > { %v2618_v20 = vpop.xlane.xlu0 %2617  ;;  %v2651_v56 = vmul.f32 %v4142_v42, %v5861_v1  ;;  %v4144_v24 = vpop.eup %4143 }
 0x800   : > { %v2615_v46 = vpop.xlane.xlu1 %2614  ;;  %v2652_v52 = vmul.f32 %v4144_v24, %v5859_v12 }
 0x801   : > { %4157 = vrcp.f32 %v2615_v46  ;;  %v2666_v26 = vpack.c.bf16 %v2651_v56, %v2650_v17 }
 0x802   : > { %v4146_v22 = vpop.eup %4145  ;;  %4159 = vrcp.f32 %v2618_v20 }
 0x803   : > { %v2653_v11 = vmul.f32 %v4146_v22, %v5871_v15  ;;  %3688 = vmatprep.mubr.msk.bf16.mxu0 %vm910_vm8, %v2666_v26  ;;  %v2624_v48 = vpop.xlane.xlu0 %2623  ;;  %v4148_v44 = vpop.eup %4147  ;;  %v3912_v26 = vld [vmem:[#allocation7 + $0x10] sm:$0xff]   ;;  %v3913_v22 = vld [vmem:[#allocation7 + $0x8] sm:$0xff]  }
 0x804   : > { %v2621_v18 = vpop.xlane.xlu1 %2620  ;;  %v2654_v1 = vmul.f32 %v4148_v44, %v5869_v5 }
 0x805   : > { %v2667_v51 = vpack.c.bf16 %v2653_v11, %v2652_v52  ;;  %4161 = vrcp.f32 %v2621_v18 }
 0x806   : > { %v4150_v57 = vpop.eup %4149  ;;  %4163 = vrcp.f32 %v2624_v48 }
 0x807   : > { %3689 = vmatmul.mubr.msk.bf16.vlgmr.msra.gmra.mxu0 %vm910_vm8, %v2667_v51  ;;  %v2655_v40 = vmul.f32 %v4150_v57, %v5881_v8  ;;  %v4152_v12 = vpop.eup %4151  ;;  %v2630_v10 = vpop.xlane.xlu0 %2629 }
 0x808   : > { %v2627_v15 = vpop.xlane.xlu1 %2626  ;;  %3713 = vmatpush3.bf16.msra.mxu0 %v3907_v45  ;;  %v2656_v4 = vmul.f32 %v4152_v12, %v5879_v28  ;;  %v3911_v28 = vld [vmem:[#allocation7 + $0x18] sm:$0xff]  }
 0x809   : > { %4165 = vrcp.f32 %v2627_v15  ;;  %v2668_v49 = vpack.c.bf16 %v2655_v40, %v2654_v1  ;;  %3714 = vmatprep.subr.bf16.mxu0 %v3908_v38 }
 0x80a   : > { %v4154_v19 = vpop.eup %4153  ;;  %4167 = vrcp.f32 %v2630_v10 }
 0x80b   : > { %3692 = vmatprep.mubr.msk.bf16.mxu0 %vm910_vm8, %v2668_v49  ;;  %v2657_v0 = vmul.f32 %v4154_v19, %v5890_v36  ;;  %v4156_v32 = vpop.eup %4155 }
 0x80c   : > { %v2633_v5 = vpop.xlane.xlu1 %2632  ;;  %3715 = vmatpush3.bf16.msra.mxu0 %v3908_v38  ;;  %v2658_v62 = vmul.f32 %v4156_v32, %v5888_v59 }
 0x80d   : > { %4169 = vrcp.f32 %v2633_v5  ;;  %v2669_v8 = vpack.c.bf16 %v2657_v0, %v2656_v4  ;;  %3716 = vmatprep.subr.bf16.mxu0 %v3909_v9 }
 0x80e   : > { %v4158_v45 = vpop.eup %4157 }
 0x80f   : > { %3693 = vmatmul.mubr.msk.bf16.gmra.mxu0 %vm910_vm8, %v2669_v8  ;;  %v2659_v35 = vmul.f32 %v4158_v45, %v5898_v54  ;;  %v4160_v29 = vpop.eup %4159 }
 0x810   : > { %3717 = vmatpush3.bf16.msra.mxu0 %v3909_v9  ;;  %v2660_v60 = vmul.f32 %v4160_v29, %v5896_v31 }
 0x811   : > { %v2670_v37 = vpack.c.bf16 %v2659_v35, %v2658_v62  ;;  %3718 = vmatprep.subr.bf16.mxu0 %v3910_v63 }
 0x812   : > { %v4162_v36 = vpop.eup %4161 }
 0x813   : > { %v2661_v21 = vmul.f32 %v4162_v36, %v5906_v53  ;;  %3704 = vmatprep.mubr.msk.bf16.mxu1 %vm910_vm8, %v2670_v37  ;;  %v4164_v61 = vpop.eup %4163 }
 0x814   : > { %3719 = vmatpush3.bf16.msra.mxu0 %v3910_v63  ;;  %v2662_v59 = vmul.f32 %v4164_v61, %v5904_v3  ;;  %v3914_v3 = vld [vmem:[#allocation7] sm:$0xff]  }
 0x815   : > { %v2671_v42 = vpack.c.bf16 %v2661_v21, %v2660_v60  ;;  %3720 = vmatprep.subr.bf16.mxu0 %v3911_v28 }
 0x816   : > { %v4166_v20 = vpop.eup %4165 }
 0x817   : > { %3705 = vmatmul.mubr.msk.bf16.vlgmr.msra.gmra.mxu1 %vm910_vm8, %v2671_v42  ;;  %v2663_v54 = vmul.f32 %v4166_v20, %v5914_v30  ;;  %v4168_v17 = vpop.eup %4167 }
 0x818   : > { %3721 = vmatpush3.bf16.msra.mxu0 %v3911_v28  ;;  %v2664_v31 = vmul.f32 %v4168_v17, %v5912_v27 }
 0x819   : > { %v2672_v56 = vpack.c.bf16 %v2663_v54, %v2662_v59  ;;  %3722 = vmatprep.subr.bf16.mxu0 %v3912_v26 }
 0x81a   : > { %v4170_v24 = vpop.eup %4169 }
 0x81b   : > { %3708 = vmatprep.mubr.msk.bf16.mxu1 %vm910_vm8, %v2672_v56  ;;  %v2665_v53 = vmul.f32 %v4170_v24, %v5920_v23 }
 0x81c   : > { %3723 = vmatpush3.bf16.msra.mxu0 %v3912_v26 }
 0x81d   : > { %v2673_v46 = vpack.c.bf16 %v2665_v53, %v2664_v31  ;;  %3724 = vmatprep.subr.bf16.mxu0 %v3913_v22 }
 0x81f   : > { %3709 = vmatmul.mubr.msk.bf16.gmra.mxu1 %vm910_vm8, %v2673_v46 }
 0x820   : > { %3725 = vmatpush3.bf16.msra.mxu0 %v3913_v22 }
 0x821   : > { %3726 = vmatprep.subr.bf16.mxu0 %v3914_v3 }
 0x824   : > { %3727 = vmatpush3.bf16.msra.mxu0 %v3914_v3 }
 0x8c7   : > { %v3690_v30 = vpop.f32.mrf.mxu0 }
 0x8c8   : > { %v2830_v48 = vadd.f32 %v3690_v30, %v5761_v58 }
 0x8c9   : > { %v2720_v52 = vpop.f32.mrf.mxu0 }
 0x8ca   : > { %v2828_v44 = vadd.f32 %v2720_v52, %v5764_v13 }
 0x8cb   : > { %v3691_v11 = vpop.f32.mrf.mxu0 }
 0x8cc   : > { %v2831_v27 = vadd.f32 %v3691_v11, %v5767_v25 }
 0x8cd   : > { %v2723_v23 = vpop.f32.mrf.mxu0 }
 0x8ce   : > { %v2845_v18 = vpack.c.bf16 %v2831_v27, %v2830_v48  ;;  %v2829_v51 = vadd.f32 %v2723_v23, %v5770_v2 }
 0x8cf   : > { %v3694_v38 = vpop.f32.mrf.mxu0 }
 0x8d0   : > { %v2844_v57 = vpack.c.bf16 %v2829_v51, %v2828_v44  ;;  %v2834_v12 = vadd.f32 %v3694_v38, %v5785_v7 }
 0x8d1   : > { %v2736_v1 = vpop.f32.mrf.mxu0 }
 0x8d2   : > { %3728 = vmatprep.mubr.bf16.mxu0 %v2844_v57  ;;  %v2832_v58 = vadd.f32 %v2736_v1, %v5788_v55 }
 0x8d3   : > { %v3695_v40 = vpop.f32.mrf.mxu0  ;;  %3729 = vmatmul.mubr.bf16.vlgmr.msra.gmra.mxu0 %v2845_v18 }
 0x8d4   : > { %v2835_v10 = vadd.f32 %v3695_v40, %v5791_v34 }
 0x8d5   : > { %v2739_v15 = vpop.f32.mrf.mxu0 }
 0x8d6   : > { %v2847_v25 = vpack.c.bf16 %v2835_v10, %v2834_v12  ;;  %v2833_v49 = vadd.f32 %v2739_v15, %v5794_v14 }
 0x8d7   : > { %v3706_v13 = vpop.f32.mrf.mxu1 }
 0x8d8   : > { %v2846_v9 = vpack.c.bf16 %v2833_v49, %v2832_v58  ;;  %v2838_v4 = vadd.f32 %v3706_v13, %v5773_v39 }
 0x8d9   : > { %v2797_v19 = vpop.f32.mrf.mxu1 }
 0x8da   : > { %3732 = vmatprep.mubr.bf16.mxu0 %v2846_v9  ;;  %v2836_v7 = vadd.f32 %v2797_v19, %v5776_v43 }
 0x8db   : > { %v3707_v2 = vpop.f32.mrf.mxu1  ;;  %3733 = vmatmul.mubr.bf16.gmra.mxu0 %v2847_v25 }
 0x8dc   : > { %v2839_v0 = vadd.f32 %v3707_v2, %v5779_v33 }
 0x8dd   : > { %v2800_v32 = vpop.f32.mrf.mxu1 }
 0x8de   : > { %v2849_v34 = vpack.c.bf16 %v2839_v0, %v2838_v4  ;;  %v2837_v5 = vadd.f32 %v2800_v32, %v5782_v6  ;;  %v3246_v6 = vld [vmem:[%s6050_s3] ss:$0 sm:$0xff] }
 0x8df   : > { %v3710_v55 = vpop.f32.mrf.mxu1 }
 0x8e0   : > { %v2848_v8 = vpack.c.bf16 %v2837_v5, %v2836_v7  ;;  %v2842_v45 = vadd.f32 %v3710_v55, %v5797_v41 }
 0x8e1   : > { %v2813_v14 = vpop.f32.mrf.mxu1 }
 0x8e2   : > { %3736 = vmatprep.mubr.bf16.mxu0 %v2848_v8  ;;  %v2840_v33 = vadd.f32 %v2813_v14, %v5800_v16 }
 0x8e3   : > { %v3711_v63 = vpop.f32.mrf.mxu1  ;;  %3737 = vmatmul.mubr.bf16.gmra.mxu0 %v2849_v34 }
 0x8e4   : > { %v2843_v62 = vadd.f32 %v3711_v63, %v5804_v50 }
 0x8e5   : > { %v2816_v39 = vpop.f32.mrf.mxu1 }
 0x8e6   : > { %v2851_v35 = vpack.c.bf16 %v2843_v62, %v2842_v45  ;;  %v2841_v43 = vadd.f32 %v2816_v39, %v5809_v47 }
 0x8e8   : > { %v2850_v29 = vpack.c.bf16 %v2841_v43, %v2840_v33 }
 0x8ea   : > { %3740 = vmatprep.mubr.bf16.mxu0 %v2850_v29 }
 0x8eb   : > { %3741 = vmatmul.mubr.bf16.gmra.mxu0 %v2851_v35 }
 0x993   : > { %v3730_v37 = vpop.f32.mrf.mxu0 }
 0x994   : > { %v2966_v28 = vadd.f32 %v3730_v37, %v3246_v6 }
 0x995   : > { %v2957_v36 = vpop.f32.mrf.mxu0 }
 0x996   : > { %3022 = vst [vmem:[%s5968_s29 + $0x10] sm:$0xff] %v2966_v28  ;;  %v2958_v41 = vadd.f32 %v3246_v6, %v2957_v36 }
 0x997   : > { %v3731_v16 = vpop.f32.mrf.mxu0 }
 0x998   : > { %3020 = vst [vmem:[%s5968_s29] sm:$0xff] %v2958_v41  ;;  %v2969_v50 = vadd.f32 %v3731_v16, %v3246_v6 }
 0x999   : > { %v2960_v47 = vpop.f32.mrf.mxu0 }
 0x99a   : > { %3023 = vst [vmem:[%s5968_s29 + $0x18] sm:$0xff] %v2969_v50  ;;  %v2961_v60 = vadd.f32 %v3246_v6, %v2960_v47 }
 0x99b   : > { %v3734_v21 = vpop.f32.mrf.mxu0 }
 0x99c   : > { %3021 = vst [vmem:[%s5968_s29 + $0x8] sm:$0xff] %v2961_v60  ;;  %v2982_v61 = vadd.f32 %v3734_v21, %v3246_v6 }
 0x99d   : > { %v2973_v42 = vpop.f32.mrf.mxu0 }
 0x99e   : > { %3026 = vst [vmem:[%s5968_s29 + $0x30] sm:$0xff] %v2982_v61  ;;  %v2974_v20 = vadd.f32 %v3246_v6, %v2973_v42 }
 0x99f   : > { %v3735_v59 = vpop.f32.mrf.mxu0 }
 0x9a0   : > { %3024 = vst [vmem:[%s5968_s29 + $0x20] sm:$0xff] %v2974_v20  ;;  %v2985_v54 = vadd.f32 %v3735_v59, %v3246_v6 }
 0x9a1   : > { %v2976_v17 = vpop.f32.mrf.mxu0 }
 0x9a2   : > { %3027 = vst [vmem:[%s5968_s29 + $0x38] sm:$0xff] %v2985_v54  ;;  %v2977_v56 = vadd.f32 %v3246_v6, %v2976_v17 }
 0x9a3   : > { %v3738_v24 = vpop.f32.mrf.mxu0 }
 0x9a4   : > { %3025 = vst [vmem:[%s5968_s29 + $0x28] sm:$0xff] %v2977_v56  ;;  %v2998_v31 = vadd.f32 %v3738_v24, %v3246_v6 }
 0x9a5   : > { %v2989_v53 = vpop.f32.mrf.mxu0 }
 0x9a6   : > { %3030 = vst [vmem:[%s5968_s29 + $0x50] sm:$0xff] %v2998_v31  ;;  %v2990_v46 = vadd.f32 %v3246_v6, %v2989_v53 }
 0x9a7   : > { %v3739_v26 = vpop.f32.mrf.mxu0 }
 0x9a8   : > { %3028 = vst [vmem:[%s5968_s29 + $0x40] sm:$0xff] %v2990_v46  ;;  %v3001_v22 = vadd.f32 %v3739_v26, %v3246_v6 }
 0x9a9   : > { %v2992_v3 = vpop.f32.mrf.mxu0 }
 0x9aa   : > { %3031 = vst [vmem:[%s5968_s29 + $0x58] sm:$0xff] %v3001_v22  ;;  %v2993_v30 = vadd.f32 %v3246_v6, %v2992_v3 }
 0x9ab   : > { %v3742_v52 = vpop.f32.mrf.mxu0 }
 0x9ac   : > { %3029 = vst [vmem:[%s5968_s29 + $0x48] sm:$0xff] %v2993_v30  ;;  %v3014_v11 = vadd.f32 %v3742_v52, %v3246_v6 }
 0x9ad   : > { %v3005_v48 = vpop.f32.mrf.mxu0 }
 0x9ae   : > { %3034 = vst [vmem:[%s5968_s29 + $0x70] sm:$0xff] %v3014_v11  ;;  %v3006_v27 = vadd.f32 %v3246_v6, %v3005_v48 }
 0x9af   : > { %v3743_v23 = vpop.f32.mrf.mxu0 }
 0x9b0   : > { %3032 = vst [vmem:[%s5968_s29 + $0x60] sm:$0xff] %v3006_v27  ;;  %v3017_v44 = vadd.f32 %v3743_v23, %v3246_v6 }
 0x9b1   : > { %v3008_v18 = vpop.f32.mrf.mxu0 }
 0x9b2   : > { %3035 = vst [vmem:[%s5968_s29 + $0x78] sm:$0xff] %v3017_v44  ;;  %v3009_v51 = vadd.f32 %v3246_v6, %v3008_v18 }
 0x9b4   : > { %3033 = vst [vmem:[%s5968_s29 + $0x68] sm:$0xff] %v3009_v51 }
 0x9b5   : > { %4264 = shalt.err (!%p4261_p0)
}
 0x9b6   : > { %s4265_s12 = scalar_lea.hbm %s5990_s1, 2048  ;;  %s4269_s25 = scalar_lea.hbm %s6236_s23, 8192 }
 0x9b7   : > { %p4266_p1 = scmp.ne.s32.totalorder %s5990_s1, %s4265_s12  ;;  %p4270_p10 = scmp.lt.s32.totalorder %s5990_s1, %s6236_s23 }
 0x9b8   : > { %p4271_p11 = scmp.lt.s32.totalorder %s4269_s25, %s4265_s12 }
 0x9b9   : > { %p4267_p4 = pnand %p4266_p1, %p4504_p5 }
 0x9ba   : > { %p4272_p7 = por %p4271_p11, %p4270_p10 }
 0x9bb   : > { %p4268_p6 = pneg %p4267_p4 }
 0x9bd   : > { %p4273_p8 = pnand %p4272_p7, %p4268_p6 }
 0x9bf   : > { %4276 = shalt.err (!%p4273_p8)
}
 0x9c0   : > { %s4363_s8 = smov 128   ;;  %s4364_s14 = smov 8  }
 0x9c1   : > { %3770 = dma.vmem_to_hbm [thread:$0]  (%p4504_p5), %s5992_s6, 2048, %s5990_s1, %s3037_s24, %s4363_s8, %s4363_s8, %s4364_s14  }
 0x9c2 PF: > { %s6237_s30 = sld [smem:[#allocation12_spill]]  ;;  %p3792_p9 = scmp.ge.s32.totalorder %s4351_s22, 2 }
 0x9c3   : > { %s6238_s26 = sld [smem:[#allocation13_spill]] }
 0x9c8   : > { %s3068_s18 = sand.u32 1, %s6237_s30  }
 0x9c9   : > { %p6239_p2 = scmp.ne.s32.totalorder %s6238_s26, 0  ;;  %s3069_s19 = scalar_lea.sflag [#allocation4], %s3068_s18 }
 0x9cb   : > { %p3784_p12 = pnand %p3792_p9, %p6239_p2 }
 0x9cd   : > { %p3785_p13 = pneg %p3784_p12 }
 0x9cf   : > { %4318 = dma.done.wait (%p3785_p13), %s3069_s19, 2048  }
 0x9d0   : > { %4320 = vsyncadd (%p3785_p13), %s3069_s19, 4294965248  ;;  %s21_s22 = sadd.s32 1, %s4351_s22   ;;  %s6240_s7 = sld [smem:[#allocation14_spill]] }
 0x9d1   : > { %p18_p3 = scmp.ge.s32.totalorder %s21_s22, 6   ;;  %s6241_s15 = smov %s4327_s16 }
 0x9d2   : > { %s6242_s16 = smov %s4331_s17  ;;  %s6243_s17 = smov %s4517_s2 }
 0x9d3   : > { %s6244_s18 = smov %s4343_s20  ;;  %s6245_s19 = smov %s4347_s21 }
 0x9d4   : > { %s6247_s21 = smov %s6253_s9  ;;  %20 = sbr.rel (!%p18_p3) target bundleno = 12 (0xc), region = 89 }
 0x9d6   : > { %s6246_s20 = smov %s6240_s7 }
 0x9d9   :  { %3074 = vsyncpa [#allocation3], 1 }
 0x9da   :  { %3076 = vsyncpa [#allocation3 + $0x1], 1 }
 0x9db   :  { %3077 = vsyncpa [#allocation6], 1 }
 0x9dc   :  { %3078 = vsyncpa [#allocation4], 1 }
 0x9dd   :  { %3080 = vsyncpa [#allocation4 + $0x1], 1 }

</bundles_post_ra>
